<compile_context>
chip_gen: v6e
topology: v6e:2x2x1
jax: 0.10.0
libtpu: 0.0.40
codegen_flags: <defaults>
</compile_context>

<pallas_src>
import math

import jax
import jax.numpy as jnp
from jax.experimental import pallas as pl
from jax.experimental.pallas import tpu as pltpu


# ---------------------------------------------------------------------------
# Fused Pallas kernel: 1x1 reduce conv + rearrange + memory module
# ---------------------------------------------------------------------------
def _temporal_branch_kernel(x_ref, w_ref, proto_ref, out_ref, att_ref, xmem_ref):
    # x_ref:     (1, N2, C, HW)   bf16  -- one batch element, N2 = 2*num_frames
    # w_ref:     (Cout, C)        bf16  -- 1x1 reduce conv weight (no bias)
    # proto_ref: (P, HW)          bf16  -- memory prototypes
    # out_ref:   (1, N2*Cout, HW) f32   -- memory-module output
    # att_ref:   (1, N2*Cout, P)  f32   -- addressing weights
    # xmem_ref:  (N2*Cout, HW)    f32 VMEM scratch (rearranged conv output)
    n2 = x_ref.shape[1]
    cout = w_ref.shape[0]
    w = w_ref[...]
    protos = proto_ref[...]

    # 1x1 reduce conv, one frame at a time (static unroll over N2 = 8 frames).
    # Rows land in '(N C)' order, i.e. exactly
    # rearrange('(B N) C H W -> B (N C) (H W)').
    for n in range(n2):
        y_n = jnp.dot(w, x_ref[0, n], preferred_element_type=jnp.float32)  # (Cout, HW)
        xmem_ref[pl.ds(n * cout, cout), :] = y_n

    x_mem = xmem_ref[...]                                       # (R, HW) f32

    # Memory addressing: att = softmax(x_mem @ protos^T) over the proto axis.
    logits = jnp.einsum(
        "rp,mp->rm", x_mem.astype(jnp.bfloat16), protos,
        preferred_element_type=jnp.float32,
    )                                                           # (R, P)
    m = jnp.max(logits, axis=-1, keepdims=True)
    e = jnp.exp(logits - m)
    att = e * pl.reciprocal(jnp.sum(e, axis=-1, keepdims=True), approx=True)

    # Memory readout: output = att @ protos.
    out = jnp.dot(att.astype(jnp.bfloat16), protos,
                  preferred_element_type=jnp.float32)           # (R, HW)

    out_ref[0] = out
    att_ref[0] = att


def _fused_reduce_mem(x, reduce_w, protos):
    """x: (B, N2, C, HW) bf16; reduce_w: (Cout, C) bf16; protos: (P, HW) bf16."""
    B, N2, C, HW = x.shape
    Cout = reduce_w.shape[0]
    P = protos.shape[0]
    R = N2 * Cout

    return pl.pallas_call(
        _temporal_branch_kernel,
        out_shape=(
            jax.ShapeDtypeStruct((B, R, HW), jnp.float32),   # memory output
            jax.ShapeDtypeStruct((B, R, P), jnp.float32),    # attention weights
        ),
        grid_spec=pltpu.PrefetchScalarGridSpec(
            num_scalar_prefetch=0,
            grid=(B,),
            in_specs=[
                pl.BlockSpec((1, N2, C, HW), lambda b: (b, 0, 0, 0)),
                pl.BlockSpec((Cout, C), lambda b: (0, 0)),
                pl.BlockSpec((P, HW), lambda b: (0, 0)),
            ],
            out_specs=[
                pl.BlockSpec((1, R, HW), lambda b: (b, 0, 0)),
                pl.BlockSpec((1, R, P), lambda b: (b, 0, 0)),
            ],
            scratch_shapes=[pltpu.VMEM((R, HW), jnp.float32)],
        ),
        compiler_params=pltpu.CompilerParams(
            dimension_semantics=("parallel",),
        ),
    )(x, reduce_w, protos)


# ---------------------------------------------------------------------------
# JAX glue: temporal shift (pure data movement) + model forward
# ---------------------------------------------------------------------------
def temporal_shift_left(x_btchw, fold):
    """x: (B, T, C, H, W).  First `fold` channels take the next frame's values
    (zeros at the last frame); remaining channels pass through unchanged."""
    head = x_btchw[:, :, :fold]
    head = jnp.concatenate([head[:, 1:], jnp.zeros_like(head[:, :1])], axis=1)
    return jnp.concatenate([head, x_btchw[:, :, fold:]], axis=2)


def new_temporal_branch(params, x, *, num_frames=4, n_div=4,
                        with_temporal_shift=True):
    """x: (B*num_frames, 512, H, W) with H*W == fea_dim (=196 -> H=W=14)."""
    BN, C, H, W = x.shape
    batch = BN // num_frames
    assert C == 512 and H * W == params["protos"].shape[1]

    if with_temporal_shift:
        xv = x.reshape(batch, num_frames, C, H, W)
        x2 = jnp.concatenate(
            [temporal_shift_left(xv, C // n_div), xv], axis=1)   # (B, 2T, C, H, W)
    else:
        x2 = x.reshape(batch, num_frames, C, H, W)

    N2 = x2.shape[1]
    x2 = x2.reshape(batch, N2, C, H * W).astype(jnp.bfloat16)

    out, att = _fused_reduce_mem(x2, params["reduce_w"], params["protos"])

    return {
        "output": out.reshape(batch, -1, H, W),   # (B, 512, 14, 14)
        "att": att,                               # (B, 512, num_protos)
    }


# ---------------------------------------------------------------------------
# Deterministic parameter init (weights stored in bfloat16 per perf review)
# ---------------------------------------------------------------------------
def init_params(key, *, num_protos=128, fea_dim=196, with_temporal_shift=True):
    k_w, k_p = jax.random.split(key)
    C = 512
    cout = C // (8 if with_temporal_shift else 4)
    bound = 1.0 / math.sqrt(C)   # Conv2d(512, cout, 1, bias=False), fan_in = 512
    reduce_w = jax.random.uniform(k_w, (cout, C), jnp.float32, -bound, bound)
    protos = jax.random.normal(k_p, (num_protos, fea_dim), jnp.float32)
    return {
        "reduce_w": reduce_w.astype(jnp.bfloat16),
        "protos": protos.astype(jnp.bfloat16),
    }


if __name__ == "__main__":
    key = jax.random.PRNGKey(0)
    k_param, k_x = jax.random.split(key)

    num_frames, batch, num_protos = 4, 2, 128
    params = init_params(k_param, num_protos=num_protos)

    # Shapes implied by the module: C=512 fixed by the reduce conv, and
    # fea_dim=196 forces H*W=196 -> 14x14 spatial.
    x = jax.random.normal(
        k_x, (batch * num_frames, 512, 14, 14), dtype=jnp.float32)

    res = new_temporal_branch(params, x, num_frames=num_frames)
    jax.block_until_ready(res)

    assert res["output"].shape == (batch, 512, 14, 14)
    assert res["att"].shape == (batch, 512, num_protos)
    assert jnp.isfinite(res["output"]).all()
    assert jnp.isfinite(res["att"]).all()
    print("KERNEL_OK")
</pallas_src>

<mosaic_0001>
module attributes {stable_mosaic.version = 11 : i64} {
  func.func @_temporal_branch_kernel(%arg0: i32, %arg1: memref<1x8x512x196xbf16, #tpu.memory_space<vmem>>, %arg2: memref<64x512xbf16, #tpu.memory_space<vmem>>, %arg3: memref<128x196xbf16, #tpu.memory_space<vmem>>, %arg4: memref<1x512x196xf32, #tpu.memory_space<vmem>>, %arg5: memref<1x512x128xf32, #tpu.memory_space<vmem>>, %arg6: memref<512x196xf32, #tpu.memory_space<vmem>>) attributes {dimension_semantics = [#tpu.dimension_semantics<parallel>], iteration_bounds = array<i64: 2>, scalar_prefetch = 0 : i64, scratch_operands = 1 : i64, tpu.core_type = #tpu.core_type<tc>, window_params = [{transform_indices = @transform_0, window_bounds = array<i64: 1, 8, 512, 196>}, {pipeline_mode = #tpu.pipeline_mode<synchronous>, transform_indices = @transform_1, window_bounds = array<i64: 64, 512>}, {pipeline_mode = #tpu.pipeline_mode<synchronous>, transform_indices = @transform_2, window_bounds = array<i64: 128, 196>}, {transform_indices = @transform_3, window_bounds = array<i64: 1, 512, 196>}, {transform_indices = @transform_4, window_bounds = array<i64: 1, 512, 128>}]} {
    %c0 = arith.constant 0 : index
    %c0_0 = arith.constant 0 : index
    %0 = vector.load %arg2[%c0, %c0_0] : memref<64x512xbf16, #tpu.memory_space<vmem>>, vector<64x512xbf16>
    %c0_1 = arith.constant 0 : index
    %c0_2 = arith.constant 0 : index
    %1 = vector.load %arg3[%c0_1, %c0_2] : memref<128x196xbf16, #tpu.memory_space<vmem>>, vector<128x196xbf16>
    %c0_3 = arith.constant 0 : index
    %c0_4 = arith.constant 0 : index
    %c0_5 = arith.constant 0 : index
    %c0_6 = arith.constant 0 : index
    %2 = vector.load %arg1[%c0_3, %c0_4, %c0_5, %c0_6] : memref<1x8x512x196xbf16, #tpu.memory_space<vmem>>, vector<1x1x512x196xbf16>
    %3 = vector.shape_cast %2 : vector<1x1x512x196xbf16> to vector<512x196xbf16>
    %cst = arith.constant dense<0.000000e+00> : vector<64x196xf32>
    %4 = tpu.matmul %0, %3, %cst {dimension_numbers = #tpu.dot_dimension_numbers<[1], [0], [0], [1], [0, 0, 1, 1], [], []>} : vector<64x512xbf16>, vector<512x196xbf16>, vector<64x196xf32> -> vector<64x196xf32>
    %c0_7 = arith.constant 0 : index
    %c0_8 = arith.constant 0 : index
    %5 = vector.load %arg6[%c0_7, %c0_8] : memref<512x196xf32, #tpu.memory_space<vmem>>, vector<64x196xf32>
    tpu.vector_store %arg6[%c0_7, %c0_8], %4 {strides = array<i32>} : memref<512x196xf32, #tpu.memory_space<vmem>>, vector<64x196xf32>,
    %c0_9 = arith.constant 0 : index
    %c1 = arith.constant 1 : index
    %c0_10 = arith.constant 0 : index
    %c0_11 = arith.constant 0 : index
    %6 = vector.load %arg1[%c0_9, %c1, %c0_10, %c0_11] : memref<1x8x512x196xbf16, #tpu.memory_space<vmem>>, vector<1x1x512x196xbf16>
    %7 = vector.shape_cast %6 : vector<1x1x512x196xbf16> to vector<512x196xbf16>
    %cst_12 = arith.constant dense<0.000000e+00> : vector<64x196xf32>
    %8 = tpu.matmul %0, %7, %cst_12 {dimension_numbers = #tpu.dot_dimension_numbers<[1], [0], [0], [1], [0, 0, 1, 1], [], []>} : vector<64x512xbf16>, vector<512x196xbf16>, vector<64x196xf32> -> vector<64x196xf32>
    %c64 = arith.constant 64 : index
    %c0_13 = arith.constant 0 : index
    %9 = vector.load %arg6[%c64, %c0_13] : memref<512x196xf32, #tpu.memory_space<vmem>>, vector<64x196xf32>
    tpu.vector_store %arg6[%c64, %c0_13], %8 {strides = array<i32>} : memref<512x196xf32, #tpu.memory_space<vmem>>, vector<64x196xf32>,
    %c0_14 = arith.constant 0 : index
    %c2 = arith.constant 2 : index
    %c0_15 = arith.constant 0 : index
    %c0_16 = arith.constant 0 : index
    %10 = vector.load %arg1[%c0_14, %c2, %c0_15, %c0_16] : memref<1x8x512x196xbf16, #tpu.memory_space<vmem>>, vector<1x1x512x196xbf16>
    %11 = vector.shape_cast %10 : vector<1x1x512x196xbf16> to vector<512x196xbf16>
    %cst_17 = arith.constant dense<0.000000e+00> : vector<64x196xf32>
    %12 = tpu.matmul %0, %11, %cst_17 {dimension_numbers = #tpu.dot_dimension_numbers<[1], [0], [0], [1], [0, 0, 1, 1], [], []>} : vector<64x512xbf16>, vector<512x196xbf16>, vector<64x196xf32> -> vector<64x196xf32>
    %c128 = arith.constant 128 : index
    %c0_18 = arith.constant 0 : index
    %13 = vector.load %arg6[%c128, %c0_18] : memref<512x196xf32, #tpu.memory_space<vmem>>, vector<64x196xf32>
    tpu.vector_store %arg6[%c128, %c0_18], %12 {strides = array<i32>} : memref<512x196xf32, #tpu.memory_space<vmem>>, vector<64x196xf32>,
    %c0_19 = arith.constant 0 : index
    %c3 = arith.constant 3 : index
    %c0_20 = arith.constant 0 : index
    %c0_21 = arith.constant 0 : index
    %14 = vector.load %arg1[%c0_19, %c3, %c0_20, %c0_21] : memref<1x8x512x196xbf16, #tpu.memory_space<vmem>>, vector<1x1x512x196xbf16>
    %15 = vector.shape_cast %14 : vector<1x1x512x196xbf16> to vector<512x196xbf16>
    %cst_22 = arith.constant dense<0.000000e+00> : vector<64x196xf32>
    %16 = tpu.matmul %0, %15, %cst_22 {dimension_numbers = #tpu.dot_dimension_numbers<[1], [0], [0], [1], [0, 0, 1, 1], [], []>} : vector<64x512xbf16>, vector<512x196xbf16>, vector<64x196xf32> -> vector<64x196xf32>
    %c192 = arith.constant 192 : index
    %c0_23 = arith.constant 0 : index
    %17 = vector.load %arg6[%c192, %c0_23] : memref<512x196xf32, #tpu.memory_space<vmem>>, vector<64x196xf32>
    tpu.vector_store %arg6[%c192, %c0_23], %16 {strides = array<i32>} : memref<512x196xf32, #tpu.memory_space<vmem>>, vector<64x196xf32>,
    %c0_24 = arith.constant 0 : index
    %c4 = arith.constant 4 : index
    %c0_25 = arith.constant 0 : index
    %c0_26 = arith.constant 0 : index
    %18 = vector.load %arg1[%c0_24, %c4, %c0_25, %c0_26] : memref<1x8x512x196xbf16, #tpu.memory_space<vmem>>, vector<1x1x512x196xbf16>
    %19 = vector.shape_cast %18 : vector<1x1x512x196xbf16> to vector<512x196xbf16>
    %cst_27 = arith.constant dense<0.000000e+00> : vector<64x196xf32>
    %20 = tpu.matmul %0, %19, %cst_27 {dimension_numbers = #tpu.dot_dimension_numbers<[1], [0], [0], [1], [0, 0, 1, 1], [], []>} : vector<64x512xbf16>, vector<512x196xbf16>, vector<64x196xf32> -> vector<64x196xf32>
    %c256 = arith.constant 256 : index
    %c0_28 = arith.constant 0 : index
    %21 = vector.load %arg6[%c256, %c0_28] : memref<512x196xf32, #tpu.memory_space<vmem>>, vector<64x196xf32>
    tpu.vector_store %arg6[%c256, %c0_28], %20 {strides = array<i32>} : memref<512x196xf32, #tpu.memory_space<vmem>>, vector<64x196xf32>,
    %c0_29 = arith.constant 0 : index
    %c5 = arith.constant 5 : index
    %c0_30 = arith.constant 0 : index
    %c0_31 = arith.constant 0 : index
    %22 = vector.load %arg1[%c0_29, %c5, %c0_30, %c0_31] : memref<1x8x512x196xbf16, #tpu.memory_space<vmem>>, vector<1x1x512x196xbf16>
    %23 = vector.shape_cast %22 : vector<1x1x512x196xbf16> to vector<512x196xbf16>
    %cst_32 = arith.constant dense<0.000000e+00> : vector<64x196xf32>
    %24 = tpu.matmul %0, %23, %cst_32 {dimension_numbers = #tpu.dot_dimension_numbers<[1], [0], [0], [1], [0, 0, 1, 1], [], []>} : vector<64x512xbf16>, vector<512x196xbf16>, vector<64x196xf32> -> vector<64x196xf32>
    %c320 = arith.constant 320 : index
    %c0_33 = arith.constant 0 : index
    %25 = vector.load %arg6[%c320, %c0_33] : memref<512x196xf32, #tpu.memory_space<vmem>>, vector<64x196xf32>
    tpu.vector_store %arg6[%c320, %c0_33], %24 {strides = array<i32>} : memref<512x196xf32, #tpu.memory_space<vmem>>, vector<64x196xf32>,
    %c0_34 = arith.constant 0 : index
    %c6 = arith.constant 6 : index
    %c0_35 = arith.constant 0 : index
    %c0_36 = arith.constant 0 : index
    %26 = vector.load %arg1[%c0_34, %c6, %c0_35, %c0_36] : memref<1x8x512x196xbf16, #tpu.memory_space<vmem>>, vector<1x1x512x196xbf16>
    %27 = vector.shape_cast %26 : vector<1x1x512x196xbf16> to vector<512x196xbf16>
    %cst_37 = arith.constant dense<0.000000e+00> : vector<64x196xf32>
    %28 = tpu.matmul %0, %27, %cst_37 {dimension_numbers = #tpu.dot_dimension_numbers<[1], [0], [0], [1], [0, 0, 1, 1], [], []>} : vector<64x512xbf16>, vector<512x196xbf16>, vector<64x196xf32> -> vector<64x196xf32>
    %c384 = arith.constant 384 : index
    %c0_38 = arith.constant 0 : index
    %29 = vector.load %arg6[%c384, %c0_38] : memref<512x196xf32, #tpu.memory_space<vmem>>, vector<64x196xf32>
    tpu.vector_store %arg6[%c384, %c0_38], %28 {strides = array<i32>} : memref<512x196xf32, #tpu.memory_space<vmem>>, vector<64x196xf32>,
    %c0_39 = arith.constant 0 : index
    %c7 = arith.constant 7 : index
    %c0_40 = arith.constant 0 : index
    %c0_41 = arith.constant 0 : index
    %30 = vector.load %arg1[%c0_39, %c7, %c0_40, %c0_41] : memref<1x8x512x196xbf16, #tpu.memory_space<vmem>>, vector<1x1x512x196xbf16>
    %31 = vector.shape_cast %30 : vector<1x1x512x196xbf16> to vector<512x196xbf16>
    %cst_42 = arith.constant dense<0.000000e+00> : vector<64x196xf32>
    %32 = tpu.matmul %0, %31, %cst_42 {dimension_numbers = #tpu.dot_dimension_numbers<[1], [0], [0], [1], [0, 0, 1, 1], [], []>} : vector<64x512xbf16>, vector<512x196xbf16>, vector<64x196xf32> -> vector<64x196xf32>
    %c448 = arith.constant 448 : index
    %c0_43 = arith.constant 0 : index
    %33 = vector.load %arg6[%c448, %c0_43] : memref<512x196xf32, #tpu.memory_space<vmem>>, vector<64x196xf32>
    tpu.vector_store %arg6[%c448, %c0_43], %32 {strides = array<i32>} : memref<512x196xf32, #tpu.memory_space<vmem>>, vector<64x196xf32>,
    %c0_44 = arith.constant 0 : index
    %c0_45 = arith.constant 0 : index
    %34 = vector.load %arg6[%c0_44, %c0_45] : memref<512x196xf32, #tpu.memory_space<vmem>>, vector<512x196xf32>
    %35 = arith.truncf %34 : vector<512x196xf32> to vector<512x196xbf16>
    "tpu.trace_start"() <{level = 10 : i32, message = "rp,mp->rm"}> : () -> ()
    %cst_46 = arith.constant dense<0.000000e+00> : vector<512x128xf32>
    %36 = tpu.matmul %35, %1, %cst_46 {dimension_numbers = #tpu.dot_dimension_numbers<[1], [1], [0], [0], [0, 0, 1, 0], [], []>} : vector<512x196xbf16>, vector<128x196xbf16>, vector<512x128xf32> -> vector<512x128xf32>
    "tpu.trace_stop"() : () -> ()
    %cst_47 = arith.constant dense<0xFF800000> : vector<512xf32>
    %37 = vector.multi_reduction <maximumf>, %36, %cst_47 [1] : vector<512x128xf32> to vector<512xf32>
    %38 = vector.shape_cast %37 : vector<512xf32> to vector<512x1xf32>
    %39 = vector.broadcast %38 : vector<512x1xf32> to vector<512x128xf32>
    %40 = arith.subf %36, %39 : vector<512x128xf32>
    %41 = math.exp %40 : vector<512x128xf32>
    %cst_48 = arith.constant dense<0.000000e+00> : vector<512xf32>
    %42 = vector.multi_reduction <add>, %41, %cst_48 [1] : vector<512x128xf32> to vector<512xf32>
    %43 = vector.shape_cast %42 : vector<512xf32> to vector<512x1xf32>
    %44 = tpu.reciprocal %43 {approx = true} : vector<512x1xf32> -> vector<512x1xf32>
    %45 = vector.broadcast %44 : vector<512x1xf32> to vector<512x128xf32>
    %46 = arith.mulf %41, %45 : vector<512x128xf32>
    %47 = arith.truncf %46 : vector<512x128xf32> to vector<512x128xbf16>
    %cst_49 = arith.constant dense<0.000000e+00> : vector<512x196xf32>
    %48 = tpu.matmul %47, %1, %cst_49 {dimension_numbers = #tpu.dot_dimension_numbers<[1], [0], [0], [1], [0, 0, 1, 1], [], []>} : vector<512x128xbf16>, vector<128x196xbf16>, vector<512x196xf32> -> vector<512x196xf32>
    %c0_50 = arith.constant 0 : index
    %c0_51 = arith.constant 0 : index
    %c0_52 = arith.constant 0 : index
    %49 = vector.load %arg4[%c0_50, %c0_51, %c0_52] : memref<1x512x196xf32, #tpu.memory_space<vmem>>, vector<1x512x196xf32>
    %50 = vector.shape_cast %49 : vector<1x512x196xf32> to vector<512x196xf32>
    %51 = vector.shape_cast %48 : vector<512x196xf32> to vector<1x512x196xf32>
    tpu.vector_store %arg4[%c0_50, %c0_51, %c0_52], %51 {strides = array<i32>} : memref<1x512x196xf32, #tpu.memory_space<vmem>>, vector<1x512x196xf32>,
    %c0_53 = arith.constant 0 : index
    %c0_54 = arith.constant 0 : index
    %c0_55 = arith.constant 0 : index
    %52 = vector.load %arg5[%c0_53, %c0_54, %c0_55] : memref<1x512x128xf32, #tpu.memory_space<vmem>>, vector<1x512x128xf32>
    %53 = vector.shape_cast %52 : vector<1x512x128xf32> to vector<512x128xf32>
    %54 = vector.shape_cast %46 : vector<512x128xf32> to vector<1x512x128xf32>
    tpu.vector_store %arg5[%c0_53, %c0_54, %c0_55], %54 {strides = array<i32>} : memref<1x512x128xf32, #tpu.memory_space<vmem>>, vector<1x512x128xf32>,
    return
  }
  func.func @transform_0(%arg0: i32) -> (i32, i32, i32, i32) {
    %c0_i32 = arith.constant 0 : i32
    %c0_i32_0 = arith.constant 0 : i32
    %c0_i32_1 = arith.constant 0 : i32
    %c0_i32_2 = arith.constant 0 : i32
    return %arg0, %c0_i32, %c0_i32_0, %c0_i32_1 : i32, i32, i32, i32
  }
  func.func @transform_1(%arg0: i32) -> (i32, i32) {
    %c0_i32 = arith.constant 0 : i32
    %c0_i32_0 = arith.constant 0 : i32
    %c0_i32_1 = arith.constant 0 : i32
    return %c0_i32, %c0_i32_0 : i32, i32
  }
  func.func @transform_2(%arg0: i32) -> (i32, i32) {
    %c0_i32 = arith.constant 0 : i32
    %c0_i32_0 = arith.constant 0 : i32
    %c0_i32_1 = arith.constant 0 : i32
    return %c0_i32, %c0_i32_0 : i32, i32
  }
  func.func @transform_3(%arg0: i32) -> (i32, i32, i32) {
    %c0_i32 = arith.constant 0 : i32
    %c0_i32_0 = arith.constant 0 : i32
    %c0_i32_1 = arith.constant 0 : i32
    return %arg0, %c0_i32, %c0_i32_0 : i32, i32, i32
  }
  func.func @transform_4(%arg0: i32) -> (i32, i32, i32) {
    %c0_i32 = arith.constant 0 : i32
    %c0_i32_0 = arith.constant 0 : i32
    %c0_i32_1 = arith.constant 0 : i32
    return %arg0, %c0_i32, %c0_i32_0 : i32, i32, i32
  }
}

</mosaic_0001>

<bundles_post_ra>
// kernel: tpu_custom_call.1
= control target key start
LH: loop header
LB: loop body
LE: loop exit
PB: predicated region body
PF: predicated region fallthrough
CT: control target
= control target key end

     0   :  { %10 = vsyncpa [#allocation4], 0  ;;  %s11062_s0 = inlined_call_operand.vmem [shape: bf16[2,8,512,196], index: 0, kind: input, shape index: {}]   ;;  %s11063_s1 = inlined_call_operand.vmem [shape: bf16[64,512], index: 1, kind: input, shape index: {}]   ;;  %s11064_s2 = inlined_call_operand.vmem [shape: bf16[128,196], index: 2, kind: input, shape index: {}]   ;;  %s11065_s3 = inlined_call_operand.vmem [shape: f32[2,512,196], index: 3, kind: output, shape index: {0}]   ;;  %s11066_s4 = inlined_call_operand.hbm [shape: f32[2,512,128], index: 4, kind: output, shape index: {1}]  }
   0x1   :  { %12 = vsyncpa [#allocation4 + $0x1], 0  ;;  %s8926_s15 = smov 0   ;;  %s8928_s16 = smov 0  }
   0x2   :  { %s8930_s17 = smov 0   ;;  %s8932_s18 = smov 0  }
   0x3 LB: > { %s8947_s19 = sadd.s32 4294967295, %s8895_s18   ;;  %s6641_s20 = sadd.s32 4294967294, %s8895_s18   ;;  %s8895_s18 = sphi %s8932_s18, %s11111_s18   ;;  %s8891_s17 = sphi %s8930_s17, %s11110_s17   ;;  %s8887_s16 = sphi %s8928_s16, %s11109_s16   ;;  %s8883_s15 = sphi %s8926_s15, %s11108_s15  }
   0x4   : > { %s8951_s21 = sadd.s32 1, %s8895_s18   ;;  %s119_s22 = sadd.s32 1, %s8891_s17 }
   0x5   : > { %s116_s23 = ssub.s32 %s8895_s18, %s8951_s21  ;;  %p129_p0 = scmp.ne.s32.totalorder %s8891_s17, %s8887_s16 }
   0x6   : > { %p117_p1 = scmp.eq.s32.totalorder %s116_s23, 0  ;;  %p130_p2 = scmp.eq.s32.totalorder %s8947_s19, 1 }
   0x7   : > { %p135_p3 = scmp.ne.s32.totalorder %s8887_s16, %s8883_s15  ;;  %p136_p4 = scmp.eq.s32.totalorder %s6641_s20, 1 }
   0x8   : > { %s8962_s24 = scalar_select %p117_p1, %s8891_s17, %s119_s22  }
   0x9   : > { %p8964_p5 = por %p130_p2, %p129_p0  ;;  %p8968_p6 = por %p136_p4, %p135_p3 }
   0xa   : > { %p6644_p7 = scmp.ge.s32.totalorder %s8895_s18, 1  ;;  %p168_p8 = scmp.lt.s32.totalorder %s8895_s18, 3 }
   0xc   : > { %p169_p9 = pnand %p6644_p7, %p168_p8 }
   0xe   : > { %172 = sbr.rel (%p169_p9) target bundleno = 1688 (0x698), region = 32 }
  0x13   : > { %p199_p10 = scmp.lt.s32.totalorder %s8947_s19, 1  ;;  %v8978_v0 = vld [vmem:[%s11063_s1 + $0x4] ss:$16 sps:$4 sm:$0xff]   ;;  %v8983_v1 = vld [vmem:[%s11063_s1 + $0xc] ss:$16 sps:$4 sm:$0xff]   ;;  %vm853_vm0 = vcmask 556032  }
  0x14   : > { %738 = vmatprep.mubr.bf16.mxu0 %v8978_v0  ;;  %811 = vmatprep.mubr.bf16.mxu1 %v8983_v1 }
  0x15   : > { %s8986_s5 = scalar_select %p199_p10, %s8947_s19, 1 }
  0x17   : > { %s7687_s6 = sshll.u32 %s8986_s5, 12  ;;  %s7688_s8 = sshll.u32 %s8986_s5, 10 }
  0x18   : > { %s8994_s9 = scalar_lea.vmem %s11062_s0, %s7687_s6  ;;  %s10714_s12 = scalar_lea.vmem %s11065_s3, %s7688_s8 }
  0x19   : > { %v7732_v2 = vld [vmem:[%s8994_s9 + $0x74] ss:$8 sps:$4 sm:$0xff]   ;;  %v7736_v4 = vld [vmem:[%s8994_s9 + $0x70] ss:$8 sps:$4 sm:$0xff]   ;;  %v7738_v6 = vld [vmem:[%s8994_s9 + $0x64] ss:$8 sps:$4 sm:$0xff]  }
  0x1a   : > { %v7734_v3 = vld [vmem:[%s8994_s9 + $0x174] ss:$8 sps:$4 sm:$0xff]   ;;  %706 = vmatprep.subr.bf16.mxu0 %v7732_v2  ;;  %v7737_v5 = vld [vmem:[%s8994_s9 + $0x170] ss:$8 sps:$4 sm:$0xff]   ;;  %v7740_v7 = vld [vmem:[%s8994_s9 + $0x164] ss:$8 sps:$4 sm:$0xff]  }
  0x1b   : > { %779 = vmatprep.subr.bf16.mxu1 %v7734_v3  ;;  %707 = vmatpush1.bf16.msra.mxu0 %v7736_v4  ;;  %v7742_v8 = vld [vmem:[%s8994_s9 + $0x60] ss:$8 sps:$4 sm:$0xff]   ;;  %v7744_v10 = vld [vmem:[%s8994_s9 + $0x54] ss:$8 sps:$4 sm:$0xff]   ;;  %v7748_v12 = vld [vmem:[%s8994_s9 + $0x50] ss:$8 sps:$4 sm:$0xff]  }
  0x1c   : > { %780 = vmatpush1.bf16.msra.mxu1 %v7737_v5  ;;  %708 = vmatprep.subr.bf16.mxu0 %v7738_v6  ;;  %v7743_v9 = vld [vmem:[%s8994_s9 + $0x160] ss:$8 sps:$4 sm:$0xff]   ;;  %v7746_v11 = vld [vmem:[%s8994_s9 + $0x154] ss:$8 sps:$4 sm:$0xff]   ;;  %v7749_v13 = vld [vmem:[%s8994_s9 + $0x150] ss:$8 sps:$4 sm:$0xff]  }
  0x1d   : > { %781 = vmatprep.subr.bf16.mxu1 %v7740_v7  ;;  %v7750_v14 = vld [vmem:[%s8994_s9 + $0x44] ss:$8 sps:$4 sm:$0xff]   ;;  %v7754_v16 = vld [vmem:[%s8994_s9 + $0x40] ss:$8 sps:$4 sm:$0xff]   ;;  %v7756_v18 = vld [vmem:[%s8994_s9 + $0x34] ss:$8 sps:$4 sm:$0xff]  }
  0x1e   : > { %v7752_v15 = vld [vmem:[%s8994_s9 + $0x144] ss:$8 sps:$4 sm:$0xff]   ;;  %v7755_v17 = vld [vmem:[%s8994_s9 + $0x140] ss:$8 sps:$4 sm:$0xff]   ;;  %v7758_v19 = vld [vmem:[%s8994_s9 + $0x134] ss:$8 sps:$4 sm:$0xff]  }
  0x1f   : > { %709 = vmatpush1.bf16.msra.mxu0 %v7742_v8  ;;  %v7760_v20 = vld [vmem:[%s8994_s9 + $0x30] ss:$8 sps:$4 sm:$0xff]   ;;  %v7762_v22 = vld [vmem:[%s8994_s9 + $0x24] ss:$8 sps:$4 sm:$0xff]   ;;  %v7766_v24 = vld [vmem:[%s8994_s9 + $0x20] ss:$8 sps:$4 sm:$0xff]  }
  0x20   : > { %782 = vmatpush1.bf16.msra.mxu1 %v7743_v9  ;;  %710 = vmatprep.subr.bf16.mxu0 %v7744_v10  ;;  %v7761_v21 = vld [vmem:[%s8994_s9 + $0x130] ss:$8 sps:$4 sm:$0xff]   ;;  %v7764_v23 = vld [vmem:[%s8994_s9 + $0x124] ss:$8 sps:$4 sm:$0xff]   ;;  %v7767_v25 = vld [vmem:[%s8994_s9 + $0x120] ss:$8 sps:$4 sm:$0xff]  }
  0x21   : > { %783 = vmatprep.subr.bf16.mxu1 %v7746_v11  ;;  %v7768_v26 = vld [vmem:[%s8994_s9 + $0x14] ss:$8 sps:$4 sm:$0xff]   ;;  %v7772_v28 = vld [vmem:[%s8994_s9 + $0x10] ss:$8 sps:$4 sm:$0xff]   ;;  %v7774_v30 = vld [vmem:[%s8994_s9 + $0x4] ss:$8 sps:$4 sm:$0xff]  }
  0x22   : > { %v7770_v27 = vld [vmem:[%s8994_s9 + $0x114] ss:$8 sps:$4 sm:$0xff]   ;;  %v7773_v29 = vld [vmem:[%s8994_s9 + $0x110] ss:$8 sps:$4 sm:$0xff]   ;;  %v7776_v31 = vld [vmem:[%s8994_s9 + $0x104] ss:$8 sps:$4 sm:$0xff]  }
  0x23   : > { %711 = vmatpush1.bf16.msra.mxu0 %v7748_v12  ;;  %v7778_v32 = vld [vmem:[%s8994_s9] ss:$8 sps:$4 sm:$0xff]   ;;  %v7780_v34 = vld [vmem:[%s8994_s9 + $0xf4] ss:$8 sps:$4 sm:$0xff]   ;;  %v7784_v36 = vld [vmem:[%s8994_s9 + $0xf0] ss:$8 sps:$4 sm:$0xff]  }
  0x24   : > { %784 = vmatpush1.bf16.msra.mxu1 %v7749_v13  ;;  %712 = vmatprep.subr.bf16.mxu0 %v7750_v14  ;;  %v7779_v33 = vld [vmem:[%s8994_s9 + $0x100] ss:$8 sps:$4 sm:$0xff]   ;;  %v7782_v35 = vld [vmem:[%s8994_s9 + $0x1f4] ss:$8 sps:$4 sm:$0xff]   ;;  %v7785_v37 = vld [vmem:[%s8994_s9 + $0x1f0] ss:$8 sps:$4 sm:$0xff]  }
  0x25   : > { %785 = vmatprep.subr.bf16.mxu1 %v7752_v15  ;;  %v7786_v38 = vld [vmem:[%s8994_s9 + $0xe4] ss:$8 sps:$4 sm:$0xff]   ;;  %v7790_v40 = vld [vmem:[%s8994_s9 + $0xe0] ss:$8 sps:$4 sm:$0xff]   ;;  %v7792_v42 = vld [vmem:[%s8994_s9 + $0xd4] ss:$8 sps:$4 sm:$0xff]  }
  0x26   : > { %v7788_v39 = vld [vmem:[%s8994_s9 + $0x1e4] ss:$8 sps:$4 sm:$0xff]   ;;  %v7791_v41 = vld [vmem:[%s8994_s9 + $0x1e0] ss:$8 sps:$4 sm:$0xff]   ;;  %v7794_v43 = vld [vmem:[%s8994_s9 + $0x1d4] ss:$8 sps:$4 sm:$0xff]  }
  0x27   : > { %713 = vmatpush1.bf16.msra.mxu0 %v7754_v16  ;;  %v7796_v44 = vld [vmem:[%s8994_s9 + $0xd0] ss:$8 sps:$4 sm:$0xff]   ;;  %v7798_v46 = vld [vmem:[%s8994_s9 + $0xc4] ss:$8 sps:$4 sm:$0xff]   ;;  %v7802_v48 = vld [vmem:[%s8994_s9 + $0xc0] ss:$8 sps:$4 sm:$0xff]  }
  0x28   : > { %786 = vmatpush1.bf16.msra.mxu1 %v7755_v17  ;;  %714 = vmatprep.subr.bf16.mxu0 %v7756_v18  ;;  %v7797_v45 = vld [vmem:[%s8994_s9 + $0x1d0] ss:$8 sps:$4 sm:$0xff]   ;;  %v7800_v47 = vld [vmem:[%s8994_s9 + $0x1c4] ss:$8 sps:$4 sm:$0xff]   ;;  %v7803_v49 = vld [vmem:[%s8994_s9 + $0x1c0] ss:$8 sps:$4 sm:$0xff]  }
  0x29   : > { %787 = vmatprep.subr.bf16.mxu1 %v7758_v19  ;;  %v7804_v50 = vld [vmem:[%s8994_s9 + $0xb4] ss:$8 sps:$4 sm:$0xff]   ;;  %v7808_v52 = vld [vmem:[%s8994_s9 + $0xb0] ss:$8 sps:$4 sm:$0xff]   ;;  %v7810_v54 = vld [vmem:[%s8994_s9 + $0xa4] ss:$8 sps:$4 sm:$0xff]  }
  0x2a   : > { %v7806_v51 = vld [vmem:[%s8994_s9 + $0x1b4] ss:$8 sps:$4 sm:$0xff]   ;;  %v7809_v53 = vld [vmem:[%s8994_s9 + $0x1b0] ss:$8 sps:$4 sm:$0xff]   ;;  %v7812_v55 = vld [vmem:[%s8994_s9 + $0x1a4] ss:$8 sps:$4 sm:$0xff]  }
  0x2b   : > { %715 = vmatpush1.bf16.msra.mxu0 %v7760_v20  ;;  %v7814_v56 = vld [vmem:[%s8994_s9 + $0xa0] ss:$8 sps:$4 sm:$0xff]   ;;  %v7816_v58 = vld [vmem:[%s8994_s9 + $0x94] ss:$8 sps:$4 sm:$0xff]   ;;  %v7820_v60 = vld [vmem:[%s8994_s9 + $0x90] ss:$8 sps:$4 sm:$0xff]  }
  0x2c   : > { %788 = vmatpush1.bf16.msra.mxu1 %v7761_v21  ;;  %716 = vmatprep.subr.bf16.mxu0 %v7762_v22  ;;  %v7815_v57 = vld [vmem:[%s8994_s9 + $0x1a0] ss:$8 sps:$4 sm:$0xff]   ;;  %v7818_v59 = vld [vmem:[%s8994_s9 + $0x194] ss:$8 sps:$4 sm:$0xff]   ;;  %v7821_v61 = vld [vmem:[%s8994_s9 + $0x190] ss:$8 sps:$4 sm:$0xff]  }
  0x2d   : > { %789 = vmatprep.subr.bf16.mxu1 %v7764_v23  ;;  %v7822_v62 = vld [vmem:[%s8994_s9 + $0x84] ss:$8 sps:$4 sm:$0xff]   ;;  %v7826_v2 = vld [vmem:[%s8994_s9 + $0x80] ss:$8 sps:$4 sm:$0xff]   ;;  %v7836_v4 = vld [vmem:[%s8994_s9 + $0x274] ss:$8 sps:$4 sm:$0xff]  }
  0x2e   : > { %v7824_v63 = vld [vmem:[%s8994_s9 + $0x184] ss:$8 sps:$4 sm:$0xff]   ;;  %v7827_v3 = vld [vmem:[%s8994_s9 + $0x180] ss:$8 sps:$4 sm:$0xff]   ;;  %v7839_v5 = vld [vmem:[%s8994_s9 + $0x374] ss:$8 sps:$4 sm:$0xff]  }
  0x2f   : > { %717 = vmatpush1.bf16.msra.mxu0 %v7766_v24  ;;  %v9065_v6 = vld [vmem:[%s11063_s1] ss:$16 sps:$4 sm:$0xff]   ;;  %v9070_v7 = vld [vmem:[%s11063_s1 + $0x8] ss:$16 sps:$4 sm:$0xff]   ;;  %v7842_v10 = vld [vmem:[%s8994_s9 + $0x264] ss:$8 sps:$4 sm:$0xff]  }
  0x30   : > { %790 = vmatpush1.bf16.msra.mxu1 %v7767_v25  ;;  %718 = vmatprep.subr.bf16.mxu0 %v7768_v26  ;;  %v7834_v8 = vld [vmem:[%s8994_s9 + $0x270] ss:$8 sps:$4 sm:$0xff]   ;;  %v7845_v11 = vld [vmem:[%s8994_s9 + $0x364] ss:$8 sps:$4 sm:$0xff]   ;;  %v7840_v14 = vld [vmem:[%s8994_s9 + $0x260] ss:$8 sps:$4 sm:$0xff]  }
  0x31   : > { %791 = vmatprep.subr.bf16.mxu1 %v7770_v27  ;;  %v7837_v9 = vld [vmem:[%s8994_s9 + $0x370] ss:$8 sps:$4 sm:$0xff]   ;;  %v9079_v12 = vld [vmem:[%s11063_s1 + $0x24] ss:$16 sps:$4 sm:$0xff]   ;;  %v9084_v13 = vld [vmem:[%s11063_s1 + $0x2c] ss:$16 sps:$4 sm:$0xff]  }
  0x32   : > { %v7843_v15 = vld [vmem:[%s8994_s9 + $0x360] ss:$8 sps:$4 sm:$0xff]   ;;  %v7848_v16 = vld [vmem:[%s8994_s9 + $0x254] ss:$8 sps:$4 sm:$0xff]   ;;  %v7846_v19 = vld [vmem:[%s8994_s9 + $0x250] ss:$8 sps:$4 sm:$0xff]  }
  0x33   : > { %719 = vmatpush1.bf16.msra.mxu0 %v7772_v28  ;;  %v7851_v17 = vld [vmem:[%s8994_s9 + $0x354] ss:$8 sps:$4 sm:$0xff]   ;;  %v9097_v18 = vld [vmem:[%s11063_s1 + $0x20] ss:$16 sps:$4 sm:$0xff]   ;;  %v9103_v20 = vld [vmem:[%s11063_s1 + $0x28] ss:$16 sps:$4 sm:$0xff]  }
  0x34   : > { %792 = vmatpush1.bf16.msra.mxu1 %v7773_v29  ;;  %720 = vmatprep.subr.bf16.mxu0 %v7774_v30  ;;  %v7849_v21 = vld [vmem:[%s8994_s9 + $0x350] ss:$8 sps:$4 sm:$0xff]   ;;  %v7854_v22 = vld [vmem:[%s8994_s9 + $0x244] ss:$8 sps:$4 sm:$0xff]   ;;  %v7852_v26 = vld [vmem:[%s8994_s9 + $0x240] ss:$8 sps:$4 sm:$0xff]  }
  0x35   : > { %793 = vmatprep.subr.bf16.mxu1 %v7776_v31  ;;  %v7857_v23 = vld [vmem:[%s8994_s9 + $0x344] ss:$8 sps:$4 sm:$0xff]   ;;  %v7855_v27 = vld [vmem:[%s8994_s9 + $0x340] ss:$8 sps:$4 sm:$0xff]   ;;  %v7860_v28 = vld [vmem:[%s8994_s9 + $0x234] ss:$8 sps:$4 sm:$0xff]  }
  0x36   : > { %v9111_v24 = vld [vmem:[%s11063_s1 + $0x44] ss:$16 sps:$4 sm:$0xff]   ;;  %v9116_v25 = vld [vmem:[%s11063_s1 + $0x4c] ss:$16 sps:$4 sm:$0xff]   ;;  %v7858_v30 = vld [vmem:[%s8994_s9 + $0x230] ss:$8 sps:$4 sm:$0xff]  }
  0x37   : > { %721 = vmatpush1.bf16.msra.mxu0 %v7778_v32  ;;  %v7863_v29 = vld [vmem:[%s8994_s9 + $0x334] ss:$8 sps:$4 sm:$0xff]   ;;  %v9130_v31 = vld [vmem:[%s11063_s1 + $0x40] ss:$16 sps:$4 sm:$0xff]   ;;  %v9135_v32 = vld [vmem:[%s11063_s1 + $0x48] ss:$16 sps:$4 sm:$0xff]  }
  0x38   : > { %794 = vmatpush1.bf16.msra.mxu1 %v7779_v33  ;;  %722 = vmatprep.subr.bf16.mxu0 %v7780_v34  ;;  %v7861_v33 = vld [vmem:[%s8994_s9 + $0x330] ss:$8 sps:$4 sm:$0xff]   ;;  %v7866_v34 = vld [vmem:[%s8994_s9 + $0x224] ss:$8 sps:$4 sm:$0xff]   ;;  %s7689_s5 = sshll.u32 %s8947_s19, 13  ;;  %s8898_s19 = smov [#allocation3]  }
  0x39   : > { %795 = vmatprep.subr.bf16.mxu1 %v7782_v35  ;;  %v7869_v35 = vld [vmem:[%s8994_s9 + $0x324] ss:$8 sps:$4 sm:$0xff]   ;;  %s10967_s20 = scalar_lea.hbm %s11066_s4, %s7689_s5  ;;  %s8839_s28 = sshll.u32 %s8898_s19, 4  ;;  %s8840_s28 = int_to_ptr.vmem [resolvable:$false] %s8839_s28 }
  0x3a   : > { %s8841_s29 = scalar_lea.vmem %s8840_s28, 16384 }
  0x3b   : > { %723 = vmatpush2.bf16.msra.mxu0 %v7784_v36  ;;  %v9143_v36 = vld [vmem:[%s11063_s1 + $0x64] ss:$16 sps:$4 sm:$0xff]  }
  0x3c   : > { %796 = vmatpush2.bf16.msra.mxu1 %v7785_v37  ;;  %724 = vmatprep.subr.bf16.mxu0 %v7786_v38  ;;  %v9148_v37 = vld [vmem:[%s11063_s1 + $0x6c] ss:$16 sps:$4 sm:$0xff]   ;;  %v7864_v38 = vld [vmem:[%s8994_s9 + $0x220] ss:$8 sps:$4 sm:$0xff]  }
  0x3d   : > { %797 = vmatprep.subr.bf16.mxu1 %v7788_v39  ;;  %v7867_v39 = vld [vmem:[%s8994_s9 + $0x320] ss:$8 sps:$4 sm:$0xff]  }
  0x3f   : > { %725 = vmatpush2.bf16.msra.mxu0 %v7790_v40  ;;  %v7872_v40 = vld [vmem:[%s8994_s9 + $0x214] ss:$8 sps:$4 sm:$0xff]  }
  0x40   : > { %798 = vmatpush2.bf16.msra.mxu1 %v7791_v41  ;;  %726 = vmatprep.subr.bf16.mxu0 %v7792_v42  ;;  %v7875_v41 = vld [vmem:[%s8994_s9 + $0x314] ss:$8 sps:$4 sm:$0xff]   ;;  %v9161_v42 = vld [vmem:[%s11063_s1 + $0x60] ss:$16 sps:$4 sm:$0xff]  }
  0x41   : > { %799 = vmatprep.subr.bf16.mxu1 %v7794_v43  ;;  %v9166_v43 = vld [vmem:[%s11063_s1 + $0x68] ss:$16 sps:$4 sm:$0xff]  }
  0x43   : > { %727 = vmatpush2.bf16.msra.mxu0 %v7796_v44  ;;  %v7870_v44 = vld [vmem:[%s8994_s9 + $0x210] ss:$8 sps:$4 sm:$0xff]  }
  0x44   : > { %800 = vmatpush2.bf16.msra.mxu1 %v7797_v45  ;;  %728 = vmatprep.subr.bf16.mxu0 %v7798_v46  ;;  %v7873_v45 = vld [vmem:[%s8994_s9 + $0x310] ss:$8 sps:$4 sm:$0xff]   ;;  %v7878_v46 = vld [vmem:[%s8994_s9 + $0x204] ss:$8 sps:$4 sm:$0xff]  }
  0x45   : > { %801 = vmatprep.subr.bf16.mxu1 %v7800_v47  ;;  %v7881_v47 = vld [vmem:[%s8994_s9 + $0x304] ss:$8 sps:$4 sm:$0xff]  }
  0x47   : > { %729 = vmatpush2.bf16.msra.mxu0 %v7802_v48  ;;  %v7876_v48 = vld [vmem:[%s8994_s9 + $0x200] ss:$8 sps:$4 sm:$0xff]  }
  0x48   : > { %802 = vmatpush2.bf16.msra.mxu1 %v7803_v49  ;;  %730 = vmatprep.subr.bf16.mxu0 %v7804_v50  ;;  %v7879_v49 = vld [vmem:[%s8994_s9 + $0x300] ss:$8 sps:$4 sm:$0xff]   ;;  %v7884_v50 = vld [vmem:[%s8994_s9 + $0x2f4] ss:$8 sps:$4 sm:$0xff]  }
  0x49   : > { %803 = vmatprep.subr.bf16.mxu1 %v7806_v51  ;;  %v7887_v51 = vld [vmem:[%s8994_s9 + $0x3f4] ss:$8 sps:$4 sm:$0xff]  }
  0x4b   : > { %731 = vmatpush2.bf16.msra.mxu0 %v7808_v52  ;;  %v7882_v52 = vld [vmem:[%s8994_s9 + $0x2f0] ss:$8 sps:$4 sm:$0xff]  }
  0x4c   : > { %804 = vmatpush2.bf16.msra.mxu1 %v7809_v53  ;;  %732 = vmatprep.subr.bf16.mxu0 %v7810_v54  ;;  %v7885_v53 = vld [vmem:[%s8994_s9 + $0x3f0] ss:$8 sps:$4 sm:$0xff]   ;;  %v7896_v54 = vld [vmem:[%s8994_s9 + $0x2e4] ss:$8 sps:$4 sm:$0xff]  }
  0x4d   : > { %805 = vmatprep.subr.bf16.mxu1 %v7812_v55  ;;  %v7899_v55 = vld [vmem:[%s8994_s9 + $0x3e4] ss:$8 sps:$4 sm:$0xff]  }
  0x4f   : > { %733 = vmatpush2.bf16.msra.mxu0 %v7814_v56  ;;  %v7894_v56 = vld [vmem:[%s8994_s9 + $0x2e0] ss:$8 sps:$4 sm:$0xff]  }
  0x50   : > { %806 = vmatpush2.bf16.msra.mxu1 %v7815_v57  ;;  %734 = vmatprep.subr.bf16.mxu0 %v7816_v58  ;;  %v7905_v57 = vld [vmem:[%s8994_s9 + $0x3d4] ss:$8 sps:$4 sm:$0xff]   ;;  %v7900_v58 = vld [vmem:[%s8994_s9 + $0x2d0] ss:$8 sps:$4 sm:$0xff]  }
  0x51   : > { %807 = vmatprep.subr.bf16.mxu1 %v7818_v59  ;;  %v7903_v59 = vld [vmem:[%s8994_s9 + $0x3d0] ss:$8 sps:$4 sm:$0xff]  }
  0x53   : > { %735 = vmatpush2.bf16.msra.mxu0 %v7820_v60  ;;  %v7914_v60 = vld [vmem:[%s8994_s9 + $0x2c4] ss:$8 sps:$4 sm:$0xff]  }
  0x54   : > { %808 = vmatpush2.bf16.msra.mxu1 %v7821_v61  ;;  %736 = vmatprep.subr.bf16.mxu0 %v7822_v62  ;;  %v7917_v61 = vld [vmem:[%s8994_s9 + $0x3c4] ss:$8 sps:$4 sm:$0xff]   ;;  %v7912_v62 = vld [vmem:[%s8994_s9 + $0x2c0] ss:$8 sps:$4 sm:$0xff]  }
  0x55   : > { %809 = vmatprep.subr.bf16.mxu1 %v7824_v63  ;;  %v7915_v63 = vld [vmem:[%s8994_s9 + $0x3c0] ss:$8 sps:$4 sm:$0xff]  }
  0x57   : > { %737 = vmatpush2.bf16.msra.mxu0 %v7826_v2  ;;  %v7920_v2 = vld [vmem:[%s8994_s9 + $0x2b4] ss:$8 sps:$4 sm:$0xff]  }
  0x58   : > { %810 = vmatpush2.bf16.msra.mxu1 %v7827_v3  ;;  %1254 = vmatprep.subr.bf16.mxu0 %v7836_v4  ;;  %v7923_v3 = vld [vmem:[%s8994_s9 + $0x3b4] ss:$8 sps:$4 sm:$0xff]   ;;  %v7918_v4 = vld [vmem:[%s8994_s9 + $0x2b0] ss:$8 sps:$4 sm:$0xff]  }
  0x59   : > { %1327 = vmatprep.subr.bf16.mxu1 %v7839_v5  ;;  %v7921_v5 = vld [vmem:[%s8994_s9 + $0x3b0] ss:$8 sps:$4 sm:$0xff]  }
  0x5a   : > { %739 = vmatmul.mubr.bf16.vlgmr.msra.gmra.mxu0 %v9065_v6 }
  0x5b   : > { %812 = vmatmul.mubr.bf16.vlgmr.msra.gmra.mxu1 %v9070_v7  ;;  %1255 = vmatpush1.bf16.msra.mxu0 %v7834_v8  ;;  %v7932_v8 = vld [vmem:[%s8994_s9 + $0x2a4] ss:$8 sps:$4 sm:$0xff]  }
  0x5c   : > { %1328 = vmatpush1.bf16.msra.mxu1 %v7837_v9  ;;  %1256 = vmatprep.subr.bf16.mxu0 %v7842_v10  ;;  %v7935_v9 = vld [vmem:[%s8994_s9 + $0x3a4] ss:$8 sps:$4 sm:$0xff]   ;;  %v7930_v10 = vld [vmem:[%s8994_s9 + $0x2a0] ss:$8 sps:$4 sm:$0xff]  }
  0x5d   : > { %1329 = vmatprep.subr.bf16.mxu1 %v7845_v11  ;;  %748 = vmatprep.mubr.bf16.mxu0 %v9079_v12  ;;  %v7933_v11 = vld [vmem:[%s8994_s9 + $0x3a0] ss:$8 sps:$4 sm:$0xff]  }
  0x5e   : > { %821 = vmatprep.mubr.bf16.mxu1 %v9084_v13 }
  0x5f   : > { %1257 = vmatpush1.bf16.msra.mxu0 %v7840_v14  ;;  %v7938_v14 = vld [vmem:[%s8994_s9 + $0x294] ss:$8 sps:$4 sm:$0xff]  }
  0x60   : > { %1330 = vmatpush1.bf16.msra.mxu1 %v7843_v15  ;;  %1258 = vmatprep.subr.bf16.mxu0 %v7848_v16  ;;  %v7941_v15 = vld [vmem:[%s8994_s9 + $0x394] ss:$8 sps:$4 sm:$0xff]   ;;  %v7936_v16 = vld [vmem:[%s8994_s9 + $0x290] ss:$8 sps:$4 sm:$0xff]  }
  0x61   : > { %1331 = vmatprep.subr.bf16.mxu1 %v7851_v17  ;;  %v7939_v17 = vld [vmem:[%s8994_s9 + $0x390] ss:$8 sps:$4 sm:$0xff]  }
  0x62   : > { %749 = vmatmul.mubr.bf16.gmra.mxu0 %v9097_v18 }
  0x63   : > { %822 = vmatmul.mubr.bf16.gmra.mxu1 %v9103_v20  ;;  %1259 = vmatpush1.bf16.msra.mxu0 %v7846_v19  ;;  %v7944_v19 = vld [vmem:[%s8994_s9 + $0x284] ss:$8 sps:$4 sm:$0xff]  }
  0x64   : > { %1332 = vmatpush1.bf16.msra.mxu1 %v7849_v21  ;;  %1260 = vmatprep.subr.bf16.mxu0 %v7854_v22  ;;  %v7947_v21 = vld [vmem:[%s8994_s9 + $0x384] ss:$8 sps:$4 sm:$0xff]   ;;  %v7942_v22 = vld [vmem:[%s8994_s9 + $0x280] ss:$8 sps:$4 sm:$0xff]  }
  0x65   : > { %1333 = vmatprep.subr.bf16.mxu1 %v7857_v23  ;;  %758 = vmatprep.mubr.bf16.mxu0 %v9111_v24  ;;  %v7945_v23 = vld [vmem:[%s8994_s9 + $0x380] ss:$8 sps:$4 sm:$0xff]  }
  0x66   : > { %831 = vmatprep.mubr.bf16.mxu1 %v9116_v25 }
  0x67   : > { %1261 = vmatpush1.bf16.msra.mxu0 %v7852_v26  ;;  %v7950_v26 = vld [vmem:[%s8994_s9 + $0x474] ss:$8 sps:$4 sm:$0xff]  }
  0x68   : > { %1334 = vmatpush1.bf16.msra.mxu1 %v7855_v27  ;;  %1262 = vmatprep.subr.bf16.mxu0 %v7860_v28  ;;  %v7953_v27 = vld [vmem:[%s8994_s9 + $0x574] ss:$8 sps:$4 sm:$0xff]   ;;  %v7948_v28 = vld [vmem:[%s8994_s9 + $0x470] ss:$8 sps:$4 sm:$0xff]  }
  0x69   : > { %1335 = vmatprep.subr.bf16.mxu1 %v7863_v29  ;;  %v7951_v29 = vld [vmem:[%s8994_s9 + $0x570] ss:$8 sps:$4 sm:$0xff]  }
  0x6a   : > { %759 = vmatmul.mubr.bf16.gmra.mxu0 %v9130_v31 }
  0x6b   : > { %832 = vmatmul.mubr.bf16.gmra.mxu1 %v9135_v32  ;;  %1263 = vmatpush1.bf16.msra.mxu0 %v7858_v30  ;;  %v7956_v30 = vld [vmem:[%s8994_s9 + $0x464] ss:$8 sps:$4 sm:$0xff]  }
  0x6c   : > { %1336 = vmatpush1.bf16.msra.mxu1 %v7861_v33  ;;  %1264 = vmatprep.subr.bf16.mxu0 %v7866_v34  ;;  %v7959_v33 = vld [vmem:[%s8994_s9 + $0x564] ss:$8 sps:$4 sm:$0xff]   ;;  %v7954_v34 = vld [vmem:[%s8994_s9 + $0x460] ss:$8 sps:$4 sm:$0xff]  }
  0x6d   : > { %1337 = vmatprep.subr.bf16.mxu1 %v7869_v35  ;;  %768 = vmatprep.mubr.bf16.mxu0 %v9143_v36  ;;  %v7957_v35 = vld [vmem:[%s8994_s9 + $0x560] ss:$8 sps:$4 sm:$0xff]  }
  0x6e   : > { %841 = vmatprep.mubr.bf16.mxu1 %v9148_v37 }
  0x6f   : > { %1265 = vmatpush1.bf16.msra.mxu0 %v7864_v38  ;;  %v7962_v38 = vld [vmem:[%s8994_s9 + $0x454] ss:$8 sps:$4 sm:$0xff]  }
  0x70   : > { %1338 = vmatpush1.bf16.msra.mxu1 %v7867_v39  ;;  %1266 = vmatprep.subr.bf16.mxu0 %v7872_v40  ;;  %v7965_v39 = vld [vmem:[%s8994_s9 + $0x554] ss:$8 sps:$4 sm:$0xff]   ;;  %v7960_v40 = vld [vmem:[%s8994_s9 + $0x450] ss:$8 sps:$4 sm:$0xff]  }
  0x71   : > { %1339 = vmatprep.subr.bf16.mxu1 %v7875_v41  ;;  %v7963_v41 = vld [vmem:[%s8994_s9 + $0x550] ss:$8 sps:$4 sm:$0xff]  }
  0x72   : > { %769 = vmatmul.mubr.bf16.gmra.mxu0 %v9161_v42 }
  0x73   : > { %842 = vmatmul.mubr.bf16.gmra.mxu1 %v9166_v43  ;;  %1267 = vmatpush1.bf16.msra.mxu0 %v7870_v44  ;;  %v7968_v44 = vld [vmem:[%s8994_s9 + $0x444] ss:$8 sps:$4 sm:$0xff]  }
  0x74   : > { %1340 = vmatpush1.bf16.msra.mxu1 %v7873_v45  ;;  %1268 = vmatprep.subr.bf16.mxu0 %v7878_v46  ;;  %v7971_v45 = vld [vmem:[%s8994_s9 + $0x544] ss:$8 sps:$4 sm:$0xff]   ;;  %v7966_v46 = vld [vmem:[%s8994_s9 + $0x440] ss:$8 sps:$4 sm:$0xff]  }
  0x75   : > { %1341 = vmatprep.subr.bf16.mxu1 %v7881_v47  ;;  %1286 = vmatprep.mubr.bf16.mxu0 %v8978_v0  ;;  %v7897_v0 = vld [vmem:[%s8994_s9 + $0x3e0] ss:$8 sps:$4 sm:$0xff]  }
  0x76   : > { %1359 = vmatprep.mubr.bf16.mxu1 %v8983_v1  ;;  %v7902_v1 = vld [vmem:[%s8994_s9 + $0x2d4] ss:$8 sps:$4 sm:$0xff]   ;;  %v7969_v47 = vld [vmem:[%s8994_s9 + $0x540] ss:$8 sps:$4 sm:$0xff]  }
  0x77   : > { %1269 = vmatpush1.bf16.msra.mxu0 %v7876_v48  ;;  %v7974_v48 = vld [vmem:[%s8994_s9 + $0x434] ss:$8 sps:$4 sm:$0xff]  }
  0x78   : > { %1342 = vmatpush1.bf16.msra.mxu1 %v7879_v49  ;;  %1270 = vmatprep.subr.bf16.mxu0 %v7884_v50  ;;  %v7977_v49 = vld [vmem:[%s8994_s9 + $0x534] ss:$8 sps:$4 sm:$0xff]   ;;  %v7972_v50 = vld [vmem:[%s8994_s9 + $0x430] ss:$8 sps:$4 sm:$0xff]  }
  0x79   : > { %1343 = vmatprep.subr.bf16.mxu1 %v7887_v51  ;;  %v7975_v51 = vld [vmem:[%s8994_s9 + $0x530] ss:$8 sps:$4 sm:$0xff]  }
  0x7b   : > { %1271 = vmatpush2.bf16.msra.mxu0 %v7882_v52  ;;  %v7980_v52 = vld [vmem:[%s8994_s9 + $0x424] ss:$8 sps:$4 sm:$0xff]  }
  0x7c   : > { %1344 = vmatpush2.bf16.msra.mxu1 %v7885_v53  ;;  %1272 = vmatprep.subr.bf16.mxu0 %v7896_v54  ;;  %v7983_v53 = vld [vmem:[%s8994_s9 + $0x524] ss:$8 sps:$4 sm:$0xff]   ;;  %v7978_v54 = vld [vmem:[%s8994_s9 + $0x420] ss:$8 sps:$4 sm:$0xff]  }
  0x7d   : > { %1345 = vmatprep.subr.bf16.mxu1 %v7899_v55  ;;  %v7981_v55 = vld [vmem:[%s8994_s9 + $0x520] ss:$8 sps:$4 sm:$0xff]  }
  0x7f   : > { %1273 = vmatpush2.bf16.msra.mxu0 %v7894_v56  ;;  %v7986_v56 = vld [vmem:[%s8994_s9 + $0x414] ss:$8 sps:$4 sm:$0xff]  }
  0x80   : > { %1346 = vmatpush2.bf16.msra.mxu1 %v7897_v0  ;;  %1274 = vmatprep.subr.bf16.mxu0 %v7902_v1  ;;  %v7989_v0 = vld [vmem:[%s8994_s9 + $0x514] ss:$8 sps:$4 sm:$0xff]   ;;  %v7984_v1 = vld [vmem:[%s8994_s9 + $0x410] ss:$8 sps:$4 sm:$0xff]  }
  0x81   : > { %1347 = vmatprep.subr.bf16.mxu1 %v7905_v57  ;;  %v7987_v57 = vld [vmem:[%s8994_s9 + $0x510] ss:$8 sps:$4 sm:$0xff]  }
  0x83   : > { %1275 = vmatpush2.bf16.msra.mxu0 %v7900_v58  ;;  %v7992_v58 = vld [vmem:[%s8994_s9 + $0x404] ss:$8 sps:$4 sm:$0xff]  }
  0x84   : > { %1348 = vmatpush2.bf16.msra.mxu1 %v7903_v59  ;;  %1276 = vmatprep.subr.bf16.mxu0 %v7914_v60  ;;  %v7995_v59 = vld [vmem:[%s8994_s9 + $0x504] ss:$8 sps:$4 sm:$0xff]   ;;  %v7990_v60 = vld [vmem:[%s8994_s9 + $0x400] ss:$8 sps:$4 sm:$0xff]  }
  0x85   : > { %1349 = vmatprep.subr.bf16.mxu1 %v7917_v61  ;;  %v7993_v61 = vld [vmem:[%s8994_s9 + $0x500] ss:$8 sps:$4 sm:$0xff]  }
  0x87   : > { %1277 = vmatpush2.bf16.msra.mxu0 %v7912_v62  ;;  %v7998_v62 = vld [vmem:[%s8994_s9 + $0x4f4] ss:$8 sps:$4 sm:$0xff]  }
  0x88   : > { %1350 = vmatpush2.bf16.msra.mxu1 %v7915_v63  ;;  %1278 = vmatprep.subr.bf16.mxu0 %v7920_v2  ;;  %v8001_v63 = vld [vmem:[%s8994_s9 + $0x5f4] ss:$8 sps:$4 sm:$0xff]  }
  0x89   : > { %1351 = vmatprep.subr.bf16.mxu1 %v7923_v3  ;;  %v9261_v2 = vld [vmem:[%s11063_s1 + $0x4] ss:$16 sps:$4 sm:$0xff]   ;;  %v9267_v3 = vld [vmem:[%s11063_s1 + $0xc] ss:$16 sps:$4 sm:$0xff]  }
  0x8b   : > { %1279 = vmatpush2.bf16.msra.mxu0 %v7918_v4  ;;  %v7996_v4 = vld [vmem:[%s8994_s9 + $0x4f0] ss:$8 sps:$4 sm:$0xff]  }
  0x8c   : > { %1352 = vmatpush2.bf16.msra.mxu1 %v7921_v5  ;;  %1280 = vmatprep.subr.bf16.mxu0 %v7932_v8  ;;  %v7999_v5 = vld [vmem:[%s8994_s9 + $0x5f0] ss:$8 sps:$4 sm:$0xff]   ;;  %v8004_v8 = vld [vmem:[%s8994_s9 + $0x4e4] ss:$8 sps:$4 sm:$0xff]  }
  0x8d   : > { %1353 = vmatprep.subr.bf16.mxu1 %v7935_v9  ;;  %v8007_v9 = vld [vmem:[%s8994_s9 + $0x5e4] ss:$8 sps:$4 sm:$0xff]  }
  0x8f   : > { %1281 = vmatpush2.bf16.msra.mxu0 %v7930_v10  ;;  %v8002_v10 = vld [vmem:[%s8994_s9 + $0x4e0] ss:$8 sps:$4 sm:$0xff]  }
  0x90   : > { %1354 = vmatpush2.bf16.msra.mxu1 %v7933_v11  ;;  %1282 = vmatprep.subr.bf16.mxu0 %v7938_v14  ;;  %v8005_v11 = vld [vmem:[%s8994_s9 + $0x5e0] ss:$8 sps:$4 sm:$0xff]   ;;  %v8010_v14 = vld [vmem:[%s8994_s9 + $0x4d4] ss:$8 sps:$4 sm:$0xff]  }
  0x91   : > { %1355 = vmatprep.subr.bf16.mxu1 %v7941_v15  ;;  %v8013_v15 = vld [vmem:[%s8994_s9 + $0x5d4] ss:$8 sps:$4 sm:$0xff]  }
  0x93   : > { %1283 = vmatpush2.bf16.msra.mxu0 %v7936_v16  ;;  %v8008_v16 = vld [vmem:[%s8994_s9 + $0x4d0] ss:$8 sps:$4 sm:$0xff]  }
  0x94   : > { %1356 = vmatpush2.bf16.msra.mxu1 %v7939_v17  ;;  %1284 = vmatprep.subr.bf16.mxu0 %v7944_v19  ;;  %v8011_v17 = vld [vmem:[%s8994_s9 + $0x5d0] ss:$8 sps:$4 sm:$0xff]   ;;  %v8016_v19 = vld [vmem:[%s8994_s9 + $0x4c4] ss:$8 sps:$4 sm:$0xff]  }
  0x95   : > { %1357 = vmatprep.subr.bf16.mxu1 %v7947_v21  ;;  %v8019_v21 = vld [vmem:[%s8994_s9 + $0x5c4] ss:$8 sps:$4 sm:$0xff]  }
  0x97   : > { %1285 = vmatpush2.bf16.msra.mxu0 %v7942_v22  ;;  %v8014_v22 = vld [vmem:[%s8994_s9 + $0x4c0] ss:$8 sps:$4 sm:$0xff]  }
  0x98   : > { %1358 = vmatpush2.bf16.msra.mxu1 %v7945_v23  ;;  %1801 = vmatprep.subr.bf16.mxu0 %v7950_v26  ;;  %v8017_v23 = vld [vmem:[%s8994_s9 + $0x5c0] ss:$8 sps:$4 sm:$0xff]   ;;  %v8022_v26 = vld [vmem:[%s8994_s9 + $0x4b4] ss:$8 sps:$4 sm:$0xff]  }
  0x99   : > { %1874 = vmatprep.subr.bf16.mxu1 %v7953_v27  ;;  %v8025_v27 = vld [vmem:[%s8994_s9 + $0x5b4] ss:$8 sps:$4 sm:$0xff]  }
  0x9a   : > { %1287 = vmatmul.mubr.bf16.vlgmr.msra.gmra.mxu0 %v9065_v6 }
  0x9b   : > { %1360 = vmatmul.mubr.bf16.vlgmr.msra.gmra.mxu1 %v9070_v7  ;;  %1802 = vmatpush1.bf16.msra.mxu0 %v7948_v28  ;;  %v8020_v28 = vld [vmem:[%s8994_s9 + $0x4b0] ss:$8 sps:$4 sm:$0xff]  }
  0x9c   : > { %1875 = vmatpush1.bf16.msra.mxu1 %v7951_v29  ;;  %1803 = vmatprep.subr.bf16.mxu0 %v7956_v30  ;;  %v8023_v29 = vld [vmem:[%s8994_s9 + $0x5b0] ss:$8 sps:$4 sm:$0xff]   ;;  %v8028_v30 = vld [vmem:[%s8994_s9 + $0x4a4] ss:$8 sps:$4 sm:$0xff]  }
  0x9d   : > { %1876 = vmatprep.subr.bf16.mxu1 %v7959_v33  ;;  %1296 = vmatprep.mubr.bf16.mxu0 %v9079_v12  ;;  %v8031_v33 = vld [vmem:[%s8994_s9 + $0x5a4] ss:$8 sps:$4 sm:$0xff]  }
  0x9e   : > { %1369 = vmatprep.mubr.bf16.mxu1 %v9084_v13 }
  0x9f   : > { %1804 = vmatpush1.bf16.msra.mxu0 %v7954_v34  ;;  %v8026_v34 = vld [vmem:[%s8994_s9 + $0x4a0] ss:$8 sps:$4 sm:$0xff]  }
  0xa0   : > { %1877 = vmatpush1.bf16.msra.mxu1 %v7957_v35  ;;  %1805 = vmatprep.subr.bf16.mxu0 %v7962_v38  ;;  %v8029_v35 = vld [vmem:[%s8994_s9 + $0x5a0] ss:$8 sps:$4 sm:$0xff]   ;;  %v8034_v38 = vld [vmem:[%s8994_s9 + $0x494] ss:$8 sps:$4 sm:$0xff]  }
  0xa1   : > { %1878 = vmatprep.subr.bf16.mxu1 %v7965_v39  ;;  %v8037_v39 = vld [vmem:[%s8994_s9 + $0x594] ss:$8 sps:$4 sm:$0xff]  }
  0xa2   : > { %1297 = vmatmul.mubr.bf16.gmra.mxu0 %v9097_v18 }
  0xa3   : > { %1370 = vmatmul.mubr.bf16.gmra.mxu1 %v9103_v20  ;;  %1806 = vmatpush1.bf16.msra.mxu0 %v7960_v40  ;;  %v8032_v40 = vld [vmem:[%s8994_s9 + $0x490] ss:$8 sps:$4 sm:$0xff]  }
  0xa4   : > { %1879 = vmatpush1.bf16.msra.mxu1 %v7963_v41  ;;  %1807 = vmatprep.subr.bf16.mxu0 %v7968_v44  ;;  %v8035_v41 = vld [vmem:[%s8994_s9 + $0x590] ss:$8 sps:$4 sm:$0xff]   ;;  %v8040_v44 = vld [vmem:[%s8994_s9 + $0x484] ss:$8 sps:$4 sm:$0xff]  }
  0xa5   : > { %1880 = vmatprep.subr.bf16.mxu1 %v7971_v45  ;;  %1306 = vmatprep.mubr.bf16.mxu0 %v9111_v24  ;;  %v8043_v45 = vld [vmem:[%s8994_s9 + $0x584] ss:$8 sps:$4 sm:$0xff]  }
  0xa6   : > { %1379 = vmatprep.mubr.bf16.mxu1 %v9116_v25 }
  0xa7   : > { %1808 = vmatpush1.bf16.msra.mxu0 %v7966_v46  ;;  %v8038_v46 = vld [vmem:[%s8994_s9 + $0x480] ss:$8 sps:$4 sm:$0xff]  }
  0xa8   : > { %1881 = vmatpush1.bf16.msra.mxu1 %v7969_v47  ;;  %1809 = vmatprep.subr.bf16.mxu0 %v7974_v48  ;;  %v8041_v47 = vld [vmem:[%s8994_s9 + $0x580] ss:$8 sps:$4 sm:$0xff]   ;;  %v8046_v48 = vld [vmem:[%s8994_s9 + $0x674] ss:$8 sps:$4 sm:$0xff]  }
  0xa9   : > { %1882 = vmatprep.subr.bf16.mxu1 %v7977_v49  ;;  %v8049_v49 = vld [vmem:[%s8994_s9 + $0x774] ss:$8 sps:$4 sm:$0xff]  }
  0xaa   : > { %1307 = vmatmul.mubr.bf16.gmra.mxu0 %v9130_v31 }
  0xab   : > { %1380 = vmatmul.mubr.bf16.gmra.mxu1 %v9135_v32  ;;  %1810 = vmatpush1.bf16.msra.mxu0 %v7972_v50  ;;  %v8044_v50 = vld [vmem:[%s8994_s9 + $0x670] ss:$8 sps:$4 sm:$0xff]  }
  0xac   : > { %1883 = vmatpush1.bf16.msra.mxu1 %v7975_v51  ;;  %1811 = vmatprep.subr.bf16.mxu0 %v7980_v52  ;;  %v8047_v51 = vld [vmem:[%s8994_s9 + $0x770] ss:$8 sps:$4 sm:$0xff]   ;;  %v8052_v52 = vld [vmem:[%s8994_s9 + $0x664] ss:$8 sps:$4 sm:$0xff]  }
  0xad   : > { %1884 = vmatprep.subr.bf16.mxu1 %v7983_v53  ;;  %1316 = vmatprep.mubr.bf16.mxu0 %v9143_v36  ;;  %v8055_v53 = vld [vmem:[%s8994_s9 + $0x764] ss:$8 sps:$4 sm:$0xff]  }
  0xae   : > { %1389 = vmatprep.mubr.bf16.mxu1 %v9148_v37 }
  0xaf   : > { %1812 = vmatpush1.bf16.msra.mxu0 %v7978_v54  ;;  %v8050_v54 = vld [vmem:[%s8994_s9 + $0x660] ss:$8 sps:$4 sm:$0xff]  }
  0xb0   : > { %1885 = vmatpush1.bf16.msra.mxu1 %v7981_v55  ;;  %1813 = vmatprep.subr.bf16.mxu0 %v7986_v56  ;;  %v8053_v55 = vld [vmem:[%s8994_s9 + $0x760] ss:$8 sps:$4 sm:$0xff]   ;;  %v8058_v56 = vld [vmem:[%s8994_s9 + $0x654] ss:$8 sps:$4 sm:$0xff]  }
  0xb1   : > { %1886 = vmatprep.subr.bf16.mxu1 %v7989_v0  ;;  %v8061_v0 = vld [vmem:[%s8994_s9 + $0x754] ss:$8 sps:$4 sm:$0xff]  }
  0xb2   : > { %1317 = vmatmul.mubr.bf16.gmra.mxu0 %v9161_v42 }
  0xb3   : > { %1390 = vmatmul.mubr.bf16.gmra.mxu1 %v9166_v43  ;;  %1814 = vmatpush1.bf16.msra.mxu0 %v7984_v1  ;;  %v8064_v1 = vld [vmem:[%s8994_s9 + $0x644] ss:$8 sps:$4 sm:$0xff]  }
  0xb4   : > { %1887 = vmatpush1.bf16.msra.mxu1 %v7987_v57  ;;  %1815 = vmatprep.subr.bf16.mxu0 %v7992_v58  ;;  %v8067_v57 = vld [vmem:[%s8994_s9 + $0x744] ss:$8 sps:$4 sm:$0xff]   ;;  %v8070_v58 = vld [vmem:[%s8994_s9 + $0x634] ss:$8 sps:$4 sm:$0xff]  }
  0xb5   : > { %1888 = vmatprep.subr.bf16.mxu1 %v7995_v59  ;;  %1833 = vmatprep.mubr.bf16.mxu0 %v9261_v2  ;;  %v8073_v59 = vld [vmem:[%s8994_s9 + $0x734] ss:$8 sps:$4 sm:$0xff]  }
  0xb6   : > { %1906 = vmatprep.mubr.bf16.mxu1 %v9267_v3 }
  0xb7   : > { %1816 = vmatpush1.bf16.msra.mxu0 %v7990_v60  ;;  %v8076_v60 = vld [vmem:[%s8994_s9 + $0x624] ss:$8 sps:$4 sm:$0xff]  }
  0xb8   : > { %1889 = vmatpush1.bf16.msra.mxu1 %v7993_v61  ;;  %1817 = vmatprep.subr.bf16.mxu0 %v7998_v62  ;;  %v8079_v61 = vld [vmem:[%s8994_s9 + $0x724] ss:$8 sps:$4 sm:$0xff]   ;;  %v8082_v62 = vld [vmem:[%s8994_s9 + $0x614] ss:$8 sps:$4 sm:$0xff]  }
  0xb9   : > { %1890 = vmatprep.subr.bf16.mxu1 %v8001_v63  ;;  %v8085_v63 = vld [vmem:[%s8994_s9 + $0x714] ss:$8 sps:$4 sm:$0xff]  }
  0xbb   : > { %1818 = vmatpush2.bf16.msra.mxu0 %v7996_v4  ;;  %v8088_v4 = vld [vmem:[%s8994_s9 + $0x604] ss:$8 sps:$4 sm:$0xff]  }
  0xbc   : > { %1891 = vmatpush2.bf16.msra.mxu1 %v7999_v5  ;;  %1819 = vmatprep.subr.bf16.mxu0 %v8004_v8  ;;  %v8091_v5 = vld [vmem:[%s8994_s9 + $0x704] ss:$8 sps:$4 sm:$0xff]   ;;  %v8094_v8 = vld [vmem:[%s8994_s9 + $0x6f4] ss:$8 sps:$4 sm:$0xff]  }
  0xbd   : > { %1892 = vmatprep.subr.bf16.mxu1 %v8007_v9  ;;  %v8097_v9 = vld [vmem:[%s8994_s9 + $0x7f4] ss:$8 sps:$4 sm:$0xff]  }
  0xbf   : > { %1820 = vmatpush2.bf16.msra.mxu0 %v8002_v10  ;;  %v8100_v10 = vld [vmem:[%s8994_s9 + $0x6e4] ss:$8 sps:$4 sm:$0xff]  }
  0xc0   : > { %1893 = vmatpush2.bf16.msra.mxu1 %v8005_v11  ;;  %1821 = vmatprep.subr.bf16.mxu0 %v8010_v14  ;;  %v8103_v11 = vld [vmem:[%s8994_s9 + $0x7e4] ss:$8 sps:$4 sm:$0xff]   ;;  %v8098_v14 = vld [vmem:[%s8994_s9 + $0x6e0] ss:$8 sps:$4 sm:$0xff]  }
  0xc1   : > { %1894 = vmatprep.subr.bf16.mxu1 %v8013_v15  ;;  %v8109_v15 = vld [vmem:[%s8994_s9 + $0x7d4] ss:$8 sps:$4 sm:$0xff]  }
  0xc3   : > { %1822 = vmatpush2.bf16.msra.mxu0 %v8008_v16  ;;  %v8104_v16 = vld [vmem:[%s8994_s9 + $0x6d0] ss:$8 sps:$4 sm:$0xff]  }
  0xc4   : > { %1895 = vmatpush2.bf16.msra.mxu1 %v8011_v17  ;;  %1823 = vmatprep.subr.bf16.mxu0 %v8016_v19  ;;  %v8107_v17 = vld [vmem:[%s8994_s9 + $0x7d0] ss:$8 sps:$4 sm:$0xff]   ;;  %v8112_v19 = vld [vmem:[%s8994_s9 + $0x6c4] ss:$8 sps:$4 sm:$0xff]  }
  0xc5   : > { %1896 = vmatprep.subr.bf16.mxu1 %v8019_v21  ;;  %v8115_v21 = vld [vmem:[%s8994_s9 + $0x7c4] ss:$8 sps:$4 sm:$0xff]  }
  0xc7   : > { %1824 = vmatpush2.bf16.msra.mxu0 %v8014_v22  ;;  %v8110_v22 = vld [vmem:[%s8994_s9 + $0x6c0] ss:$8 sps:$4 sm:$0xff]  }
  0xc8   : > { %1897 = vmatpush2.bf16.msra.mxu1 %v8017_v23  ;;  %1825 = vmatprep.subr.bf16.mxu0 %v8022_v26  ;;  %v8113_v23 = vld [vmem:[%s8994_s9 + $0x7c0] ss:$8 sps:$4 sm:$0xff]   ;;  %v8118_v26 = vld [vmem:[%s8994_s9 + $0x6b4] ss:$8 sps:$4 sm:$0xff]  }
  0xc9   : > { %1898 = vmatprep.subr.bf16.mxu1 %v8025_v27  ;;  %v8121_v27 = vld [vmem:[%s8994_s9 + $0x7b4] ss:$8 sps:$4 sm:$0xff]  }
  0xcb   : > { %1826 = vmatpush2.bf16.msra.mxu0 %v8020_v28  ;;  %v8116_v28 = vld [vmem:[%s8994_s9 + $0x6b0] ss:$8 sps:$4 sm:$0xff]  }
  0xcc   : > { %1899 = vmatpush2.bf16.msra.mxu1 %v8023_v29  ;;  %1827 = vmatprep.subr.bf16.mxu0 %v8028_v30  ;;  %v8119_v29 = vld [vmem:[%s8994_s9 + $0x7b0] ss:$8 sps:$4 sm:$0xff]   ;;  %v8124_v30 = vld [vmem:[%s8994_s9 + $0x6a4] ss:$8 sps:$4 sm:$0xff]  }
  0xcd   : > { %1900 = vmatprep.subr.bf16.mxu1 %v8031_v33  ;;  %v8127_v33 = vld [vmem:[%s8994_s9 + $0x7a4] ss:$8 sps:$4 sm:$0xff]  }
  0xcf   : > { %1828 = vmatpush2.bf16.msra.mxu0 %v8026_v34  ;;  %v8122_v34 = vld [vmem:[%s8994_s9 + $0x6a0] ss:$8 sps:$4 sm:$0xff]  }
  0xd0   : > { %1901 = vmatpush2.bf16.msra.mxu1 %v8029_v35  ;;  %1829 = vmatprep.subr.bf16.mxu0 %v8034_v38  ;;  %v8125_v35 = vld [vmem:[%s8994_s9 + $0x7a0] ss:$8 sps:$4 sm:$0xff]   ;;  %v8130_v38 = vld [vmem:[%s8994_s9 + $0x694] ss:$8 sps:$4 sm:$0xff]  }
  0xd1   : > { %1902 = vmatprep.subr.bf16.mxu1 %v8037_v39  ;;  %v8133_v39 = vld [vmem:[%s8994_s9 + $0x794] ss:$8 sps:$4 sm:$0xff]  }
  0xd3   : > { %1830 = vmatpush2.bf16.msra.mxu0 %v8032_v40  ;;  %v8128_v40 = vld [vmem:[%s8994_s9 + $0x690] ss:$8 sps:$4 sm:$0xff]  }
  0xd4   : > { %1903 = vmatpush2.bf16.msra.mxu1 %v8035_v41  ;;  %1831 = vmatprep.subr.bf16.mxu0 %v8040_v44  ;;  %v8131_v41 = vld [vmem:[%s8994_s9 + $0x790] ss:$8 sps:$4 sm:$0xff]   ;;  %v8136_v44 = vld [vmem:[%s8994_s9 + $0x684] ss:$8 sps:$4 sm:$0xff]  }
  0xd5   : > { %1904 = vmatprep.subr.bf16.mxu1 %v8043_v45  ;;  %v8139_v45 = vld [vmem:[%s8994_s9 + $0x784] ss:$8 sps:$4 sm:$0xff]  }
  0xd7   : > { %1832 = vmatpush2.bf16.msra.mxu0 %v8038_v46  ;;  %v8134_v46 = vld [vmem:[%s8994_s9 + $0x680] ss:$8 sps:$4 sm:$0xff]  }
  0xd8   : > { %1905 = vmatpush2.bf16.msra.mxu1 %v8041_v47  ;;  %2348 = vmatprep.subr.bf16.mxu0 %v8046_v48  ;;  %v8137_v47 = vld [vmem:[%s8994_s9 + $0x780] ss:$8 sps:$4 sm:$0xff]   ;;  %v8142_v48 = vld [vmem:[%s8994_s9 + $0x874] ss:$8 sps:$4 sm:$0xff]  }
  0xd9   : > { %2421 = vmatprep.subr.bf16.mxu1 %v8049_v49  ;;  %v8145_v49 = vld [vmem:[%s8994_s9 + $0x974] ss:$8 sps:$4 sm:$0xff]  }
  0xda   : > { %1834 = vmatmul.mubr.bf16.vlgmr.msra.gmra.mxu0 %v9065_v6  ;;  %v8056_v6 = vld [vmem:[%s8994_s9 + $0x650] ss:$8 sps:$4 sm:$0xff]  }
  0xdb   : > { %1907 = vmatmul.mubr.bf16.vlgmr.msra.gmra.mxu1 %v9070_v7  ;;  %2349 = vmatpush1.bf16.msra.mxu0 %v8044_v50  ;;  %v8059_v7 = vld [vmem:[%s8994_s9 + $0x750] ss:$8 sps:$4 sm:$0xff]  }
  0xdc   : > { %2422 = vmatpush1.bf16.msra.mxu1 %v8047_v51  ;;  %2350 = vmatprep.subr.bf16.mxu0 %v8052_v52  ;;  %v8140_v50 = vld [vmem:[%s8994_s9 + $0x870] ss:$8 sps:$4 sm:$0xff]   ;;  %v8148_v52 = vld [vmem:[%s8994_s9 + $0x864] ss:$8 sps:$4 sm:$0xff]  }
  0xdd   : > { %2423 = vmatprep.subr.bf16.mxu1 %v8055_v53  ;;  %1843 = vmatprep.mubr.bf16.mxu0 %v9079_v12  ;;  %v8062_v12 = vld [vmem:[%s8994_s9 + $0x640] ss:$8 sps:$4 sm:$0xff]   ;;  %v8143_v51 = vld [vmem:[%s8994_s9 + $0x970] ss:$8 sps:$4 sm:$0xff]   ;;  %v8151_v53 = vld [vmem:[%s8994_s9 + $0x964] ss:$8 sps:$4 sm:$0xff]  }
  0xde   : > { %1916 = vmatprep.mubr.bf16.mxu1 %v9084_v13  ;;  %v8065_v13 = vld [vmem:[%s8994_s9 + $0x740] ss:$8 sps:$4 sm:$0xff]  }
  0xdf   : > { %2351 = vmatpush1.bf16.msra.mxu0 %v8050_v54 }
  0xe0   : > { %2424 = vmatpush1.bf16.msra.mxu1 %v8053_v55  ;;  %2352 = vmatprep.subr.bf16.mxu0 %v8058_v56  ;;  %v9389_v56 = vld [vmem:[%s11063_s1] ss:$16 sps:$4 sm:$0xff]  }
  0xe1   : > { %2425 = vmatprep.subr.bf16.mxu1 %v8061_v0  ;;  %v9395_v0 = vld [vmem:[%s11063_s1 + $0x8] ss:$16 sps:$4 sm:$0xff]  }
  0xe2   : > { %1844 = vmatmul.mubr.bf16.gmra.mxu0 %v9097_v18  ;;  %v8068_v18 = vld [vmem:[%s8994_s9 + $0x630] ss:$8 sps:$4 sm:$0xff]  }
  0xe3   : > { %1917 = vmatmul.mubr.bf16.gmra.mxu1 %v9103_v20  ;;  %2353 = vmatpush1.bf16.msra.mxu0 %v8056_v6  ;;  %v8071_v20 = vld [vmem:[%s8994_s9 + $0x730] ss:$8 sps:$4 sm:$0xff]  }
  0xe4   : > { %2426 = vmatpush1.bf16.msra.mxu1 %v8059_v7  ;;  %2354 = vmatprep.subr.bf16.mxu0 %v8064_v1  ;;  %v8146_v7 = vld [vmem:[%s8994_s9 + $0x860] ss:$8 sps:$4 sm:$0xff]  }
  0xe5   : > { %2427 = vmatprep.subr.bf16.mxu1 %v8067_v57  ;;  %1853 = vmatprep.mubr.bf16.mxu0 %v9111_v24  ;;  %v8074_v24 = vld [vmem:[%s8994_s9 + $0x620] ss:$8 sps:$4 sm:$0xff]  }
  0xe6   : > { %1926 = vmatprep.mubr.bf16.mxu1 %v9116_v25  ;;  %v8077_v25 = vld [vmem:[%s8994_s9 + $0x720] ss:$8 sps:$4 sm:$0xff]  }
  0xe7   : > { %2355 = vmatpush1.bf16.msra.mxu0 %v8062_v12  ;;  %v8149_v1 = vld [vmem:[%s8994_s9 + $0x960] ss:$8 sps:$4 sm:$0xff]  }
  0xe8   : > { %2428 = vmatpush1.bf16.msra.mxu1 %v8065_v13  ;;  %2356 = vmatprep.subr.bf16.mxu0 %v8070_v58  ;;  %v8154_v13 = vld [vmem:[%s8994_s9 + $0x854] ss:$8 sps:$4 sm:$0xff]  }
  0xe9   : > { %2429 = vmatprep.subr.bf16.mxu1 %v8073_v59  ;;  %v8157_v58 = vld [vmem:[%s8994_s9 + $0x954] ss:$8 sps:$4 sm:$0xff]  }
  0xea   : > { %1854 = vmatmul.mubr.bf16.gmra.mxu0 %v9130_v31  ;;  %v8080_v31 = vld [vmem:[%s8994_s9 + $0x610] ss:$8 sps:$4 sm:$0xff]  }
  0xeb   : > { %1927 = vmatmul.mubr.bf16.gmra.mxu1 %v9135_v32  ;;  %2357 = vmatpush1.bf16.msra.mxu0 %v8068_v18  ;;  %v8083_v32 = vld [vmem:[%s8994_s9 + $0x710] ss:$8 sps:$4 sm:$0xff]   ;;  %v9405_v18 = vld [vmem:[%s11063_s1 + $0x24] ss:$16 sps:$4 sm:$0xff]  }
  0xec   : > { %2430 = vmatpush1.bf16.msra.mxu1 %v8071_v20  ;;  %2358 = vmatprep.subr.bf16.mxu0 %v8076_v60  ;;  %v9411_v20 = vld [vmem:[%s11063_s1 + $0x2c] ss:$16 sps:$4 sm:$0xff]  }
  0xed   : > { %2431 = vmatprep.subr.bf16.mxu1 %v8079_v61  ;;  %1863 = vmatprep.mubr.bf16.mxu0 %v9143_v36  ;;  %v8086_v36 = vld [vmem:[%s8994_s9 + $0x600] ss:$8 sps:$4 sm:$0xff]  }
  0xee   : > { %1936 = vmatprep.mubr.bf16.mxu1 %v9148_v37  ;;  %v8089_v37 = vld [vmem:[%s8994_s9 + $0x700] ss:$8 sps:$4 sm:$0xff]  }
  0xef   : > { %2359 = vmatpush1.bf16.msra.mxu0 %v8074_v24 }
  0xf0   : > { %2432 = vmatpush1.bf16.msra.mxu1 %v8077_v25  ;;  %2360 = vmatprep.subr.bf16.mxu0 %v8082_v62  ;;  %v8152_v25 = vld [vmem:[%s8994_s9 + $0x850] ss:$8 sps:$4 sm:$0xff]  }
  0xf1   : > { %2433 = vmatprep.subr.bf16.mxu1 %v8085_v63  ;;  %v8155_v62 = vld [vmem:[%s8994_s9 + $0x950] ss:$8 sps:$4 sm:$0xff]  }
  0xf2   : > { %1864 = vmatmul.mubr.bf16.gmra.mxu0 %v9161_v42  ;;  %v8092_v42 = vld [vmem:[%s8994_s9 + $0x6f0] ss:$8 sps:$4 sm:$0xff]  }
  0xf3   : > { %1937 = vmatmul.mubr.bf16.gmra.mxu1 %v9166_v43  ;;  %2361 = vmatpush1.bf16.msra.mxu0 %v8080_v31  ;;  %v8095_v43 = vld [vmem:[%s8994_s9 + $0x7f0] ss:$8 sps:$4 sm:$0xff]  }
  0xf4   : > { %2434 = vmatpush1.bf16.msra.mxu1 %v8083_v32  ;;  %2362 = vmatprep.subr.bf16.mxu0 %v8088_v4  ;;  %v8160_v32 = vld [vmem:[%s8994_s9 + $0x844] ss:$8 sps:$4 sm:$0xff]  }
  0xf5   : > { %2435 = vmatprep.subr.bf16.mxu1 %v8091_v5  ;;  %2380 = vmatprep.mubr.bf16.mxu0 %v9261_v2  ;;  %v8101_v2 = vld [vmem:[%s8994_s9 + $0x7e0] ss:$8 sps:$4 sm:$0xff]   ;;  %v8163_v4 = vld [vmem:[%s8994_s9 + $0x944] ss:$8 sps:$4 sm:$0xff]  }
  0xf6   : > { %2453 = vmatprep.mubr.bf16.mxu1 %v9267_v3  ;;  %v8106_v3 = vld [vmem:[%s8994_s9 + $0x6d4] ss:$8 sps:$4 sm:$0xff]  }
  0xf7   : > { %2363 = vmatpush1.bf16.msra.mxu0 %v8086_v36 }
  0xf8   : > { %2436 = vmatpush1.bf16.msra.mxu1 %v8089_v37  ;;  %2364 = vmatprep.subr.bf16.mxu0 %v8094_v8  ;;  %v9422_v8 = vld [vmem:[%s11063_s1 + $0x20] ss:$16 sps:$4 sm:$0xff]  }
  0xf9   : > { %2437 = vmatprep.subr.bf16.mxu1 %v8097_v9  ;;  %v9428_v9 = vld [vmem:[%s11063_s1 + $0x28] ss:$16 sps:$4 sm:$0xff]  }
  0xfb   : > { %2365 = vmatpush2.bf16.msra.mxu0 %v8092_v42  ;;  %v8158_v42 = vld [vmem:[%s8994_s9 + $0x840] ss:$8 sps:$4 sm:$0xff]  }
  0xfc   : > { %2438 = vmatpush2.bf16.msra.mxu1 %v8095_v43  ;;  %2366 = vmatprep.subr.bf16.mxu0 %v8100_v10  ;;  %v8161_v43 = vld [vmem:[%s8994_s9 + $0x940] ss:$8 sps:$4 sm:$0xff]  }
  0xfd   : > { %2439 = vmatprep.subr.bf16.mxu1 %v8103_v11  ;;  %v8166_v11 = vld [vmem:[%s8994_s9 + $0x834] ss:$8 sps:$4 sm:$0xff]  }
  0xff   : > { %2367 = vmatpush2.bf16.msra.mxu0 %v8098_v14  ;;  %v8169_v14 = vld [vmem:[%s8994_s9 + $0x934] ss:$8 sps:$4 sm:$0xff]  }
 0x100   : > { %2440 = vmatpush2.bf16.msra.mxu1 %v8101_v2  ;;  %2368 = vmatprep.subr.bf16.mxu0 %v8106_v3 }
 0x101   : > { %2441 = vmatprep.subr.bf16.mxu1 %v8109_v15 }
 0x103   : > { %2369 = vmatpush2.bf16.msra.mxu0 %v8104_v16  ;;  %v9439_v16 = vld [vmem:[%s11063_s1 + $0x44] ss:$16 sps:$4 sm:$0xff]  }
 0x104   : > { %2442 = vmatpush2.bf16.msra.mxu1 %v8107_v17  ;;  %2370 = vmatprep.subr.bf16.mxu0 %v8112_v19  ;;  %v9445_v17 = vld [vmem:[%s11063_s1 + $0x4c] ss:$16 sps:$4 sm:$0xff]  }
 0x105   : > { %2443 = vmatprep.subr.bf16.mxu1 %v8115_v21 }
 0x107   : > { %2371 = vmatpush2.bf16.msra.mxu0 %v8110_v22  ;;  %v8164_v22 = vld [vmem:[%s8994_s9 + $0x830] ss:$8 sps:$4 sm:$0xff]  }
 0x108   : > { %2444 = vmatpush2.bf16.msra.mxu1 %v8113_v23  ;;  %2372 = vmatprep.subr.bf16.mxu0 %v8118_v26  ;;  %v8167_v23 = vld [vmem:[%s8994_s9 + $0x930] ss:$8 sps:$4 sm:$0xff]  }
 0x109   : > { %2445 = vmatprep.subr.bf16.mxu1 %v8121_v27  ;;  %v8172_v27 = vld [vmem:[%s8994_s9 + $0x824] ss:$8 sps:$4 sm:$0xff]  }
 0x10b   : > { %2373 = vmatpush2.bf16.msra.mxu0 %v8116_v28  ;;  %v8175_v28 = vld [vmem:[%s8994_s9 + $0x924] ss:$8 sps:$4 sm:$0xff]  }
 0x10c   : > { %2446 = vmatpush2.bf16.msra.mxu1 %v8119_v29  ;;  %2374 = vmatprep.subr.bf16.mxu0 %v8124_v30 }
 0x10d   : > { %2447 = vmatprep.subr.bf16.mxu1 %v8127_v33 }
 0x10f   : > { %2375 = vmatpush2.bf16.msra.mxu0 %v8122_v34 }
 0x110   : > { %2448 = vmatpush2.bf16.msra.mxu1 %v8125_v35  ;;  %2376 = vmatprep.subr.bf16.mxu0 %v8130_v38  ;;  %v9456_v38 = vld [vmem:[%s11063_s1 + $0x40] ss:$16 sps:$4 sm:$0xff]  }
 0x111   : > { %2449 = vmatprep.subr.bf16.mxu1 %v8133_v39  ;;  %v9462_v39 = vld [vmem:[%s11063_s1 + $0x48] ss:$16 sps:$4 sm:$0xff]  }
 0x113   : > { %2377 = vmatpush2.bf16.msra.mxu0 %v8128_v40  ;;  %v8170_v40 = vld [vmem:[%s8994_s9 + $0x820] ss:$8 sps:$4 sm:$0xff]  }
 0x114   : > { %2450 = vmatpush2.bf16.msra.mxu1 %v8131_v41  ;;  %2378 = vmatprep.subr.bf16.mxu0 %v8136_v44  ;;  %v8173_v41 = vld [vmem:[%s8994_s9 + $0x920] ss:$8 sps:$4 sm:$0xff]  }
 0x115   : > { %2451 = vmatprep.subr.bf16.mxu1 %v8139_v45  ;;  %v8178_v45 = vld [vmem:[%s8994_s9 + $0x814] ss:$8 sps:$4 sm:$0xff]  }
 0x117   : > { %2379 = vmatpush2.bf16.msra.mxu0 %v8134_v46  ;;  %v8181_v46 = vld [vmem:[%s8994_s9 + $0x914] ss:$8 sps:$4 sm:$0xff]  }
 0x118   : > { %2452 = vmatpush2.bf16.msra.mxu1 %v8137_v47  ;;  %2895 = vmatprep.subr.bf16.mxu0 %v8142_v48 }
 0x119   : > { %2968 = vmatprep.subr.bf16.mxu1 %v8145_v49 }
 0x11a   : > { %v740_v54 = vpop.f32.mrf.mxu0  ;;  %2381 = vmatmul.mubr.bf16.vlgmr.msra.gmra.mxu0 %v9389_v56 }
 0x11b   : > { %v813_v55 = vpop.f32.mrf.mxu1  ;;  %2454 = vmatmul.mubr.bf16.vlgmr.msra.gmra.mxu1 %v9395_v0  ;;  %2896 = vmatpush1.bf16.msra.mxu0 %v8140_v50  ;;  %v9473_v50 = vld [vmem:[%s11063_s1 + $0x64] ss:$16 sps:$4 sm:$0xff]  }
 0x11c   : > { %v814_v6 = vadd.f32 %v813_v55, %v740_v54  ;;  %2969 = vmatpush1.bf16.msra.mxu1 %v8143_v51  ;;  %v742_v57 = vpop.f32.mrf.mxu0  ;;  %2897 = vmatprep.subr.bf16.mxu0 %v8148_v52  ;;  %v9479_v51 = vld [vmem:[%s11063_s1 + $0x6c] ss:$16 sps:$4 sm:$0xff]   ;;  %v8176_v54 = vld [vmem:[%s8994_s9 + $0x810] ss:$8 sps:$4 sm:$0xff]  }
 0x11d   : > { %v815_v12 = vpop.f32.mrf.mxu1  ;;  %2970 = vmatprep.subr.bf16.mxu1 %v8151_v53  ;;  %2390 = vmatprep.mubr.bf16.mxu0 %v9405_v18  ;;  %v8179_v55 = vld [vmem:[%s8994_s9 + $0x910] ss:$8 sps:$4 sm:$0xff]  }
 0x11e   : > { %852 = vst [vmem:[#allocation2] sm:$0xff] %v814_v6  ;;  %v816_v59 = vadd.f32 %v815_v12, %v742_v57  ;;  %2463 = vmatprep.mubr.bf16.mxu1 %v9411_v20  ;;  %v744_v60 = vpop.f32.mrf.mxu0 }
 0x11f   : > { %v817_v61 = vpop.f32.mrf.mxu1  ;;  %2898 = vmatpush1.bf16.msra.mxu0 %v8146_v7  ;;  %v8184_v7 = vld [vmem:[%s8994_s9 + $0x804] ss:$8 sps:$4 sm:$0xff]  }
 0x120   : > { %854 = vst.msk [vmem:[#allocation2 + $0x8] sm:$0xff] %vm853_vm0, %v816_v59  ;;  %v818_v24 = vadd.f32 %v817_v61, %v744_v60  ;;  %2971 = vmatpush1.bf16.msra.mxu1 %v8149_v1  ;;  %v746_v63 = vpop.f32.mrf.mxu0  ;;  %2899 = vmatprep.subr.bf16.mxu0 %v8154_v13  ;;  %v8187_v1 = vld [vmem:[%s8994_s9 + $0x904] ss:$8 sps:$4 sm:$0xff]   ;;  %v9490_v60 = vld [vmem:[%s11063_s1 + $0x60] ss:$16 sps:$4 sm:$0xff]  }
 0x121   : > { %v819_v31 = vpop.f32.mrf.mxu1  ;;  %2972 = vmatprep.subr.bf16.mxu1 %v8157_v58  ;;  %v9496_v61 = vld [vmem:[%s11063_s1 + $0x68] ss:$16 sps:$4 sm:$0xff]  }
 0x122   : > { %855 = vst [vmem:[#allocation2 + $0x10] sm:$0xff] %v818_v24  ;;  %v820_v5 = vadd.f32 %v819_v31, %v746_v63  ;;  %v750_v36 = vpop.f32.mrf.mxu0  ;;  %2391 = vmatmul.mubr.bf16.gmra.mxu0 %v9422_v8  ;;  %v8182_v24 = vld [vmem:[%s8994_s9 + $0x800] ss:$8 sps:$4 sm:$0xff]   ;;  %v8190_v63 = vld [vmem:[%s8994_s9 + $0x8f4] ss:$8 sps:$4 sm:$0xff]  }
 0x123   : > { %v823_v37 = vpop.f32.mrf.mxu1  ;;  %2464 = vmatmul.mubr.bf16.gmra.mxu1 %v9428_v9  ;;  %2900 = vmatpush1.bf16.msra.mxu0 %v8152_v25  ;;  %v8185_v25 = vld [vmem:[%s8994_s9 + $0x900] ss:$8 sps:$4 sm:$0xff]   ;;  %v8193_v31 = vld [vmem:[%s8994_s9 + $0x9f4] ss:$8 sps:$4 sm:$0xff]  }
 0x124   : > { %856 = vst.msk [vmem:[#allocation2 + $0x18] sm:$0xff] %vm853_vm0, %v820_v5  ;;  %2973 = vmatpush1.bf16.msra.mxu1 %v8155_v62  ;;  %v824_v10 = vadd.f32 %v823_v37, %v750_v36  ;;  %2901 = vmatprep.subr.bf16.mxu0 %v8160_v32  ;;  %v752_v2 = vpop.f32.mrf.mxu0  ;;  %v9507_v36 = vld [vmem:[%s11063_s1 + $0x4] ss:$16 sps:$4 sm:$0xff]   ;;  %v9513_v37 = vld [vmem:[%s11063_s1 + $0xc] ss:$16 sps:$4 sm:$0xff]  }
 0x125   : > { %2974 = vmatprep.subr.bf16.mxu1 %v8163_v4  ;;  %v825_v3 = vpop.f32.mrf.mxu1  ;;  %2400 = vmatprep.mubr.bf16.mxu0 %v9439_v16 }
 0x126   : > { %857 = vst [vmem:[#allocation2 + $0x20] sm:$0xff] %v824_v10  ;;  %v826_v15 = vadd.f32 %v825_v3, %v752_v2  ;;  %2473 = vmatprep.mubr.bf16.mxu1 %v9445_v17  ;;  %v754_v19 = vpop.f32.mrf.mxu0  ;;  %v8188_v10 = vld [vmem:[%s8994_s9 + $0x8f0] ss:$8 sps:$4 sm:$0xff]   ;;  %v8196_v2 = vld [vmem:[%s8994_s9 + $0x8e4] ss:$8 sps:$4 sm:$0xff]  }
 0x127   : > { %v827_v21 = vpop.f32.mrf.mxu1  ;;  %2902 = vmatpush1.bf16.msra.mxu0 %v8158_v42  ;;  %v8199_v3 = vld [vmem:[%s8994_s9 + $0x9e4] ss:$8 sps:$4 sm:$0xff]  }
 0x128   : > { %2975 = vmatpush1.bf16.msra.mxu1 %v8161_v43  ;;  %858 = vst.msk [vmem:[#allocation2 + $0x28] sm:$0xff] %vm853_vm0, %v826_v15  ;;  %v828_v26 = vadd.f32 %v827_v21, %v754_v19  ;;  %2903 = vmatprep.subr.bf16.mxu0 %v8166_v11  ;;  %v756_v29 = vpop.f32.mrf.mxu0  ;;  %v8191_v11 = vld [vmem:[%s8994_s9 + $0x9f0] ss:$8 sps:$4 sm:$0xff]  }
 0x129   : > { %2976 = vmatprep.subr.bf16.mxu1 %v8169_v14  ;;  %v829_v30 = vpop.f32.mrf.mxu1 }
 0x12a   : > { %859 = vst [vmem:[#allocation2 + $0x30] sm:$0xff] %v828_v26  ;;  %v830_v33 = vadd.f32 %v829_v30, %v756_v29  ;;  %v760_v34 = vpop.f32.mrf.mxu0  ;;  %2401 = vmatmul.mubr.bf16.gmra.mxu0 %v9456_v38  ;;  %v8202_v26 = vld [vmem:[%s8994_s9 + $0x8d4] ss:$8 sps:$4 sm:$0xff]   ;;  %v8203_v29 = vld [vmem:[%s8994_s9 + $0x9d0] ss:$8 sps:$4 sm:$0xff]  }
 0x12b   : > { %v833_v35 = vpop.f32.mrf.mxu1  ;;  %2474 = vmatmul.mubr.bf16.gmra.mxu1 %v9462_v39  ;;  %2904 = vmatpush1.bf16.msra.mxu0 %v8164_v22  ;;  %v8194_v22 = vld [vmem:[%s8994_s9 + $0x8e0] ss:$8 sps:$4 sm:$0xff]   ;;  %v8208_v30 = vld [vmem:[%s8994_s9 + $0x8c4] ss:$8 sps:$4 sm:$0xff]  }
 0x12c   : > { %2977 = vmatpush1.bf16.msra.mxu1 %v8167_v23  ;;  %860 = vst.msk [vmem:[#allocation2 + $0x38] sm:$0xff] %vm853_vm0, %v830_v33  ;;  %v834_v44 = vadd.f32 %v833_v35, %v760_v34  ;;  %2905 = vmatprep.subr.bf16.mxu0 %v8172_v27  ;;  %v762_v47 = vpop.f32.mrf.mxu0  ;;  %v8197_v23 = vld [vmem:[%s8994_s9 + $0x9e0] ss:$8 sps:$4 sm:$0xff]   ;;  %v8205_v27 = vld [vmem:[%s8994_s9 + $0x9d4] ss:$8 sps:$4 sm:$0xff]  }
 0x12d   : > { %2978 = vmatprep.subr.bf16.mxu1 %v8175_v28  ;;  %v835_v48 = vpop.f32.mrf.mxu1  ;;  %2410 = vmatprep.mubr.bf16.mxu0 %v9473_v50  ;;  %v8200_v28 = vld [vmem:[%s8994_s9 + $0x8d0] ss:$8 sps:$4 sm:$0xff]   ;;  %v8211_v33 = vld [vmem:[%s8994_s9 + $0x9c4] ss:$8 sps:$4 sm:$0xff]   ;;  %v8206_v34 = vld [vmem:[%s8994_s9 + $0x8c0] ss:$8 sps:$4 sm:$0xff]  }
 0x12e   : > { %861 = vst [vmem:[#allocation2 + $0x40] sm:$0xff] %v834_v44  ;;  %v836_v49 = vadd.f32 %v835_v48, %v762_v47  ;;  %2483 = vmatprep.mubr.bf16.mxu1 %v9479_v51  ;;  %v764_v52 = vpop.f32.mrf.mxu0  ;;  %v8209_v35 = vld [vmem:[%s8994_s9 + $0x9c0] ss:$8 sps:$4 sm:$0xff]   ;;  %v8212_v44 = vld [vmem:[%s8994_s9 + $0x8b0] ss:$8 sps:$4 sm:$0xff]  }
 0x12f   : > { %v837_v53 = vpop.f32.mrf.mxu1  ;;  %2906 = vmatpush1.bf16.msra.mxu0 %v8170_v40  ;;  %v8214_v40 = vld [vmem:[%s8994_s9 + $0x8b4] ss:$8 sps:$4 sm:$0xff]   ;;  %v8223_v47 = vld [vmem:[%s8994_s9 + $0x9a4] ss:$8 sps:$4 sm:$0xff]   ;;  %v8218_v48 = vld [vmem:[%s8994_s9 + $0x8a0] ss:$8 sps:$4 sm:$0xff]  }
 0x130   : > { %2979 = vmatpush1.bf16.msra.mxu1 %v8173_v41  ;;  %862 = vst.msk [vmem:[#allocation2 + $0x48] sm:$0xff] %vm853_vm0, %v836_v49  ;;  %v838_v6 = vadd.f32 %v837_v53, %v764_v52  ;;  %2907 = vmatprep.subr.bf16.mxu0 %v8178_v45  ;;  %v766_v57 = vpop.f32.mrf.mxu0  ;;  %v8217_v41 = vld [vmem:[%s8994_s9 + $0x9b4] ss:$8 sps:$4 sm:$0xff]   ;;  %v8215_v45 = vld [vmem:[%s8994_s9 + $0x9b0] ss:$8 sps:$4 sm:$0xff]  }
 0x131   : > { %2980 = vmatprep.subr.bf16.mxu1 %v8181_v46  ;;  %v839_v12 = vpop.f32.mrf.mxu1  ;;  %v8220_v46 = vld [vmem:[%s8994_s9 + $0x8a4] ss:$8 sps:$4 sm:$0xff]   ;;  %v8221_v49 = vld [vmem:[%s8994_s9 + $0x9a0] ss:$8 sps:$4 sm:$0xff]   ;;  %v8226_v52 = vld [vmem:[%s8994_s9 + $0x894] ss:$8 sps:$4 sm:$0xff]  }
 0x132   : > { %863 = vst [vmem:[#allocation2 + $0x50] sm:$0xff] %v838_v6  ;;  %v840_v13 = vadd.f32 %v839_v12, %v766_v57  ;;  %v770_v58 = vpop.f32.mrf.mxu0  ;;  %2411 = vmatmul.mubr.bf16.gmra.mxu0 %v9490_v60  ;;  %v8229_v53 = vld [vmem:[%s8994_s9 + $0x994] ss:$8 sps:$4 sm:$0xff]   ;;  %v8232_v6 = vld [vmem:[%s8994_s9 + $0x884] ss:$8 sps:$4 sm:$0xff]  }
 0x133   : > { %v843_v59 = vpop.f32.mrf.mxu1  ;;  %2484 = vmatmul.mubr.bf16.gmra.mxu1 %v9496_v61  ;;  %2908 = vmatpush1.bf16.msra.mxu0 %v8176_v54  ;;  %v8224_v54 = vld [vmem:[%s8994_s9 + $0x890] ss:$8 sps:$4 sm:$0xff]   ;;  %v8233_v57 = vld [vmem:[%s8994_s9 + $0x980] ss:$8 sps:$4 sm:$0xff]   ;;  %v8238_v12 = vld [vmem:[%s8994_s9 + $0xa74] ss:$8 sps:$4 sm:$0xff]  }
 0x134   : > { %2981 = vmatpush1.bf16.msra.mxu1 %v8179_v55  ;;  %864 = vst.msk [vmem:[#allocation2 + $0x58] sm:$0xff] %vm853_vm0, %v840_v13  ;;  %v844_v62 = vadd.f32 %v843_v59, %v770_v58  ;;  %2909 = vmatprep.subr.bf16.mxu0 %v8184_v7  ;;  %v772_v32 = vpop.f32.mrf.mxu0  ;;  %v8227_v55 = vld [vmem:[%s8994_s9 + $0x990] ss:$8 sps:$4 sm:$0xff]   ;;  %v8235_v7 = vld [vmem:[%s8994_s9 + $0x984] ss:$8 sps:$4 sm:$0xff]  }
 0x135   : > { %2982 = vmatprep.subr.bf16.mxu1 %v8187_v1  ;;  %v845_v4 = vpop.f32.mrf.mxu1  ;;  %2927 = vmatprep.mubr.bf16.mxu0 %v9507_v36  ;;  %v8230_v1 = vld [vmem:[%s8994_s9 + $0x880] ss:$8 sps:$4 sm:$0xff]   ;;  %v8241_v13 = vld [vmem:[%s8994_s9 + $0xb74] ss:$8 sps:$4 sm:$0xff]   ;;  %v8236_v58 = vld [vmem:[%s8994_s9 + $0xa70] ss:$8 sps:$4 sm:$0xff]  }
 0x136   : > { %865 = vst [vmem:[#allocation2 + $0x60] sm:$0xff] %v844_v62  ;;  %v846_v5 = vadd.f32 %v845_v4, %v772_v32  ;;  %3000 = vmatprep.mubr.bf16.mxu1 %v9513_v37  ;;  %v774_v42 = vpop.f32.mrf.mxu0  ;;  %v8239_v59 = vld [vmem:[%s8994_s9 + $0xb70] ss:$8 sps:$4 sm:$0xff]   ;;  %v8242_v62 = vld [vmem:[%s8994_s9 + $0xa60] ss:$8 sps:$4 sm:$0xff]  }
 0x137   : > { %v847_v43 = vpop.f32.mrf.mxu1  ;;  %2910 = vmatpush1.bf16.msra.mxu0 %v8182_v24  ;;  %v8244_v24 = vld [vmem:[%s8994_s9 + $0xa64] ss:$8 sps:$4 sm:$0xff]  }
 0x138   : > { %2983 = vmatpush1.bf16.msra.mxu1 %v8185_v25  ;;  %866 = vst.msk [vmem:[#allocation2 + $0x68] sm:$0xff] %vm853_vm0, %v846_v5  ;;  %v848_v14 = vadd.f32 %v847_v43, %v774_v42  ;;  %2911 = vmatprep.subr.bf16.mxu0 %v8190_v63  ;;  %v776_v15 = vpop.f32.mrf.mxu0  ;;  %v8247_v25 = vld [vmem:[%s8994_s9 + $0xb64] ss:$8 sps:$4 sm:$0xff]   ;;  %v8245_v63 = vld [vmem:[%s8994_s9 + $0xb60] ss:$8 sps:$4 sm:$0xff]  }
 0x139   : > { %2984 = vmatprep.subr.bf16.mxu1 %v8193_v31  ;;  %v849_v19 = vpop.f32.mrf.mxu1  ;;  %v8250_v43 = vld [vmem:[%s8994_s9 + $0xa54] ss:$8 sps:$4 sm:$0xff]  }
 0x13a   : > { %867 = vst [vmem:[#allocation2 + $0x70] sm:$0xff] %v848_v14  ;;  %v850_v21 = vadd.f32 %v849_v19, %v776_v15  ;;  %v8248_v14 = vld [vmem:[%s8994_s9 + $0xa50] ss:$8 sps:$4 sm:$0xff]  }
 0x13b   : > { %2912 = vmatpush2.bf16.msra.mxu0 %v8188_v10  ;;  %v8253_v10 = vld [vmem:[%s8994_s9 + $0xb54] ss:$8 sps:$4 sm:$0xff]  }
 0x13c   : > { %2985 = vmatpush2.bf16.msra.mxu1 %v8191_v11  ;;  %868 = vst.msk [vmem:[#allocation2 + $0x78] sm:$0xff] %vm853_vm0, %v850_v21  ;;  %2913 = vmatprep.subr.bf16.mxu0 %v8196_v2  ;;  %v8251_v2 = vld [vmem:[%s8994_s9 + $0xb50] ss:$8 sps:$4 sm:$0xff]   ;;  %v8256_v21 = vld [vmem:[%s8994_s9 + $0xa44] ss:$8 sps:$4 sm:$0xff]  }
 0x13d   : > { %2986 = vmatprep.subr.bf16.mxu1 %v8199_v3 }
 0x13f   : > { %2914 = vmatpush2.bf16.msra.mxu0 %v8194_v22  ;;  %v8259_v22 = vld [vmem:[%s8994_s9 + $0xb44] ss:$8 sps:$4 sm:$0xff]  }
 0x140   : > { %2987 = vmatpush2.bf16.msra.mxu1 %v8197_v23  ;;  %2915 = vmatprep.subr.bf16.mxu0 %v8202_v26  ;;  %v8254_v26 = vld [vmem:[%s8994_s9 + $0xa40] ss:$8 sps:$4 sm:$0xff]  }
 0x141   : > { %2988 = vmatprep.subr.bf16.mxu1 %v8205_v27  ;;  %v8257_v27 = vld [vmem:[%s8994_s9 + $0xb40] ss:$8 sps:$4 sm:$0xff]  }
 0x143   : > { %2916 = vmatpush2.bf16.msra.mxu0 %v8200_v28 }
 0x144   : > { %2989 = vmatpush2.bf16.msra.mxu1 %v8203_v29  ;;  %2917 = vmatprep.subr.bf16.mxu0 %v8208_v30  ;;  %v8262_v29 = vld [vmem:[%s8994_s9 + $0xa34] ss:$8 sps:$4 sm:$0xff]  }
 0x145   : > { %2990 = vmatprep.subr.bf16.mxu1 %v8211_v33  ;;  %v8265_v30 = vld [vmem:[%s8994_s9 + $0xb34] ss:$8 sps:$4 sm:$0xff]  }
 0x147   : > { %2918 = vmatpush2.bf16.msra.mxu0 %v8206_v34 }
 0x148   : > { %2991 = vmatpush2.bf16.msra.mxu1 %v8209_v35  ;;  %2919 = vmatprep.subr.bf16.mxu0 %v8214_v40  ;;  %v8260_v40 = vld [vmem:[%s8994_s9 + $0xa30] ss:$8 sps:$4 sm:$0xff]  }
 0x149   : > { %2992 = vmatprep.subr.bf16.mxu1 %v8217_v41  ;;  %v8263_v41 = vld [vmem:[%s8994_s9 + $0xb30] ss:$8 sps:$4 sm:$0xff]  }
 0x14b   : > { %2920 = vmatpush2.bf16.msra.mxu0 %v8212_v44 }
 0x14c   : > { %2993 = vmatpush2.bf16.msra.mxu1 %v8215_v45  ;;  %2921 = vmatprep.subr.bf16.mxu0 %v8220_v46  ;;  %v8268_v45 = vld [vmem:[%s8994_s9 + $0xa24] ss:$8 sps:$4 sm:$0xff]  }
 0x14d   : > { %2994 = vmatprep.subr.bf16.mxu1 %v8223_v47  ;;  %v8271_v46 = vld [vmem:[%s8994_s9 + $0xb24] ss:$8 sps:$4 sm:$0xff]  }
 0x14f   : > { %2922 = vmatpush2.bf16.msra.mxu0 %v8218_v48 }
 0x150   : > { %2995 = vmatpush2.bf16.msra.mxu1 %v8221_v49  ;;  %2923 = vmatprep.subr.bf16.mxu0 %v8226_v52  ;;  %v8266_v52 = vld [vmem:[%s8994_s9 + $0xa20] ss:$8 sps:$4 sm:$0xff]  }
 0x151   : > { %2996 = vmatprep.subr.bf16.mxu1 %v8229_v53  ;;  %v8269_v53 = vld [vmem:[%s8994_s9 + $0xb20] ss:$8 sps:$4 sm:$0xff]  }
 0x153   : > { %2924 = vmatpush2.bf16.msra.mxu0 %v8224_v54 }
 0x154   : > { %2997 = vmatpush2.bf16.msra.mxu1 %v8227_v55  ;;  %2925 = vmatprep.subr.bf16.mxu0 %v8232_v6  ;;  %v8274_v55 = vld [vmem:[%s8994_s9 + $0xa14] ss:$8 sps:$4 sm:$0xff]  }
 0x155   : > { %2998 = vmatprep.subr.bf16.mxu1 %v8235_v7  ;;  %v8277_v6 = vld [vmem:[%s8994_s9 + $0xb14] ss:$8 sps:$4 sm:$0xff]  }
 0x157   : > { %2926 = vmatpush2.bf16.msra.mxu0 %v8230_v1 }
 0x158   : > { %2999 = vmatpush2.bf16.msra.mxu1 %v8233_v57  ;;  %3442 = vmatprep.subr.bf16.mxu0 %v8238_v12  ;;  %v8272_v12 = vld [vmem:[%s8994_s9 + $0xa10] ss:$8 sps:$4 sm:$0xff]  }
 0x159   : > { %3515 = vmatprep.subr.bf16.mxu1 %v8241_v13  ;;  %v8275_v13 = vld [vmem:[%s8994_s9 + $0xb10] ss:$8 sps:$4 sm:$0xff]  }
 0x15a   : > { %v1288_v31 = vpop.f32.mrf.mxu0  ;;  %2928 = vmatmul.mubr.bf16.vlgmr.msra.gmra.mxu0 %v9389_v56 }
 0x15b   : > { %v1361_v32 = vpop.f32.mrf.mxu1  ;;  %3001 = vmatmul.mubr.bf16.vlgmr.msra.gmra.mxu1 %v9395_v0  ;;  %3443 = vmatpush1.bf16.msra.mxu0 %v8236_v58 }
 0x15c   : > { %v1362_v4 = vadd.f32 %v1361_v32, %v1288_v31  ;;  %3516 = vmatpush1.bf16.msra.mxu1 %v8239_v59  ;;  %v1290_v5 = vpop.f32.mrf.mxu0  ;;  %3444 = vmatprep.subr.bf16.mxu0 %v8244_v24  ;;  %v8280_v59 = vld [vmem:[%s8994_s9 + $0xa04] ss:$8 sps:$4 sm:$0xff]   ;;  %v8278_v31 = vld [vmem:[%s8994_s9 + $0xa00] ss:$8 sps:$4 sm:$0xff]  }
 0x15d   : > { %v1363_v42 = vpop.f32.mrf.mxu1  ;;  %3517 = vmatprep.subr.bf16.mxu1 %v8247_v25  ;;  %2937 = vmatprep.mubr.bf16.mxu0 %v9405_v18  ;;  %v8283_v24 = vld [vmem:[%s8994_s9 + $0xb04] ss:$8 sps:$4 sm:$0xff]   ;;  %v8281_v32 = vld [vmem:[%s8994_s9 + $0xb00] ss:$8 sps:$4 sm:$0xff]  }
 0x15e   : > { %1400 = vst [vmem:[#allocation2 + $0x80] sm:$0xff] %v1362_v4  ;;  %v1364_v11 = vadd.f32 %v1363_v42, %v1290_v5  ;;  %3010 = vmatprep.mubr.bf16.mxu1 %v9411_v20  ;;  %v1292_v56 = vpop.f32.mrf.mxu0  ;;  %v8286_v5 = vld [vmem:[%s8994_s9 + $0xaf4] ss:$8 sps:$4 sm:$0xff]  }
 0x15f   : > { %v1365_v0 = vpop.f32.mrf.mxu1  ;;  %3445 = vmatpush1.bf16.msra.mxu0 %v8242_v62  ;;  %v8289_v42 = vld [vmem:[%s8994_s9 + $0xbf4] ss:$8 sps:$4 sm:$0xff]  }
 0x160   : > { %1401 = vst.msk [vmem:[#allocation2 + $0x88] sm:$0xff] %vm853_vm0, %v1364_v11  ;;  %v1366_v3 = vadd.f32 %v1365_v0, %v1292_v56  ;;  %3518 = vmatpush1.bf16.msra.mxu1 %v8245_v63  ;;  %v1294_v15 = vpop.f32.mrf.mxu0  ;;  %3446 = vmatprep.subr.bf16.mxu0 %v8250_v43  ;;  %v8292_v0 = vld [vmem:[%s8994_s9 + $0xae4] ss:$8 sps:$4 sm:$0xff]  }
 0x161   : > { %v1367_v19 = vpop.f32.mrf.mxu1  ;;  %3519 = vmatprep.subr.bf16.mxu1 %v8253_v10 }
 0x162   : > { %1402 = vst [vmem:[#allocation2 + $0x90] sm:$0xff] %v1366_v3  ;;  %v1368_v18 = vadd.f32 %v1367_v19, %v1294_v15  ;;  %v1298_v20 = vpop.f32.mrf.mxu0  ;;  %2938 = vmatmul.mubr.bf16.gmra.mxu0 %v9422_v8  ;;  %v8295_v3 = vld [vmem:[%s8994_s9 + $0xbe4] ss:$8 sps:$4 sm:$0xff]  }
 0x163   : > { %v1371_v23 = vpop.f32.mrf.mxu1  ;;  %3011 = vmatmul.mubr.bf16.gmra.mxu1 %v9428_v9  ;;  %3447 = vmatpush1.bf16.msra.mxu0 %v8248_v14  ;;  %v8284_v14 = vld [vmem:[%s8994_s9 + $0xaf0] ss:$8 sps:$4 sm:$0xff]  }
 0x164   : > { %1403 = vst.msk [vmem:[#allocation2 + $0x98] sm:$0xff] %vm853_vm0, %v1368_v18  ;;  %3520 = vmatpush1.bf16.msra.mxu1 %v8251_v2  ;;  %v1372_v28 = vadd.f32 %v1371_v23, %v1298_v20  ;;  %3448 = vmatprep.subr.bf16.mxu0 %v8256_v21  ;;  %v1300_v33 = vpop.f32.mrf.mxu0  ;;  %v8287_v2 = vld [vmem:[%s8994_s9 + $0xbf0] ss:$8 sps:$4 sm:$0xff]   ;;  %v8293_v18 = vld [vmem:[%s8994_s9 + $0xbe0] ss:$8 sps:$4 sm:$0xff]  }
 0x165   : > { %3521 = vmatprep.subr.bf16.mxu1 %v8259_v22  ;;  %v1373_v34 = vpop.f32.mrf.mxu1  ;;  %2947 = vmatprep.mubr.bf16.mxu0 %v9439_v16  ;;  %v8290_v22 = vld [vmem:[%s8994_s9 + $0xae0] ss:$8 sps:$4 sm:$0xff]   ;;  %v8298_v20 = vld [vmem:[%s8994_s9 + $0xad4] ss:$8 sps:$4 sm:$0xff]  }
 0x166   : > { %1404 = vst [vmem:[#allocation2 + $0xa0] sm:$0xff] %v1372_v28  ;;  %v1374_v8 = vadd.f32 %v1373_v34, %v1300_v33  ;;  %3020 = vmatprep.mubr.bf16.mxu1 %v9445_v17  ;;  %v1302_v9 = vpop.f32.mrf.mxu0  ;;  %v8301_v23 = vld [vmem:[%s8994_s9 + $0xbd4] ss:$8 sps:$4 sm:$0xff]   ;;  %v8304_v28 = vld [vmem:[%s8994_s9 + $0xac4] ss:$8 sps:$4 sm:$0xff]  }
 0x167   : > { %v1375_v35 = vpop.f32.mrf.mxu1  ;;  %3449 = vmatpush1.bf16.msra.mxu0 %v8254_v26  ;;  %v8296_v26 = vld [vmem:[%s8994_s9 + $0xad0] ss:$8 sps:$4 sm:$0xff]   ;;  %v8305_v33 = vld [vmem:[%s8994_s9 + $0xbc0] ss:$8 sps:$4 sm:$0xff]   ;;  %v8310_v34 = vld [vmem:[%s8994_s9 + $0xab4] ss:$8 sps:$4 sm:$0xff]  }
 0x168   : > { %3522 = vmatpush1.bf16.msra.mxu1 %v8257_v27  ;;  %1405 = vst.msk [vmem:[#allocation2 + $0xa8] sm:$0xff] %vm853_vm0, %v1374_v8  ;;  %v1376_v44 = vadd.f32 %v1375_v35, %v1302_v9  ;;  %3450 = vmatprep.subr.bf16.mxu0 %v8262_v29  ;;  %v1304_v47 = vpop.f32.mrf.mxu0  ;;  %v8299_v27 = vld [vmem:[%s8994_s9 + $0xbd0] ss:$8 sps:$4 sm:$0xff]   ;;  %v8307_v29 = vld [vmem:[%s8994_s9 + $0xbc4] ss:$8 sps:$4 sm:$0xff]  }
 0x169   : > { %3523 = vmatprep.subr.bf16.mxu1 %v8265_v30  ;;  %v1377_v16 = vpop.f32.mrf.mxu1  ;;  %v8302_v30 = vld [vmem:[%s8994_s9 + $0xac0] ss:$8 sps:$4 sm:$0xff]   ;;  %v8313_v8 = vld [vmem:[%s8994_s9 + $0xbb4] ss:$8 sps:$4 sm:$0xff]   ;;  %v8308_v9 = vld [vmem:[%s8994_s9 + $0xab0] ss:$8 sps:$4 sm:$0xff]  }
 0x16a   : > { %1406 = vst [vmem:[#allocation2 + $0xb0] sm:$0xff] %v1376_v44  ;;  %v1378_v17 = vadd.f32 %v1377_v16, %v1304_v47  ;;  %v1308_v48 = vpop.f32.mrf.mxu0  ;;  %2948 = vmatmul.mubr.bf16.gmra.mxu0 %v9456_v38  ;;  %v8311_v35 = vld [vmem:[%s8994_s9 + $0xbb0] ss:$8 sps:$4 sm:$0xff]   ;;  %v8314_v44 = vld [vmem:[%s8994_s9 + $0xaa0] ss:$8 sps:$4 sm:$0xff]  }
 0x16b   : > { %v1381_v49 = vpop.f32.mrf.mxu1  ;;  %3021 = vmatmul.mubr.bf16.gmra.mxu1 %v9462_v39  ;;  %3451 = vmatpush1.bf16.msra.mxu0 %v8260_v40  ;;  %v8316_v40 = vld [vmem:[%s8994_s9 + $0xaa4] ss:$8 sps:$4 sm:$0xff]   ;;  %v8325_v47 = vld [vmem:[%s8994_s9 + $0xb94] ss:$8 sps:$4 sm:$0xff]   ;;  %v8320_v16 = vld [vmem:[%s8994_s9 + $0xa90] ss:$8 sps:$4 sm:$0xff]  }
 0x16c   : > { %3524 = vmatpush1.bf16.msra.mxu1 %v8263_v41  ;;  %1407 = vst.msk [vmem:[#allocation2 + $0xb8] sm:$0xff] %vm853_vm0, %v1378_v17  ;;  %v1382_v54 = vadd.f32 %v1381_v49, %v1308_v48  ;;  %3452 = vmatprep.subr.bf16.mxu0 %v8268_v45  ;;  %v1310_v7 = vpop.f32.mrf.mxu0  ;;  %v8319_v41 = vld [vmem:[%s8994_s9 + $0xba4] ss:$8 sps:$4 sm:$0xff]   ;;  %v8317_v45 = vld [vmem:[%s8994_s9 + $0xba0] ss:$8 sps:$4 sm:$0xff]  }
 0x16d   : > { %3525 = vmatprep.subr.bf16.mxu1 %v8271_v46  ;;  %v1383_v1 = vpop.f32.mrf.mxu1  ;;  %2957 = vmatprep.mubr.bf16.mxu0 %v9473_v50  ;;  %v8322_v46 = vld [vmem:[%s8994_s9 + $0xa94] ss:$8 sps:$4 sm:$0xff]   ;;  %v8323_v17 = vld [vmem:[%s8994_s9 + $0xb90] ss:$8 sps:$4 sm:$0xff]   ;;  %v8328_v48 = vld [vmem:[%s8994_s9 + $0xa84] ss:$8 sps:$4 sm:$0xff]  }
 0x16e   : > { %1408 = vst [vmem:[#allocation2 + $0xc0] sm:$0xff] %v1382_v54  ;;  %v1384_v38 = vadd.f32 %v1383_v1, %v1310_v7  ;;  %3030 = vmatprep.mubr.bf16.mxu1 %v9479_v51  ;;  %v1312_v39 = vpop.f32.mrf.mxu0  ;;  %v8331_v49 = vld [vmem:[%s8994_s9 + $0xb84] ss:$8 sps:$4 sm:$0xff]   ;;  %v8334_v54 = vld [vmem:[%s8994_s9 + $0xc74] ss:$8 sps:$4 sm:$0xff]  }
 0x16f   : > { %v1385_v57 = vpop.f32.mrf.mxu1  ;;  %3453 = vmatpush1.bf16.msra.mxu0 %v8266_v52  ;;  %v8326_v52 = vld [vmem:[%s8994_s9 + $0xa80] ss:$8 sps:$4 sm:$0xff]   ;;  %v8335_v7 = vld [vmem:[%s8994_s9 + $0xd70] ss:$8 sps:$4 sm:$0xff]   ;;  %v8340_v1 = vld [vmem:[%s8994_s9 + $0xc64] ss:$8 sps:$4 sm:$0xff]  }
 0x170   : > { %3526 = vmatpush1.bf16.msra.mxu1 %v8269_v53  ;;  %1409 = vst.msk [vmem:[#allocation2 + $0xc8] sm:$0xff] %vm853_vm0, %v1384_v38  ;;  %v1386_v58 = vadd.f32 %v1385_v57, %v1312_v39  ;;  %3454 = vmatprep.subr.bf16.mxu0 %v8274_v55  ;;  %v1314_v25 = vpop.f32.mrf.mxu0  ;;  %v8329_v53 = vld [vmem:[%s8994_s9 + $0xb80] ss:$8 sps:$4 sm:$0xff]   ;;  %v8337_v55 = vld [vmem:[%s8994_s9 + $0xd74] ss:$8 sps:$4 sm:$0xff]  }
 0x171   : > { %3527 = vmatprep.subr.bf16.mxu1 %v8277_v6  ;;  %v1387_v50 = vpop.f32.mrf.mxu1  ;;  %v8332_v6 = vld [vmem:[%s8994_s9 + $0xc70] ss:$8 sps:$4 sm:$0xff]   ;;  %v8343_v38 = vld [vmem:[%s8994_s9 + $0xd64] ss:$8 sps:$4 sm:$0xff]  }
 0x172   : > { %1410 = vst [vmem:[#allocation2 + $0xd0] sm:$0xff] %v1386_v58  ;;  %v1388_v51 = vadd.f32 %v1387_v50, %v1314_v25  ;;  %v1318_v62 = vpop.f32.mrf.mxu0  ;;  %2958 = vmatmul.mubr.bf16.gmra.mxu0 %v9490_v60 }
 0x173   : > { %v1391_v63 = vpop.f32.mrf.mxu1  ;;  %3031 = vmatmul.mubr.bf16.gmra.mxu1 %v9496_v61  ;;  %3455 = vmatpush1.bf16.msra.mxu0 %v8272_v12  ;;  %v9645_v12 = vld [vmem:[%s11063_s1] ss:$16 sps:$4 sm:$0xff]  }
 0x174   : > { %3528 = vmatpush1.bf16.msra.mxu1 %v8275_v13  ;;  %1411 = vst.msk [vmem:[#allocation2 + $0xd8] sm:$0xff] %vm853_vm0, %v1388_v51  ;;  %v1392_v4 = vadd.f32 %v1391_v63, %v1318_v62  ;;  %3456 = vmatprep.subr.bf16.mxu0 %v8280_v59  ;;  %v1320_v43 = vpop.f32.mrf.mxu0  ;;  %v9651_v13 = vld [vmem:[%s11063_s1 + $0x8] ss:$16 sps:$4 sm:$0xff]   ;;  %v8346_v51 = vld [vmem:[%s8994_s9 + $0xc54] ss:$8 sps:$4 sm:$0xff]  }
 0x175   : > { %3529 = vmatprep.subr.bf16.mxu1 %v8283_v24  ;;  %v1393_v10 = vpop.f32.mrf.mxu1  ;;  %3474 = vmatprep.mubr.bf16.mxu0 %v9507_v36  ;;  %v8338_v59 = vld [vmem:[%s8994_s9 + $0xc60] ss:$8 sps:$4 sm:$0xff]   ;;  %v8349_v62 = vld [vmem:[%s8994_s9 + $0xd54] ss:$8 sps:$4 sm:$0xff]  }
 0x176   : > { %1412 = vst [vmem:[#allocation2 + $0xe0] sm:$0xff] %v1392_v4  ;;  %v1394_v60 = vadd.f32 %v1393_v10, %v1320_v43  ;;  %3547 = vmatprep.mubr.bf16.mxu1 %v9513_v37  ;;  %v1322_v61 = vpop.f32.mrf.mxu0  ;;  %v8341_v24 = vld [vmem:[%s8994_s9 + $0xd60] ss:$8 sps:$4 sm:$0xff]   ;;  %v8344_v43 = vld [vmem:[%s8994_s9 + $0xc50] ss:$8 sps:$4 sm:$0xff]  }
 0x177   : > { %v1395_v11 = vpop.f32.mrf.mxu1  ;;  %3457 = vmatpush1.bf16.msra.mxu0 %v8278_v31  ;;  %v9661_v31 = vld [vmem:[%s11063_s1 + $0x24] ss:$16 sps:$4 sm:$0xff]   ;;  %v8347_v10 = vld [vmem:[%s8994_s9 + $0xd50] ss:$8 sps:$4 sm:$0xff]  }
 0x178   : > { %3530 = vmatpush1.bf16.msra.mxu1 %v8281_v32  ;;  %1413 = vst.msk [vmem:[#allocation2 + $0xe8] sm:$0xff] %vm853_vm0, %v1394_v60  ;;  %v1396_v56 = vadd.f32 %v1395_v11, %v1322_v61  ;;  %3458 = vmatprep.subr.bf16.mxu0 %v8286_v5  ;;  %v1324_v15 = vpop.f32.mrf.mxu0  ;;  %v9667_v32 = vld [vmem:[%s11063_s1 + $0x2c] ss:$16 sps:$4 sm:$0xff]  }
 0x179   : > { %3531 = vmatprep.subr.bf16.mxu1 %v8289_v42  ;;  %v1397_v19 = vpop.f32.mrf.mxu1  ;;  %v8352_v11 = vld [vmem:[%s8994_s9 + $0xc44] ss:$8 sps:$4 sm:$0xff]  }
 0x17a   : > { %1414 = vst [vmem:[#allocation2 + $0xf0] sm:$0xff] %v1396_v56  ;;  %v1398_v21 = vadd.f32 %v1397_v19, %v1324_v15  ;;  %v9684_v15 = vld [vmem:[%s11063_s1 + $0x28] ss:$16 sps:$4 sm:$0xff]  }
 0x17b   : > { %3459 = vmatpush2.bf16.msra.mxu0 %v8284_v14  ;;  %v8355_v14 = vld [vmem:[%s8994_s9 + $0xd44] ss:$8 sps:$4 sm:$0xff]   ;;  %v8350_v19 = vld [vmem:[%s8994_s9 + $0xc40] ss:$8 sps:$4 sm:$0xff]  }
 0x17c   : > { %3532 = vmatpush2.bf16.msra.mxu1 %v8287_v2  ;;  %1415 = vst.msk [vmem:[#allocation2 + $0xf8] sm:$0xff] %vm853_vm0, %v1398_v21  ;;  %3460 = vmatprep.subr.bf16.mxu0 %v8292_v0  ;;  %v8353_v21 = vld [vmem:[%s8994_s9 + $0xd40] ss:$8 sps:$4 sm:$0xff]  }
 0x17d   : > { %3533 = vmatprep.subr.bf16.mxu1 %v8295_v3  ;;  %v9678_v3 = vld [vmem:[%s11063_s1 + $0x20] ss:$16 sps:$4 sm:$0xff]  }
 0x17f   : > { %3461 = vmatpush2.bf16.msra.mxu0 %v8290_v22 }
 0x180   : > { %3534 = vmatpush2.bf16.msra.mxu1 %v8293_v18  ;;  %3462 = vmatprep.subr.bf16.mxu0 %v8298_v20  ;;  %v8358_v18 = vld [vmem:[%s8994_s9 + $0xc34] ss:$8 sps:$4 sm:$0xff]  }
 0x181   : > { %3535 = vmatprep.subr.bf16.mxu1 %v8301_v23  ;;  %v8361_v20 = vld [vmem:[%s8994_s9 + $0xd34] ss:$8 sps:$4 sm:$0xff]  }
 0x183   : > { %3463 = vmatpush2.bf16.msra.mxu0 %v8296_v26 }
 0x184   : > { %3536 = vmatpush2.bf16.msra.mxu1 %v8299_v27  ;;  %3464 = vmatprep.subr.bf16.mxu0 %v8304_v28  ;;  %v9695_v28 = vld [vmem:[%s11063_s1 + $0x44] ss:$16 sps:$4 sm:$0xff]  }
 0x185   : > { %3537 = vmatprep.subr.bf16.mxu1 %v8307_v29  ;;  %v9701_v29 = vld [vmem:[%s11063_s1 + $0x4c] ss:$16 sps:$4 sm:$0xff]  }
 0x187   : > { %3465 = vmatpush2.bf16.msra.mxu0 %v8302_v30 }
 0x188   : > { %3538 = vmatpush2.bf16.msra.mxu1 %v8305_v33  ;;  %3466 = vmatprep.subr.bf16.mxu0 %v8310_v34  ;;  %v8356_v34 = vld [vmem:[%s8994_s9 + $0xc30] ss:$8 sps:$4 sm:$0xff]  }
 0x189   : > { %3539 = vmatprep.subr.bf16.mxu1 %v8313_v8  ;;  %v8359_v8 = vld [vmem:[%s8994_s9 + $0xd30] ss:$8 sps:$4 sm:$0xff]  }
 0x18b   : > { %3467 = vmatpush2.bf16.msra.mxu0 %v8308_v9 }
 0x18c   : > { %3540 = vmatpush2.bf16.msra.mxu1 %v8311_v35  ;;  %3468 = vmatprep.subr.bf16.mxu0 %v8316_v40  ;;  %v8364_v35 = vld [vmem:[%s8994_s9 + $0xc24] ss:$8 sps:$4 sm:$0xff]  }
 0x18d   : > { %3541 = vmatprep.subr.bf16.mxu1 %v8319_v41  ;;  %v8367_v40 = vld [vmem:[%s8994_s9 + $0xd24] ss:$8 sps:$4 sm:$0xff]  }
 0x18f   : > { %3469 = vmatpush2.bf16.msra.mxu0 %v8314_v44 }
 0x190   : > { %3542 = vmatpush2.bf16.msra.mxu1 %v8317_v45  ;;  %3470 = vmatprep.subr.bf16.mxu0 %v8322_v46 }
 0x191   : > { %3543 = vmatprep.subr.bf16.mxu1 %v8325_v47 }
 0x193   : > { %3471 = vmatpush2.bf16.msra.mxu0 %v8320_v16  ;;  %v9712_v16 = vld [vmem:[%s11063_s1 + $0x40] ss:$16 sps:$4 sm:$0xff]  }
 0x194   : > { %3544 = vmatpush2.bf16.msra.mxu1 %v8323_v17  ;;  %3472 = vmatprep.subr.bf16.mxu0 %v8328_v48  ;;  %v9718_v17 = vld [vmem:[%s11063_s1 + $0x48] ss:$16 sps:$4 sm:$0xff]  }
 0x195   : > { %3545 = vmatprep.subr.bf16.mxu1 %v8331_v49  ;;  %v8362_v48 = vld [vmem:[%s8994_s9 + $0xc20] ss:$8 sps:$4 sm:$0xff]  }
 0x196   : > { %v8365_v49 = vld [vmem:[%s8994_s9 + $0xd20] ss:$8 sps:$4 sm:$0xff]  }
 0x197   : > { %3473 = vmatpush2.bf16.msra.mxu0 %v8326_v52 }
 0x198   : > { %3546 = vmatpush2.bf16.msra.mxu1 %v8329_v53  ;;  %3989 = vmatprep.subr.bf16.mxu0 %v8334_v54  ;;  %v8370_v53 = vld [vmem:[%s8994_s9 + $0xc14] ss:$8 sps:$4 sm:$0xff]  }
 0x199   : > { %4062 = vmatprep.subr.bf16.mxu1 %v8337_v55  ;;  %v8373_v54 = vld [vmem:[%s8994_s9 + $0xd14] ss:$8 sps:$4 sm:$0xff]  }
 0x19a   : > { %v1835_v39 = vpop.f32.mrf.mxu0  ;;  %3475 = vmatmul.mubr.bf16.vlgmr.msra.gmra.mxu0 %v9645_v12 }
 0x19b   : > { %v1908_v57 = vpop.f32.mrf.mxu1  ;;  %3548 = vmatmul.mubr.bf16.vlgmr.msra.gmra.mxu1 %v9651_v13  ;;  %3990 = vmatpush1.bf16.msra.mxu0 %v8332_v6 }
 0x19c   : > { %v1909_v58 = vadd.f32 %v1908_v57, %v1835_v39  ;;  %4063 = vmatpush1.bf16.msra.mxu1 %v8335_v7  ;;  %v1837_v25 = vpop.f32.mrf.mxu0  ;;  %3991 = vmatprep.subr.bf16.mxu0 %v8340_v1  ;;  %v9729_v1 = vld [vmem:[%s11063_s1 + $0x64] ss:$16 sps:$4 sm:$0xff]  }
 0x19d   : > { %v1910_v50 = vpop.f32.mrf.mxu1  ;;  %4064 = vmatprep.subr.bf16.mxu1 %v8343_v38  ;;  %3484 = vmatprep.mubr.bf16.mxu0 %v9661_v31  ;;  %v9735_v38 = vld [vmem:[%s11063_s1 + $0x6c] ss:$16 sps:$4 sm:$0xff]  }
 0x19e   : > { %1947 = vst [vmem:[#allocation2 + $0x100] sm:$0xff] %v1909_v58  ;;  %v1911_v63 = vadd.f32 %v1910_v50, %v1837_v25  ;;  %3557 = vmatprep.mubr.bf16.mxu1 %v9667_v32  ;;  %v1839_v4 = vpop.f32.mrf.mxu0  ;;  %v8368_v58 = vld [vmem:[%s8994_s9 + $0xc10] ss:$8 sps:$4 sm:$0xff]   ;;  %v8376_v25 = vld [vmem:[%s8994_s9 + $0xc04] ss:$8 sps:$4 sm:$0xff]  }
 0x19f   : > { %v1912_v5 = vpop.f32.mrf.mxu1  ;;  %3992 = vmatpush1.bf16.msra.mxu0 %v8338_v59  ;;  %v8371_v59 = vld [vmem:[%s8994_s9 + $0xd10] ss:$8 sps:$4 sm:$0xff]   ;;  %v8379_v50 = vld [vmem:[%s8994_s9 + $0xd04] ss:$8 sps:$4 sm:$0xff]  }
 0x1a0   : > { %1948 = vst.msk [vmem:[#allocation2 + $0x108] sm:$0xff] %vm853_vm0, %v1911_v63  ;;  %v1913_v42 = vadd.f32 %v1912_v5, %v1839_v4  ;;  %4065 = vmatpush1.bf16.msra.mxu1 %v8341_v24  ;;  %v1841_v60 = vpop.f32.mrf.mxu0  ;;  %3993 = vmatprep.subr.bf16.mxu0 %v8346_v51 }
 0x1a1   : > { %v1914_v61 = vpop.f32.mrf.mxu1  ;;  %4066 = vmatprep.subr.bf16.mxu1 %v8349_v62 }
 0x1a2   : > { %1949 = vst [vmem:[#allocation2 + $0x110] sm:$0xff] %v1913_v42  ;;  %v1915_v2 = vadd.f32 %v1914_v61, %v1841_v60  ;;  %v1845_v56 = vpop.f32.mrf.mxu0  ;;  %3485 = vmatmul.mubr.bf16.gmra.mxu0 %v9678_v3  ;;  %v9746_v42 = vld [vmem:[%s11063_s1 + $0x60] ss:$16 sps:$4 sm:$0xff]  }
 0x1a3   : > { %v1918_v0 = vpop.f32.mrf.mxu1  ;;  %3558 = vmatmul.mubr.bf16.gmra.mxu1 %v9684_v15  ;;  %3994 = vmatpush1.bf16.msra.mxu0 %v8344_v43  ;;  %v9752_v43 = vld [vmem:[%s11063_s1 + $0x68] ss:$16 sps:$4 sm:$0xff]  }
 0x1a4   : > { %1950 = vst.msk [vmem:[#allocation2 + $0x118] sm:$0xff] %vm853_vm0, %v1915_v2  ;;  %4067 = vmatpush1.bf16.msra.mxu1 %v8347_v10  ;;  %v1919_v22 = vadd.f32 %v1918_v0, %v1845_v56  ;;  %3995 = vmatprep.subr.bf16.mxu0 %v8352_v11  ;;  %v1847_v23 = vpop.f32.mrf.mxu0  ;;  %v8374_v10 = vld [vmem:[%s8994_s9 + $0xc00] ss:$8 sps:$4 sm:$0xff]   ;;  %v8382_v11 = vld [vmem:[%s8994_s9 + $0xcf4] ss:$8 sps:$4 sm:$0xff]  }
 0x1a5   : > { %4068 = vmatprep.subr.bf16.mxu1 %v8355_v14  ;;  %v1920_v26 = vpop.f32.mrf.mxu1  ;;  %3494 = vmatprep.mubr.bf16.mxu0 %v9695_v28  ;;  %v8377_v60 = vld [vmem:[%s8994_s9 + $0xd00] ss:$8 sps:$4 sm:$0xff]   ;;  %v8385_v14 = vld [vmem:[%s8994_s9 + $0xdf4] ss:$8 sps:$4 sm:$0xff]  }
 0x1a6   : > { %1951 = vst [vmem:[#allocation2 + $0x120] sm:$0xff] %v1919_v22  ;;  %v1921_v27 = vadd.f32 %v1920_v26, %v1847_v23  ;;  %3567 = vmatprep.mubr.bf16.mxu1 %v9701_v29  ;;  %v1849_v30 = vpop.f32.mrf.mxu0  ;;  %v8380_v22 = vld [vmem:[%s8994_s9 + $0xcf0] ss:$8 sps:$4 sm:$0xff]   ;;  %v8388_v23 = vld [vmem:[%s8994_s9 + $0xce4] ss:$8 sps:$4 sm:$0xff]  }
 0x1a7   : > { %v1922_v33 = vpop.f32.mrf.mxu1  ;;  %3996 = vmatpush1.bf16.msra.mxu0 %v8350_v19  ;;  %v8391_v26 = vld [vmem:[%s8994_s9 + $0xde4] ss:$8 sps:$4 sm:$0xff]  }
 0x1a8   : > { %4069 = vmatpush1.bf16.msra.mxu1 %v8353_v21  ;;  %1952 = vst.msk [vmem:[#allocation2 + $0x128] sm:$0xff] %vm853_vm0, %v1921_v27  ;;  %v1923_v9 = vadd.f32 %v1922_v33, %v1849_v30  ;;  %3997 = vmatprep.subr.bf16.mxu0 %v8358_v18  ;;  %v1851_v41 = vpop.f32.mrf.mxu0  ;;  %v8383_v18 = vld [vmem:[%s8994_s9 + $0xdf0] ss:$8 sps:$4 sm:$0xff]   ;;  %v8386_v30 = vld [vmem:[%s8994_s9 + $0xce0] ss:$8 sps:$4 sm:$0xff]  }
 0x1a9   : > { %4070 = vmatprep.subr.bf16.mxu1 %v8361_v20  ;;  %v1924_v44 = vpop.f32.mrf.mxu1  ;;  %v8389_v33 = vld [vmem:[%s8994_s9 + $0xde0] ss:$8 sps:$4 sm:$0xff]  }
 0x1aa   : > { %1953 = vst [vmem:[#allocation2 + $0x130] sm:$0xff] %v1923_v9  ;;  %v1925_v45 = vadd.f32 %v1924_v44, %v1851_v41  ;;  %v1855_v46 = vpop.f32.mrf.mxu0  ;;  %3495 = vmatmul.mubr.bf16.gmra.mxu0 %v9712_v16  ;;  %v8392_v9 = vld [vmem:[%s8994_s9 + $0xcd0] ss:$8 sps:$4 sm:$0xff]   ;;  %v8403_v41 = vld [vmem:[%s8994_s9 + $0xdc4] ss:$8 sps:$4 sm:$0xff]  }
 0x1ab   : > { %v1928_v47 = vpop.f32.mrf.mxu1  ;;  %3568 = vmatmul.mubr.bf16.gmra.mxu1 %v9718_v17  ;;  %3998 = vmatpush1.bf16.msra.mxu0 %v8356_v34  ;;  %v8394_v34 = vld [vmem:[%s8994_s9 + $0xcd4] ss:$8 sps:$4 sm:$0xff]   ;;  %v8398_v44 = vld [vmem:[%s8994_s9 + $0xcc0] ss:$8 sps:$4 sm:$0xff]  }
 0x1ac   : > { %4071 = vmatpush1.bf16.msra.mxu1 %v8359_v8  ;;  %1954 = vst.msk [vmem:[#allocation2 + $0x138] sm:$0xff] %vm853_vm0, %v1925_v45  ;;  %v1929_v52 = vadd.f32 %v1928_v47, %v1855_v46  ;;  %3999 = vmatprep.subr.bf16.mxu0 %v8364_v35  ;;  %v1857_v55 = vpop.f32.mrf.mxu0  ;;  %v8397_v8 = vld [vmem:[%s8994_s9 + $0xdd4] ss:$8 sps:$4 sm:$0xff]   ;;  %v8395_v35 = vld [vmem:[%s8994_s9 + $0xdd0] ss:$8 sps:$4 sm:$0xff]  }
 0x1ad   : > { %4072 = vmatprep.subr.bf16.mxu1 %v8367_v40  ;;  %v1930_v6 = vpop.f32.mrf.mxu1  ;;  %3504 = vmatprep.mubr.bf16.mxu0 %v9729_v1  ;;  %v8400_v40 = vld [vmem:[%s8994_s9 + $0xcc4] ss:$8 sps:$4 sm:$0xff]   ;;  %v8401_v45 = vld [vmem:[%s8994_s9 + $0xdc0] ss:$8 sps:$4 sm:$0xff]   ;;  %v8406_v46 = vld [vmem:[%s8994_s9 + $0xcb4] ss:$8 sps:$4 sm:$0xff]  }
 0x1ae   : > { %1955 = vst [vmem:[#allocation2 + $0x140] sm:$0xff] %v1929_v52  ;;  %v1931_v7 = vadd.f32 %v1930_v6, %v1857_v55  ;;  %3577 = vmatprep.mubr.bf16.mxu1 %v9735_v38  ;;  %v1859_v39 = vpop.f32.mrf.mxu0  ;;  %v8409_v47 = vld [vmem:[%s8994_s9 + $0xdb4] ss:$8 sps:$4 sm:$0xff]   ;;  %v8412_v52 = vld [vmem:[%s8994_s9 + $0xca4] ss:$8 sps:$4 sm:$0xff]  }
 0x1af   : > { %v1932_v57 = vpop.f32.mrf.mxu1  ;;  %4000 = vmatpush1.bf16.msra.mxu0 %v8362_v48  ;;  %v8404_v48 = vld [vmem:[%s8994_s9 + $0xcb0] ss:$8 sps:$4 sm:$0xff]   ;;  %v8413_v55 = vld [vmem:[%s8994_s9 + $0xda0] ss:$8 sps:$4 sm:$0xff]   ;;  %v8418_v6 = vld [vmem:[%s8994_s9 + $0xc94] ss:$8 sps:$4 sm:$0xff]  }
 0x1b0   : > { %4073 = vmatpush1.bf16.msra.mxu1 %v8365_v49  ;;  %1956 = vst.msk [vmem:[#allocation2 + $0x148] sm:$0xff] %vm853_vm0, %v1931_v7  ;;  %v1933_v24 = vadd.f32 %v1932_v57, %v1859_v39  ;;  %4001 = vmatprep.subr.bf16.mxu0 %v8370_v53  ;;  %v1861_v51 = vpop.f32.mrf.mxu0  ;;  %v8407_v49 = vld [vmem:[%s8994_s9 + $0xdb0] ss:$8 sps:$4 sm:$0xff]   ;;  %v8415_v53 = vld [vmem:[%s8994_s9 + $0xda4] ss:$8 sps:$4 sm:$0xff]  }
 0x1b1   : > { %4074 = vmatprep.subr.bf16.mxu1 %v8373_v54  ;;  %v1934_v62 = vpop.f32.mrf.mxu1  ;;  %v8410_v54 = vld [vmem:[%s8994_s9 + $0xca0] ss:$8 sps:$4 sm:$0xff]   ;;  %v8421_v7 = vld [vmem:[%s8994_s9 + $0xd94] ss:$8 sps:$4 sm:$0xff]   ;;  %v8416_v39 = vld [vmem:[%s8994_s9 + $0xc90] ss:$8 sps:$4 sm:$0xff]  }
 0x1b2   : > { %1957 = vst [vmem:[#allocation2 + $0x150] sm:$0xff] %v1933_v24  ;;  %v1935_v63 = vadd.f32 %v1934_v62, %v1861_v51  ;;  %v1865_v4 = vpop.f32.mrf.mxu0  ;;  %3505 = vmatmul.mubr.bf16.gmra.mxu0 %v9746_v42  ;;  %v8419_v57 = vld [vmem:[%s8994_s9 + $0xd90] ss:$8 sps:$4 sm:$0xff]   ;;  %v8422_v24 = vld [vmem:[%s8994_s9 + $0xc80] ss:$8 sps:$4 sm:$0xff]  }
 0x1b3   : > { %v1938_v5 = vpop.f32.mrf.mxu1  ;;  %3578 = vmatmul.mubr.bf16.gmra.mxu1 %v9752_v43  ;;  %4002 = vmatpush1.bf16.msra.mxu0 %v8368_v58  ;;  %v8424_v58 = vld [vmem:[%s8994_s9 + $0xc84] ss:$8 sps:$4 sm:$0xff]   ;;  %v8433_v51 = vld [vmem:[%s8994_s9 + $0xf74] ss:$8 sps:$4 sm:$0xff]   ;;  %v8428_v62 = vld [vmem:[%s8994_s9 + $0xe70] ss:$8 sps:$4 sm:$0xff]  }
 0x1b4   : > { %4075 = vmatpush1.bf16.msra.mxu1 %v8371_v59  ;;  %1958 = vst.msk [vmem:[#allocation2 + $0x158] sm:$0xff] %vm853_vm0, %v1935_v63  ;;  %v1939_v61 = vadd.f32 %v1938_v5, %v1865_v4  ;;  %4003 = vmatprep.subr.bf16.mxu0 %v8376_v25  ;;  %v1867_v2 = vpop.f32.mrf.mxu0  ;;  %v8427_v59 = vld [vmem:[%s8994_s9 + $0xd84] ss:$8 sps:$4 sm:$0xff]   ;;  %v8425_v25 = vld [vmem:[%s8994_s9 + $0xd80] ss:$8 sps:$4 sm:$0xff]  }
 0x1b5   : > { %4076 = vmatprep.subr.bf16.mxu1 %v8379_v50  ;;  %v1940_v56 = vpop.f32.mrf.mxu1  ;;  %4021 = vmatprep.mubr.bf16.mxu0 %v9507_v36  ;;  %v8430_v50 = vld [vmem:[%s8994_s9 + $0xe74] ss:$8 sps:$4 sm:$0xff]   ;;  %v8431_v63 = vld [vmem:[%s8994_s9 + $0xf70] ss:$8 sps:$4 sm:$0xff]   ;;  %v8436_v4 = vld [vmem:[%s8994_s9 + $0xe64] ss:$8 sps:$4 sm:$0xff]  }
 0x1b6   : > { %1959 = vst [vmem:[#allocation2 + $0x160] sm:$0xff] %v1939_v61  ;;  %v1941_v0 = vadd.f32 %v1940_v56, %v1867_v2  ;;  %4094 = vmatprep.mubr.bf16.mxu1 %v9513_v37  ;;  %v1869_v19 = vpop.f32.mrf.mxu0  ;;  %v8439_v5 = vld [vmem:[%s8994_s9 + $0xf64] ss:$8 sps:$4 sm:$0xff]  }
 0x1b7   : > { %v1942_v21 = vpop.f32.mrf.mxu1  ;;  %4004 = vmatpush1.bf16.msra.mxu0 %v8374_v10 }
 0x1b8   : > { %4077 = vmatpush1.bf16.msra.mxu1 %v8377_v60  ;;  %1960 = vst.msk [vmem:[#allocation2 + $0x168] sm:$0xff] %vm853_vm0, %v1941_v0  ;;  %v1943_v20 = vadd.f32 %v1942_v21, %v1869_v19  ;;  %4005 = vmatprep.subr.bf16.mxu0 %v8382_v11  ;;  %v1871_v36 = vpop.f32.mrf.mxu0  ;;  %v8434_v11 = vld [vmem:[%s8994_s9 + $0xe60] ss:$8 sps:$4 sm:$0xff]   ;;  %v8442_v0 = vld [vmem:[%s8994_s9 + $0xe54] ss:$8 sps:$4 sm:$0xff]  }
 0x1b9   : > { %4078 = vmatprep.subr.bf16.mxu1 %v8385_v14  ;;  %v1944_v37 = vpop.f32.mrf.mxu1  ;;  %v8437_v14 = vld [vmem:[%s8994_s9 + $0xf60] ss:$8 sps:$4 sm:$0xff]   ;;  %v8445_v19 = vld [vmem:[%s8994_s9 + $0xf54] ss:$8 sps:$4 sm:$0xff]  }
 0x1ba   : > { %1961 = vst [vmem:[#allocation2 + $0x170] sm:$0xff] %v1943_v20  ;;  %v1945_v27 = vadd.f32 %v1944_v37, %v1871_v36 }
 0x1bb   : > { %4006 = vmatpush2.bf16.msra.mxu0 %v8380_v22 }
 0x1bc   : > { %4079 = vmatpush2.bf16.msra.mxu1 %v8383_v18  ;;  %1962 = vst.msk [vmem:[#allocation2 + $0x178] sm:$0xff] %vm853_vm0, %v1945_v27  ;;  %4007 = vmatprep.subr.bf16.mxu0 %v8388_v23  ;;  %v8440_v23 = vld [vmem:[%s8994_s9 + $0xe50] ss:$8 sps:$4 sm:$0xff]   ;;  %v8448_v27 = vld [vmem:[%s8994_s9 + $0xe44] ss:$8 sps:$4 sm:$0xff]  }
 0x1bd   : > { %4080 = vmatprep.subr.bf16.mxu1 %v8391_v26  ;;  %v8443_v26 = vld [vmem:[%s8994_s9 + $0xf50] ss:$8 sps:$4 sm:$0xff]  }
 0x1bf   : > { %4008 = vmatpush2.bf16.msra.mxu0 %v8386_v30  ;;  %v8451_v30 = vld [vmem:[%s8994_s9 + $0xf44] ss:$8 sps:$4 sm:$0xff]  }
 0x1c0   : > { %4081 = vmatpush2.bf16.msra.mxu1 %v8389_v33  ;;  %4009 = vmatprep.subr.bf16.mxu0 %v8394_v34 }
 0x1c1   : > { %4082 = vmatprep.subr.bf16.mxu1 %v8397_v8 }
 0x1c3   : > { %4010 = vmatpush2.bf16.msra.mxu0 %v8392_v9  ;;  %v8446_v9 = vld [vmem:[%s8994_s9 + $0xe40] ss:$8 sps:$4 sm:$0xff]  }
 0x1c4   : > { %4083 = vmatpush2.bf16.msra.mxu1 %v8395_v35  ;;  %4011 = vmatprep.subr.bf16.mxu0 %v8400_v40  ;;  %v8449_v35 = vld [vmem:[%s8994_s9 + $0xf40] ss:$8 sps:$4 sm:$0xff]  }
 0x1c5   : > { %4084 = vmatprep.subr.bf16.mxu1 %v8403_v41  ;;  %v8454_v41 = vld [vmem:[%s8994_s9 + $0xe34] ss:$8 sps:$4 sm:$0xff]  }
 0x1c7   : > { %4012 = vmatpush2.bf16.msra.mxu0 %v8398_v44  ;;  %v8457_v44 = vld [vmem:[%s8994_s9 + $0xf34] ss:$8 sps:$4 sm:$0xff]  }
 0x1c8   : > { %4085 = vmatpush2.bf16.msra.mxu1 %v8401_v45  ;;  %4013 = vmatprep.subr.bf16.mxu0 %v8406_v46 }
 0x1c9   : > { %4086 = vmatprep.subr.bf16.mxu1 %v8409_v47 }
 0x1cb   : > { %4014 = vmatpush2.bf16.msra.mxu0 %v8404_v48 }
 0x1cc   : > { %4087 = vmatpush2.bf16.msra.mxu1 %v8407_v49  ;;  %4015 = vmatprep.subr.bf16.mxu0 %v8412_v52  ;;  %v8452_v52 = vld [vmem:[%s8994_s9 + $0xe30] ss:$8 sps:$4 sm:$0xff]  }
 0x1cd   : > { %4088 = vmatprep.subr.bf16.mxu1 %v8415_v53  ;;  %v8455_v53 = vld [vmem:[%s8994_s9 + $0xf30] ss:$8 sps:$4 sm:$0xff]  }
 0x1cf   : > { %4016 = vmatpush2.bf16.msra.mxu0 %v8410_v54 }
 0x1d0   : > { %4089 = vmatpush2.bf16.msra.mxu1 %v8413_v55  ;;  %4017 = vmatprep.subr.bf16.mxu0 %v8418_v6  ;;  %v8460_v55 = vld [vmem:[%s8994_s9 + $0xe24] ss:$8 sps:$4 sm:$0xff]  }
 0x1d1   : > { %4090 = vmatprep.subr.bf16.mxu1 %v8421_v7  ;;  %v8463_v6 = vld [vmem:[%s8994_s9 + $0xf24] ss:$8 sps:$4 sm:$0xff]  }
 0x1d3   : > { %4018 = vmatpush2.bf16.msra.mxu0 %v8416_v39 }
 0x1d4   : > { %4091 = vmatpush2.bf16.msra.mxu1 %v8419_v57  ;;  %4019 = vmatprep.subr.bf16.mxu0 %v8424_v58 }
 0x1d5   : > { %4092 = vmatprep.subr.bf16.mxu1 %v8427_v59 }
 0x1d7   : > { %4020 = vmatpush2.bf16.msra.mxu0 %v8422_v24 }
 0x1d8   : > { %4093 = vmatpush2.bf16.msra.mxu1 %v8425_v25  ;;  %4536 = vmatprep.subr.bf16.mxu0 %v8430_v50  ;;  %v8458_v25 = vld [vmem:[%s8994_s9 + $0xe20] ss:$8 sps:$4 sm:$0xff]  }
 0x1d9   : > { %4609 = vmatprep.subr.bf16.mxu1 %v8433_v51  ;;  %v8461_v50 = vld [vmem:[%s8994_s9 + $0xf20] ss:$8 sps:$4 sm:$0xff]  }
 0x1da   : > { %v2382_v10 = vpop.f32.mrf.mxu0  ;;  %4022 = vmatmul.mubr.bf16.vlgmr.msra.gmra.mxu0 %v9645_v12 }
 0x1db   : > { %v2455_v60 = vpop.f32.mrf.mxu1  ;;  %4095 = vmatmul.mubr.bf16.vlgmr.msra.gmra.mxu1 %v9651_v13  ;;  %4537 = vmatpush1.bf16.msra.mxu0 %v8428_v62  ;;  %v8466_v62 = vld [vmem:[%s8994_s9 + $0xe14] ss:$8 sps:$4 sm:$0xff]  }
 0x1dc   : > { %v2456_v61 = vadd.f32 %v2455_v60, %v2382_v10  ;;  %4610 = vmatpush1.bf16.msra.mxu1 %v8431_v63  ;;  %v2384_v2 = vpop.f32.mrf.mxu0  ;;  %4538 = vmatprep.subr.bf16.mxu0 %v8436_v4  ;;  %v8469_v63 = vld [vmem:[%s8994_s9 + $0xf14] ss:$8 sps:$4 sm:$0xff]  }
 0x1dd   : > { %v2457_v56 = vpop.f32.mrf.mxu1  ;;  %4611 = vmatprep.subr.bf16.mxu1 %v8439_v5  ;;  %4031 = vmatprep.mubr.bf16.mxu0 %v9661_v31 }
 0x1de   : > { %2494 = vst [vmem:[#allocation2 + $0x180] sm:$0xff] %v2456_v61  ;;  %v2458_v21 = vadd.f32 %v2457_v56, %v2384_v2  ;;  %4104 = vmatprep.mubr.bf16.mxu1 %v9667_v32  ;;  %v2386_v22 = vpop.f32.mrf.mxu0  ;;  %v8472_v56 = vld [vmem:[%s8994_s9 + $0xe04] ss:$8 sps:$4 sm:$0xff]  }
 0x1df   : > { %v2459_v18 = vpop.f32.mrf.mxu1  ;;  %4539 = vmatpush1.bf16.msra.mxu0 %v8434_v11  ;;  %v8464_v11 = vld [vmem:[%s8994_s9 + $0xe10] ss:$8 sps:$4 sm:$0xff]  }
 0x1e0   : > { %2495 = vst.msk [vmem:[#allocation2 + $0x188] sm:$0xff] %vm853_vm0, %v2458_v21  ;;  %v2460_v20 = vadd.f32 %v2459_v18, %v2386_v22  ;;  %4612 = vmatpush1.bf16.msra.mxu1 %v8437_v14  ;;  %v2388_v36 = vpop.f32.mrf.mxu0  ;;  %4540 = vmatprep.subr.bf16.mxu0 %v8442_v0  ;;  %v8467_v14 = vld [vmem:[%s8994_s9 + $0xf10] ss:$8 sps:$4 sm:$0xff]   ;;  %v8475_v0 = vld [vmem:[%s8994_s9 + $0xf04] ss:$8 sps:$4 sm:$0xff]  }
 0x1e1   : > { %v2461_v37 = vpop.f32.mrf.mxu1  ;;  %4613 = vmatprep.subr.bf16.mxu1 %v8445_v19 }
 0x1e2   : > { %2496 = vst [vmem:[#allocation2 + $0x190] sm:$0xff] %v2460_v20  ;;  %v2462_v33 = vadd.f32 %v2461_v37, %v2388_v36  ;;  %v2392_v34 = vpop.f32.mrf.mxu0  ;;  %4032 = vmatmul.mubr.bf16.gmra.mxu0 %v9678_v3  ;;  %v8473_v36 = vld [vmem:[%s8994_s9 + $0xf00] ss:$8 sps:$4 sm:$0xff]  }
 0x1e3   : > { %v2465_v8 = vpop.f32.mrf.mxu1  ;;  %4105 = vmatmul.mubr.bf16.gmra.mxu1 %v9684_v15  ;;  %4541 = vmatpush1.bf16.msra.mxu0 %v8440_v23 }
 0x1e4   : > { %2497 = vst.msk [vmem:[#allocation2 + $0x198] sm:$0xff] %vm853_vm0, %v2462_v33  ;;  %4614 = vmatpush1.bf16.msra.mxu1 %v8443_v26  ;;  %v9818_v40 = vadd.f32 %v2465_v8, %v2392_v34  ;;  %4542 = vmatprep.subr.bf16.mxu0 %v8448_v27  ;;  %v2394_v45 = vpop.f32.mrf.mxu0  ;;  %v8470_v26 = vld [vmem:[%s8994_s9 + $0xe00] ss:$8 sps:$4 sm:$0xff]   ;;  %v8478_v27 = vld [vmem:[%s8994_s9 + $0xef4] ss:$8 sps:$4 sm:$0xff]  }
 0x1e5   : > { %4615 = vmatprep.subr.bf16.mxu1 %v8451_v30  ;;  %v2467_v46 = vpop.f32.mrf.mxu1  ;;  %4041 = vmatprep.mubr.bf16.mxu0 %v9695_v28  ;;  %v8481_v30 = vld [vmem:[%s8994_s9 + $0xff4] ss:$8 sps:$4 sm:$0xff]  }
 0x1e6   : > { %v2468_v47 = vadd.f32 %v2467_v46, %v2394_v45  ;;  %4114 = vmatprep.mubr.bf16.mxu1 %v9701_v29  ;;  %v2396_v48 = vpop.f32.mrf.mxu0  ;;  %v8476_v45 = vld [vmem:[%s8994_s9 + $0xef0] ss:$8 sps:$4 sm:$0xff]  }
 0x1e7   : > { %v2469_v49 = vpop.f32.mrf.mxu1  ;;  %4543 = vmatpush1.bf16.msra.mxu0 %v8446_v9  ;;  %v8833_v9 = vld [vmem:[%s11063_s1 + $0x4] ss:$16 sps:$4 sm:$0xff]   ;;  %v8479_v46 = vld [vmem:[%s8994_s9 + $0xff0] ss:$8 sps:$4 sm:$0xff]  }
 0x1e8   : > { %4616 = vmatpush1.bf16.msra.mxu1 %v8449_v35  ;;  %2499 = vst.msk [vmem:[#allocation2 + $0x1a8] sm:$0xff] %vm853_vm0, %v2468_v47  ;;  %v9827_v54 = vadd.f32 %v2469_v49, %v2396_v48  ;;  %4544 = vmatprep.subr.bf16.mxu0 %v8454_v41  ;;  %v2398_v7 = vpop.f32.mrf.mxu0  ;;  %v8834_v35 = vld [vmem:[%s11063_s1 + $0xc] ss:$16 sps:$4 sm:$0xff]  }
 0x1e9   : > { %4617 = vmatprep.subr.bf16.mxu1 %v8457_v44  ;;  %v2471_v39 = vpop.f32.mrf.mxu1  ;;  %v8484_v48 = vld [vmem:[%s8994_s9 + $0xee4] ss:$8 sps:$4 sm:$0xff]  }
 0x1ea   : > { %v2472_v57 = vadd.f32 %v2471_v39, %v2398_v7  ;;  %v4852_v58 = vpack.c.bf16 %v9827_v54, %v9818_v40  ;;  %v2402_v59 = vpop.f32.mrf.mxu0  ;;  %4042 = vmatmul.mubr.bf16.gmra.mxu0 %v9712_v16  ;;  %v8487_v49 = vld [vmem:[%s8994_s9 + $0xfe4] ss:$8 sps:$4 sm:$0xff]   ;;  %v8482_v7 = vld [vmem:[%s8994_s9 + $0xee0] ss:$8 sps:$4 sm:$0xff]  }
 0x1eb   : > { %v2475_v24 = vpop.f32.mrf.mxu1  ;;  %4115 = vmatmul.mubr.bf16.gmra.mxu1 %v9718_v17  ;;  %4545 = vmatpush1.bf16.msra.mxu0 %v8452_v52  ;;  %v8485_v39 = vld [vmem:[%s8994_s9 + $0xfe0] ss:$8 sps:$4 sm:$0xff]  }
 0x1ec   : > { %4618 = vmatpush1.bf16.msra.mxu1 %v8455_v53  ;;  %2501 = vst.msk [vmem:[#allocation2 + $0x1b8] sm:$0xff] %vm853_vm0, %v2472_v57  ;;  %v9838_v51 = vadd.f32 %v2475_v24, %v2402_v59  ;;  %4546 = vmatprep.subr.bf16.mxu0 %v8460_v55  ;;  %v2404_v4 = vpop.f32.mrf.mxu0  ;;  %v8490_v57 = vld [vmem:[%s8994_s9 + $0xed4] ss:$8 sps:$4 sm:$0xff]   ;;  %v8488_v24 = vld [vmem:[%s8994_s9 + $0xed0] ss:$8 sps:$4 sm:$0xff]  }
 0x1ed   : > { %4619 = vmatprep.subr.bf16.mxu1 %v8463_v6  ;;  %v2477_v5 = vpop.f32.mrf.mxu1  ;;  %4051 = vmatprep.mubr.bf16.mxu0 %v9729_v1  ;;  %v8493_v59 = vld [vmem:[%s8994_s9 + $0xfd4] ss:$8 sps:$4 sm:$0xff]  }
 0x1ee   : > { %v2478_v10 = vadd.f32 %v2477_v5, %v2404_v4  ;;  %4124 = vmatprep.mubr.bf16.mxu1 %v9735_v38  ;;  %v2406_v60 = vpop.f32.mrf.mxu0  ;;  %v8497_v4 = vld [vmem:[%s8994_s9 + $0xfc0] ss:$8 sps:$4 sm:$0xff]   ;;  %v8502_v5 = vld [vmem:[%s8994_s9 + $0xeb4] ss:$8 sps:$4 sm:$0xff]  }
 0x1ef   : > { %v2479_v61 = vpop.f32.mrf.mxu1  ;;  %4547 = vmatpush1.bf16.msra.mxu0 %v8458_v25  ;;  %v8491_v25 = vld [vmem:[%s8994_s9 + $0xfd0] ss:$8 sps:$4 sm:$0xff]  }
 0x1f0   : > { %4620 = vmatpush1.bf16.msra.mxu1 %v8461_v50  ;;  %2503 = vst.msk [vmem:[#allocation2 + $0x1c8] sm:$0xff] %vm853_vm0, %v2478_v10  ;;  %v9847_v2 = vadd.f32 %v2479_v61, %v2406_v60  ;;  %4548 = vmatprep.subr.bf16.mxu0 %v8466_v62  ;;  %v2408_v19 = vpop.f32.mrf.mxu0  ;;  %v8496_v50 = vld [vmem:[%s8994_s9 + $0xec4] ss:$8 sps:$4 sm:$0xff]   ;;  %v8505_v10 = vld [vmem:[%s8994_s9 + $0xfb4] ss:$8 sps:$4 sm:$0xff]  }
 0x1f1   : > { %4621 = vmatprep.subr.bf16.mxu1 %v8469_v63  ;;  %v2481_v21 = vpop.f32.mrf.mxu1  ;;  %v8499_v62 = vld [vmem:[%s8994_s9 + $0xfc4] ss:$8 sps:$4 sm:$0xff]   ;;  %v8494_v63 = vld [vmem:[%s8994_s9 + $0xec0] ss:$8 sps:$4 sm:$0xff]   ;;  %v8500_v60 = vld [vmem:[%s8994_s9 + $0xeb0] ss:$8 sps:$4 sm:$0xff]  }
 0x1f2   : > { %v2482_v22 = vadd.f32 %v2481_v21, %v2408_v19  ;;  %v4854_v18 = vpack.c.bf16 %v9847_v2, %v9838_v51  ;;  %v2412_v20 = vpop.f32.mrf.mxu0  ;;  %4052 = vmatmul.mubr.bf16.gmra.mxu0 %v9746_v42  ;;  %v8503_v61 = vld [vmem:[%s8994_s9 + $0xfb0] ss:$8 sps:$4 sm:$0xff]   ;;  %v8514_v19 = vld [vmem:[%s8994_s9 + $0xe94] ss:$8 sps:$4 sm:$0xff]  }
 0x1f3   : > { %v2485_v23 = vpop.f32.mrf.mxu1  ;;  %4125 = vmatmul.mubr.bf16.gmra.mxu1 %v9752_v43  ;;  %4549 = vmatpush1.bf16.msra.mxu0 %v8464_v11  ;;  %v8508_v11 = vld [vmem:[%s8994_s9 + $0xea4] ss:$8 sps:$4 sm:$0xff]   ;;  %v8517_v21 = vld [vmem:[%s8994_s9 + $0xf94] ss:$8 sps:$4 sm:$0xff]  }
 0x1f4   : > { %4622 = vmatpush1.bf16.msra.mxu1 %v8467_v14  ;;  %2505 = vst.msk [vmem:[#allocation2 + $0x1d8] sm:$0xff] %vm853_vm0, %v2482_v22  ;;  %v9858_v37 = vadd.f32 %v2485_v23, %v2412_v20  ;;  %4550 = vmatprep.subr.bf16.mxu0 %v8472_v56  ;;  %v2414_v33 = vpop.f32.mrf.mxu0  ;;  %v8511_v14 = vld [vmem:[%s8994_s9 + $0xfa4] ss:$8 sps:$4 sm:$0xff]   ;;  %v8506_v56 = vld [vmem:[%s8994_s9 + $0xea0] ss:$8 sps:$4 sm:$0xff]  }
 0x1f5   : > { %4623 = vmatprep.subr.bf16.mxu1 %v8475_v0  ;;  %v2487_v34 = vpop.f32.mrf.mxu1  ;;  %4568 = vmatprep.mubr.bf16.mxu0 %v8833_v9  ;;  %v8509_v0 = vld [vmem:[%s8994_s9 + $0xfa0] ss:$8 sps:$4 sm:$0xff]   ;;  %v8512_v22 = vld [vmem:[%s8994_s9 + $0xe90] ss:$8 sps:$4 sm:$0xff]   ;;  %v8520_v23 = vld [vmem:[%s8994_s9 + $0xe84] ss:$8 sps:$4 sm:$0xff]  }
 0x1f6   : > { %v2488_v8 = vadd.f32 %v2487_v34, %v2414_v33  ;;  %4641 = vmatprep.mubr.bf16.mxu1 %v8834_v35  ;;  %v2416_v41 = vpop.f32.mrf.mxu0  ;;  %v8515_v20 = vld [vmem:[%s8994_s9 + $0xf90] ss:$8 sps:$4 sm:$0xff]   ;;  %v8527_v34 = vld [vmem:[%s11064_s2 + $0x64] ss:$8 sps:$4 sm:$0xff]  }
 0x1f7   : > { %v2489_v44 = vpop.f32.mrf.mxu1  ;;  %4551 = vmatpush1.bf16.msra.mxu0 %v8470_v26  ;;  %v8523_v26 = vld [vmem:[%s8994_s9 + $0xf84] ss:$8 sps:$4 sm:$0xff]   ;;  %v8526_v33 = vld [vmem:[%s11064_s2 + $0x70] ss:$8 sps:$4 sm:$0xff]  }
 0x1f8   : > { %4624 = vmatpush1.bf16.msra.mxu1 %v8473_v36  ;;  %2507 = vst.msk [vmem:[#allocation2 + $0x1e8] sm:$0xff] %vm853_vm0, %v2488_v8  ;;  %v9871_v47 = vadd.f32 %v2489_v44, %v2416_v41  ;;  %4552 = vmatprep.subr.bf16.mxu0 %v8478_v27  ;;  %v2418_v52 = vpop.f32.mrf.mxu0  ;;  %v8518_v36 = vld [vmem:[%s8994_s9 + $0xe80] ss:$8 sps:$4 sm:$0xff]  }
 0x1f9   : > { %4625 = vmatprep.subr.bf16.mxu1 %v8481_v30  ;;  %v2491_v53 = vpop.f32.mrf.mxu1  ;;  %v8521_v27 = vld [vmem:[%s8994_s9 + $0xf80] ss:$8 sps:$4 sm:$0xff]   ;;  %v8524_v30 = vld [vmem:[%s11064_s2 + $0x74] ss:$8 sps:$4 sm:$0xff]   ;;  %s196_s9 = sand.u32 1, %s8887_s16  }
 0x1fa   : > { %v2492_v55 = vadd.f32 %v2491_v53, %v2418_v52  ;;  %v4856_v6 = vpack.c.bf16 %v9871_v47, %v9858_v37  ;;  %v8530_v52 = vld [vmem:[%s11064_s2 + $0x54] ss:$8 sps:$4 sm:$0xff]   ;;  %s6645_s6 = sshll.u32 %s196_s9, 9  ;;  %s10974_s23 = scalar_lea.sflag [#allocation4], %s196_s9 }
 0x1fb   : > { %4553 = vmatpush2.bf16.msra.mxu0 %v8476_v45  ;;  %s10480_s7 = scalar_lea.vmem [#allocation3], %s6645_s6 }
 0x1fc   : > { %4626 = vmatpush2.bf16.msra.mxu1 %v8479_v46  ;;  %2509 = vst.msk [vmem:[#allocation2 + $0x1f8] sm:$0xff] %vm853_vm0, %v2492_v55  ;;  %4554 = vmatprep.subr.bf16.mxu0 %v8484_v48  ;;  %s6554_s22 = sshll.u32 %s10480_s7, 4  ;;  %s10970_s22 = int_to_ptr.vmem [resolvable:$true] %s6554_s22 }
 0x1fd   : > { %4627 = vmatprep.subr.bf16.mxu1 %v8487_v49  ;;  %s8835_s27 = scalar_lea.vmem %s10970_s22, 8192  ;;  %p8842_p0 = scmp.lt.s32.totalorder %s10970_s22, %s8840_s28 }
 0x1fe   : > { %p8836_p11 = scmp.ne.s32.totalorder %s10970_s22, %s8835_s27  ;;  %p8843_p1 = scmp.lt.s32.totalorder %s8841_s29, %s8835_s27 }
 0x1ff   : > { %4555 = vmatpush2.bf16.msra.mxu0 %v8482_v7 }
 0x200   : > { %4628 = vmatpush2.bf16.msra.mxu1 %v8485_v39  ;;  %4556 = vmatprep.subr.bf16.mxu0 %v8490_v57  ;;  %v8532_v57 = vld [vmem:[%s11064_s2 + $0x50] ss:$8 sps:$4 sm:$0xff]   ;;  %p8837_p12 = pnand %p8836_p11, %p8964_p5  ;;  %p8844_p2 = por %p8843_p1, %p8842_p0 }
 0x201   : > { %4629 = vmatprep.subr.bf16.mxu1 %v8493_v59 }
 0x202   : > { %p8838_p13 = pneg %p8837_p12 }
 0x203   : > { %4557 = vmatpush2.bf16.msra.mxu0 %v8488_v24 }
 0x204   : > { %4630 = vmatpush2.bf16.msra.mxu1 %v8491_v25  ;;  %4558 = vmatprep.subr.bf16.mxu0 %v8496_v50  ;;  %p8845_p3 = pnand %p8844_p2, %p8838_p13 }
 0x205   : > { %4631 = vmatprep.subr.bf16.mxu1 %v8499_v62 }
 0x207   : > { %4559 = vmatpush2.bf16.msra.mxu0 %v8494_v63 }
 0x208   : > { %4632 = vmatpush2.bf16.msra.mxu1 %v8497_v4  ;;  %4560 = vmatprep.subr.bf16.mxu0 %v8502_v5 }
 0x209   : > { %4633 = vmatprep.subr.bf16.mxu1 %v8505_v10 }
 0x20b   : > { %4561 = vmatpush2.bf16.msra.mxu0 %v8500_v60  ;;  %v8535_v60 = vld [vmem:[%s11064_s2 + $0x40] ss:$8 sps:$4 sm:$0xff]  }
 0x20c   : > { %4634 = vmatpush2.bf16.msra.mxu1 %v8503_v61  ;;  %4562 = vmatprep.subr.bf16.mxu0 %v8508_v11 }
 0x20d   : > { %4635 = vmatprep.subr.bf16.mxu1 %v8511_v14 }
 0x20f   : > { %4563 = vmatpush2.bf16.msra.mxu0 %v8506_v56 }
 0x210   : > { %4636 = vmatpush2.bf16.msra.mxu1 %v8509_v0  ;;  %4564 = vmatprep.subr.bf16.mxu0 %v8514_v19  ;;  %v8538_v19 = vld [vmem:[%s11064_s2 + $0x30] ss:$8 sps:$4 sm:$0xff]  }
 0x211   : > { %4637 = vmatprep.subr.bf16.mxu1 %v8517_v21 }
 0x213   : > { %4565 = vmatpush2.bf16.msra.mxu0 %v8512_v22  ;;  %v4699_v22 = vld [vmem:[#allocation2 + $0x8] sm:$0xff] }
 0x214   : > { %4638 = vmatpush2.bf16.msra.mxu1 %v8515_v20  ;;  %4566 = vmatprep.subr.bf16.mxu0 %v8520_v23  ;;  %v230_v20 = vld [vmem:[%s11064_s2 + $0x20] sm:$0xff] }
 0x215   : > { %4639 = vmatprep.subr.bf16.mxu1 %v8523_v26 }
 0x217   : > { %4567 = vmatpush2.bf16.msra.mxu0 %v8518_v36 }
 0x218   : > { %4640 = vmatpush2.bf16.msra.mxu1 %v8521_v27  ;;  %7642 = vmatprep.subr.msk.bf16.mxu0 %vm853_vm0, %v8524_v30 }
 0x219   : > { %5987 = vmatprep.subr.bf16.mxu1 %v8524_v30 }
 0x21a   : > { %v2929_v8 = vpop.f32.mrf.mxu0  ;;  %4569 = vmatmul.mubr.bf16.vlgmr.msra.gmra.mxu0 %v9645_v12 }
 0x21b   : > { %v3002_v9 = vpop.f32.mrf.mxu1  ;;  %4642 = vmatmul.mubr.bf16.vlgmr.msra.gmra.mxu1 %v9651_v13  ;;  %5083 = vmatpush1.bf16.xpose.msra.mxu0 %v8526_v33  ;;  %v8529_v13 = vld [vmem:[%s11064_s2 + $0x60] ss:$8 sps:$4 sm:$0xff]  }
 0x21c   : > { %v9916_v35 = vadd.f32 %v3002_v9, %v2929_v8  ;;  %4578 = vmatprep.mubr.bf16.mxu0 %v9661_v31  ;;  %v2931_v41 = vpop.f32.mrf.mxu0  ;;  %7643 = vmatprep.subr.msk.bf16.mxu0 %vm853_vm0, %v8527_v34 }
 0x21d   : > { %v3004_v44 = vpop.f32.mrf.mxu1  ;;  %4651 = vmatprep.mubr.bf16.mxu1 %v9667_v32  ;;  %5988 = vmatpush1.bf16.msra.mxu1 %v8526_v33  ;;  %v8539_v33 = vld [vmem:[%s11064_s2 + $0x24] ss:$8 sps:$4 sm:$0xff]  }
 0x21e   : > { %v3005_v45 = vadd.f32 %v3004_v44, %v2931_v41  ;;  %v2933_v46 = vpop.f32.mrf.mxu0  ;;  %5989 = vmatprep.subr.bf16.mxu1 %v8527_v34  ;;  %v8541_v44 = vld [vmem:[%s11064_s2 + $0x14] ss:$8 sps:$4 sm:$0xff]  }
 0x21f   : > { %v3006_v48 = vpop.f32.mrf.mxu1 }
 0x220   : > { %3042 = vst.msk [vmem:[#allocation2 + $0x208] sm:$0xff] %vm853_vm0, %v3005_v45  ;;  %v9922_v12 = vadd.f32 %v3006_v48, %v2933_v46  ;;  %v2935_v31 = vpop.f32.mrf.mxu0 }
 0x221   : > { %v3008_v49 = vpop.f32.mrf.mxu1  ;;  %5990 = vmatpush1.bf16.msra.mxu1 %v8529_v13 }
 0x222   : > { %v3009_v32 = vadd.f32 %v3008_v49, %v2935_v31  ;;  %v4858_v53 = vpack.c.bf16 %v9922_v12, %v9916_v35  ;;  %4579 = vmatmul.mubr.bf16.gmra.mxu0 %v9678_v3  ;;  %v2939_v55 = vpop.f32.mrf.mxu0  ;;  %v8533_v3 = vld [vmem:[%s11064_s2 + $0x44] ss:$8 sps:$4 sm:$0xff]   ;;  %5991 = vmatprep.subr.bf16.mxu1 %v8530_v52 }
 0x223   : > { %4652 = vmatmul.mubr.bf16.gmra.mxu1 %v9684_v15  ;;  %v3012_v7 = vpop.f32.mrf.mxu1  ;;  %5085 = vmatpush1.bf16.xpose.msra.mxu0 %v8529_v13 }
 0x224   : > { %3044 = vst.msk [vmem:[#allocation2 + $0x218] sm:$0xff] %vm853_vm0, %v3009_v32  ;;  %4588 = vmatprep.mubr.bf16.mxu0 %v9695_v28  ;;  %v9936_v39 = vadd.f32 %v3012_v7, %v2939_v55  ;;  %7644 = vmatprep.subr.msk.bf16.mxu0 %vm853_vm0, %v8530_v52  ;;  %v2941_v59 = vpop.f32.mrf.mxu0  ;;  %v226_v32 = vld [vmem:[%s11064_s2] sm:$0xff]  ;;  %v227_v55 = vld [vmem:[%s11064_s2 + $0x8] sm:$0xff] }
 0x225   : > { %v3014_v24 = vpop.f32.mrf.mxu1  ;;  %4661 = vmatprep.mubr.bf16.mxu1 %v9701_v29  ;;  %5992 = vmatpush1.bf16.msra.mxu1 %v8532_v57  ;;  %v8543_v7 = vld [vmem:[%s11064_s2 + $0x4] ss:$8 sps:$4 sm:$0xff]  }
 0x226   : > { %v3015_v15 = vadd.f32 %v3014_v24, %v2941_v59  ;;  %v2943_v25 = vpop.f32.mrf.mxu0  ;;  %5993 = vmatprep.subr.bf16.mxu1 %v8533_v3 }
 0x227   : > { %v3016_v28 = vpop.f32.mrf.mxu1 }
 0x228   : > { %3046 = vst.msk [vmem:[#allocation2 + $0x228] sm:$0xff] %vm853_vm0, %v3015_v15  ;;  %v9947_v50 = vadd.f32 %v3016_v28, %v2943_v25  ;;  %v2945_v62 = vpop.f32.mrf.mxu0  ;;  %v7626_v15 = vcombine.low %v226_v32, %v227_v55  ;;  %v4700_v25 = vld [vmem:[#allocation2 + $0x10] sm:$0xff]  ;;  %v4703_v28 = vld [vmem:[#allocation2 + $0x28] sm:$0xff] }
 0x229   : > { %v3018_v63 = vpop.f32.mrf.mxu1  ;;  %5994 = vmatpush1.bf16.msra.mxu1 %v8535_v60 }
 0x22a   : > { %v3019_v4 = vadd.f32 %v3018_v63, %v2945_v62  ;;  %v4860_v29 = vpack.c.bf16 %v9947_v50, %v9936_v39  ;;  %4589 = vmatmul.mubr.bf16.gmra.mxu0 %v9712_v16  ;;  %v2949_v5 = vpop.f32.mrf.mxu0  ;;  %v8536_v16 = vld [vmem:[%s11064_s2 + $0x34] ss:$8 sps:$4 sm:$0xff]   ;;  %v4698_v63 = vld [vmem:[#allocation2] sm:$0xff] }
 0x22b   : > { %4662 = vmatmul.mubr.bf16.gmra.mxu1 %v9718_v17  ;;  %v3022_v10 = vpop.f32.mrf.mxu1  ;;  %5087 = vmatpush1.bf16.xpose.msra.mxu0 %v8532_v57  ;;  %v4705_v62 = vld [vmem:[#allocation2 + $0x38] sm:$0xff] }
 0x22c   : > { %4598 = vmatprep.mubr.bf16.mxu0 %v9729_v1  ;;  %3048 = vst.msk [vmem:[#allocation2 + $0x238] sm:$0xff] %vm853_vm0, %v3019_v4  ;;  %v9958_v61 = vadd.f32 %v3022_v10, %v2949_v5  ;;  %7645 = vmatprep.subr.msk.bf16.mxu0 %vm853_vm0, %v8533_v3  ;;  %v2951_v17 = vpop.f32.mrf.mxu0  ;;  %v4701_v1 = vld [vmem:[#allocation2 + $0x18] sm:$0xff]  ;;  %v4826_v4 = vpack.c.bf16 %v4700_v25, %v4698_v63 }
 0x22d   : > { %v3024_v11 = vpop.f32.mrf.mxu1  ;;  %4671 = vmatprep.mubr.bf16.mxu1 %v9735_v38  ;;  %5995 = vmatprep.subr.bf16.mxu1 %v8536_v16  ;;  %v231_v38 = vld [vmem:[%s11064_s2 + $0x28] sm:$0xff]  ;;  %v4827_v36 = vpack.c.bf16 %v4701_v1, %v4699_v22  ;;  %v4829_v5 = vpack.c.bf16 %v4705_v62, %v4703_v28  ;;  %v4702_v1 = vld [vmem:[#allocation2 + $0x20] sm:$0xff] }
 0x22e   : > { %v3025_v14 = vadd.f32 %v3024_v11, %v2951_v17  ;;  %v2953_v56 = vpop.f32.mrf.mxu0  ;;  %5996 = vmatpush1.bf16.msra.mxu1 %v8538_v19  ;;  %v7630_v9 = vcombine.low %v230_v20, %v231_v38  ;;  %v4707_v22 = vld [vmem:[#allocation2 + $0x48] sm:$0xff]  ;;  %v4709_v20 = vld [vmem:[#allocation2 + $0x58] sm:$0xff] }
 0x22f   : > { %v3026_v0 = vpop.f32.mrf.mxu1  ;;  %5997 = vmatprep.subr.bf16.mxu1 %v8539_v33  ;;  %v4767_v40 = vld [vmem:[#allocation2 + $0x228] sm:$0xff] }
 0x230   : > { %3050 = vst.msk [vmem:[#allocation2 + $0x248] sm:$0xff] %vm853_vm0, %v3025_v14  ;;  %v9969_v21 = vadd.f32 %v3026_v0, %v2953_v56  ;;  %v2955_v23 = vpop.f32.mrf.mxu0  ;;  %v4704_v56 = vld [vmem:[#allocation2 + $0x30] sm:$0xff] }
 0x231   : > { %v3028_v26 = vpop.f32.mrf.mxu1 }
 0x232   : > { %v3029_v27 = vadd.f32 %v3028_v26, %v2955_v23  ;;  %v4862_v30 = vpack.c.bf16 %v9969_v21, %v9958_v61  ;;  %4599 = vmatmul.mubr.bf16.gmra.mxu0 %v9746_v42  ;;  %v2959_v34 = vpop.f32.mrf.mxu0  ;;  %v228_v42 = vld [vmem:[%s11064_s2 + $0x10] sm:$0xff]  ;;  %5998 = vmatpush1.bf16.msra.mxu1 %v7630_v9 }
 0x233   : > { %4672 = vmatmul.mubr.bf16.gmra.mxu1 %v9752_v43  ;;  %v3032_v8 = vpop.f32.mrf.mxu1  ;;  %5089 = vmatpush1.bf16.xpose.msra.mxu0 %v8535_v60  ;;  %v229_v43 = vld [vmem:[%s11064_s2 + $0x18] sm:$0xff] }
 0x234   : > { %7650 = vmatprep.mubr.msk.bf16.mxu0 %vm853_vm0, %v4827_v36  ;;  %3052 = vst.msk [vmem:[#allocation2 + $0x258] sm:$0xff] %vm853_vm0, %v3029_v27  ;;  %v9986_v41 = vadd.f32 %v3032_v8, %v2959_v34  ;;  %7646 = vmatprep.subr.msk.bf16.mxu0 %vm853_vm0, %v8536_v16  ;;  %v2961_v45 = vpop.f32.mrf.mxu0  ;;  %v7628_v49 = vcombine.low %v228_v42, %v229_v43  ;;  %v4769_v54 = vld [vmem:[#allocation2 + $0x238] sm:$0xff] }
 0x235   : > { %v3034_v46 = vpop.f32.mrf.mxu1  ;;  %5999 = vmatprep.subr.bf16.mxu1 %v8541_v44  ;;  %v4828_v36 = vpack.c.bf16 %v4704_v56, %v4702_v1 }
 0x236   : > { %v3035_v48 = vadd.f32 %v3034_v46, %v2961_v45  ;;  %v2963_v13 = vpop.f32.mrf.mxu0  ;;  %6000 = vmatpush1.bf16.msra.mxu1 %v7628_v49  ;;  %v4706_v45 = vld [vmem:[#allocation2 + $0x40] sm:$0xff]  ;;  %v4708_v46 = vld [vmem:[#allocation2 + $0x50] sm:$0xff] }
 0x237   : > { %v3036_v31 = vpop.f32.mrf.mxu1  ;;  %6001 = vmatprep.subr.bf16.mxu1 %v8543_v7 }
 0x238   : > { %3054 = vst.msk [vmem:[#allocation2 + $0x268] sm:$0xff] %vm853_vm0, %v3035_v48  ;;  %v9999_v52 = vadd.f32 %v3036_v31, %v2963_v13  ;;  %v2965_v57 = vpop.f32.mrf.mxu0  ;;  %v4711_v13 = vld [vmem:[#allocation2 + $0x68] sm:$0xff]  ;;  %v4713_v31 = vld [vmem:[#allocation2 + $0x78] sm:$0xff] }
 0x239   : > { %v3038_v59 = vpop.f32.mrf.mxu1 }
 0x23a   : > { %v3039_v24 = vadd.f32 %v3038_v59, %v2965_v57  ;;  %v4864_v3 = vpack.c.bf16 %v9999_v52, %v9986_v41  ;;  %6002 = vmatpush1.bf16.msra.mxu1 %v7626_v15 }
 0x23b   : > { %5091 = vmatpush1.bf16.xpose.msra.mxu0 %v8538_v19 }
 0x23c   : > { %3056 = vst.msk [vmem:[#allocation2 + $0x278] sm:$0xff] %vm853_vm0, %v3039_v24  ;;  %7647 = vmatprep.subr.msk.bf16.mxu0 %vm853_vm0, %v8539_v33  ;;  %v4831_v33 = vpack.c.bf16 %v4709_v20, %v4707_v22  ;;  %v4833_v24 = vpack.c.bf16 %v4713_v31, %v4711_v13 }
 0x243   : > { %5093 = vmatpush1.bf16.xpose.msra.mxu0 %v7630_v9 }
 0x244   : > { %7648 = vmatprep.subr.msk.bf16.mxu0 %vm853_vm0, %v8541_v44 }
 0x24b   : > { %5095 = vmatpush1.bf16.xpose.msra.mxu0 %v7628_v49 }
 0x24c   : > { %7649 = vmatprep.subr.msk.bf16.mxu0 %vm853_vm0, %v8543_v7  ;;  %v4830_v7 = vpack.c.bf16 %v4708_v46, %v4706_v45  ;;  %v4719_v46 = vld [vmem:[#allocation2 + $0xa8] sm:$0xff] }
 0x253   : > { %5097 = vmatpush1.bf16.xpose.msra.mxu0 %v7626_v15 }
 0x25a   : > { %v3476_v10 = vpop.f32.mrf.mxu0  ;;  %5115 = vmatmul.mubr.bf16.vlgmr.msra.gmra.mxu0 %v4826_v4 }
 0x25b   : > { %v3549_v60 = vpop.f32.mrf.mxu1  ;;  %7651 = vmatprep.mubr.msk.bf16.mxu0 %vm853_vm0, %v4829_v5 }
 0x25c   : > { %v10016_v16 = vadd.f32 %v3549_v60, %v3476_v10  ;;  %v3478_v17 = vpop.f32.mrf.mxu0  ;;  %v4710_v10 = vld [vmem:[#allocation2 + $0x60] sm:$0xff]  ;;  %v4712_v60 = vld [vmem:[#allocation2 + $0x70] sm:$0xff] }
 0x25d   : > { %v3551_v11 = vpop.f32.mrf.mxu1 }
 0x25e   : > { %v3552_v14 = vadd.f32 %v3551_v11, %v3478_v17  ;;  %v3480_v0 = vpop.f32.mrf.mxu0  ;;  %v4717_v11 = vld [vmem:[#allocation2 + $0x98] sm:$0xff] }
 0x25f   : > { %v3553_v19 = vpop.f32.mrf.mxu1 }
 0x260   : > { %3589 = vst.msk [vmem:[#allocation2 + $0x288] sm:$0xff] %vm853_vm0, %v3552_v14  ;;  %v10020_v38 = vadd.f32 %v3553_v19, %v3480_v0  ;;  %v3482_v23 = vpop.f32.mrf.mxu0  ;;  %v4832_v0 = vpack.c.bf16 %v4712_v60, %v4710_v10  ;;  %v4715_v19 = vld [vmem:[#allocation2 + $0x88] sm:$0xff]  ;;  %v4725_v10 = vld [vmem:[#allocation2 + $0xd8] sm:$0xff] }
 0x261   : > { %v3555_v26 = vpop.f32.mrf.mxu1 }
 0x262   : > { %v3556_v27 = vadd.f32 %v3555_v26, %v3482_v23  ;;  %v4866_v34 = vpack.c.bf16 %v10020_v38, %v10016_v16  ;;  %5123 = vmatmul.mubr.bf16.gmra.mxu0 %v4828_v36  ;;  %v3486_v8 = vpop.f32.mrf.mxu0  ;;  %v4835_v23 = vpack.c.bf16 %v4717_v11, %v4715_v19  ;;  %v4722_v11 = vld [vmem:[#allocation2 + $0xc0] sm:$0xff] }
 0x263   : > { %v3559_v9 = vpop.f32.mrf.mxu1  ;;  %7652 = vmatprep.mubr.msk.bf16.mxu0 %vm853_vm0, %v4831_v33 }
 0x264   : > { %3591 = vst.msk [vmem:[#allocation2 + $0x298] sm:$0xff] %vm853_vm0, %v3556_v27  ;;  %v10026_v42 = vadd.f32 %v3559_v9, %v3486_v8  ;;  %v3488_v43 = vpop.f32.mrf.mxu0 }
 0x265   : > { %v3561_v44 = vpop.f32.mrf.mxu1 }
 0x266   : > { %v3562_v48 = vadd.f32 %v3561_v44, %v3488_v43  ;;  %v3490_v49 = vpop.f32.mrf.mxu0  ;;  %v4716_v44 = vld [vmem:[#allocation2 + $0x90] sm:$0xff] }
 0x267   : > { %v3563_v32 = vpop.f32.mrf.mxu1  ;;  %v4779_v61 = vld [vmem:[#allocation2 + $0x288] sm:$0xff] }
 0x268   : > { %3593 = vst.msk [vmem:[#allocation2 + $0x2a8] sm:$0xff] %vm853_vm0, %v3562_v48  ;;  %v10029_v55 = vadd.f32 %v3563_v32, %v3490_v49  ;;  %v3492_v57 = vpop.f32.mrf.mxu0  ;;  %v4721_v48 = vld [vmem:[#allocation2 + $0xb8] sm:$0xff]  ;;  %v4714_v49 = vld [vmem:[#allocation2 + $0x80] sm:$0xff] }
 0x269   : > { %v3565_v59 = vpop.f32.mrf.mxu1 }
 0x26a   : > { %v3566_v15 = vadd.f32 %v3565_v59, %v3492_v57  ;;  %v4868_v25 = vpack.c.bf16 %v10029_v55, %v10026_v42  ;;  %5131 = vmatmul.mubr.bf16.gmra.mxu0 %v4830_v7  ;;  %v3496_v28 = vpop.f32.mrf.mxu0  ;;  %v4834_v7 = vpack.c.bf16 %v4716_v44, %v4714_v49  ;;  %v4735_v44 = vld [vmem:[#allocation2 + $0x128] sm:$0xff] }
 0x26b   : > { %v3569_v62 = vpop.f32.mrf.mxu1  ;;  %7653 = vmatprep.mubr.msk.bf16.mxu0 %vm853_vm0, %v4833_v24  ;;  %v4837_v24 = vpack.c.bf16 %v4721_v48, %v4719_v46  ;;  %v4730_v46 = vld [vmem:[#allocation2 + $0x100] sm:$0xff] }
 0x26c   : > { %3595 = vst.msk [vmem:[#allocation2 + $0x2b8] sm:$0xff] %vm853_vm0, %v3566_v15  ;;  %v10035_v63 = vadd.f32 %v3569_v62, %v3496_v28  ;;  %v3498_v4 = vpop.f32.mrf.mxu0  ;;  %v4718_v62 = vld [vmem:[#allocation2 + $0xa0] sm:$0xff] }
 0x26d   : > { %v3571_v5 = vpop.f32.mrf.mxu1 }
 0x26e   : > { %v3572_v17 = vadd.f32 %v3571_v5, %v3498_v4  ;;  %v3500_v14 = vpop.f32.mrf.mxu0  ;;  %v4720_v4 = vld [vmem:[#allocation2 + $0xb0] sm:$0xff]  ;;  %v4723_v5 = vld [vmem:[#allocation2 + $0xc8] sm:$0xff] }
 0x26f   : > { %v3573_v1 = vpop.f32.mrf.mxu1  ;;  %v4836_v60 = vpack.c.bf16 %v4720_v4, %v4718_v62  ;;  %v4736_v62 = vld [vmem:[#allocation2 + $0x130] sm:$0xff] }
 0x270   : > { %3597 = vst.msk [vmem:[#allocation2 + $0x2c8] sm:$0xff] %vm853_vm0, %v3572_v17  ;;  %v10038_v56 = vadd.f32 %v3573_v1, %v3500_v14  ;;  %v3502_v22 = vpop.f32.mrf.mxu0  ;;  %v4839_v17 = vpack.c.bf16 %v4725_v10, %v4723_v5  ;;  %v4724_v14 = vld [vmem:[#allocation2 + $0xd0] sm:$0xff]  ;;  %v4727_v1 = vld [vmem:[#allocation2 + $0xe8] sm:$0xff] }
 0x271   : > { %v3575_v20 = vpop.f32.mrf.mxu1  ;;  %v4838_v19 = vpack.c.bf16 %v4724_v14, %v4722_v11  ;;  %v4739_v10 = vld [vmem:[#allocation2 + $0x148] sm:$0xff] }
 0x272   : > { %v3576_v26 = vadd.f32 %v3575_v20, %v3502_v22  ;;  %v4870_v36 = vpack.c.bf16 %v10038_v56, %v10035_v63  ;;  %5139 = vmatmul.mubr.bf16.gmra.mxu0 %v4832_v0  ;;  %v3506_v27 = vpop.f32.mrf.mxu0  ;;  %v4729_v0 = vld [vmem:[#allocation2 + $0xf8] sm:$0xff]  ;;  %v4726_v20 = vld [vmem:[#allocation2 + $0xe0] sm:$0xff] }
 0x273   : > { %v3579_v33 = vpop.f32.mrf.mxu1  ;;  %7654 = vmatprep.mubr.msk.bf16.mxu0 %vm853_vm0, %v4835_v23  ;;  %v4841_v22 = vpack.c.bf16 %v4729_v0, %v4727_v1  ;;  %v4728_v23 = vld [vmem:[#allocation2 + $0xf0] sm:$0xff] }
 0x274   : > { %3599 = vst.msk [vmem:[#allocation2 + $0x2d8] sm:$0xff] %vm853_vm0, %v3576_v26  ;;  %v10044_v8 = vadd.f32 %v3579_v33, %v3506_v27  ;;  %v3508_v9 = vpop.f32.mrf.mxu0  ;;  %v4733_v26 = vld [vmem:[#allocation2 + $0x118] sm:$0xff]  ;;  %v4840_v27 = vpack.c.bf16 %v4728_v23, %v4726_v20  ;;  %v4731_v33 = vld [vmem:[#allocation2 + $0x108] sm:$0xff] }
 0x275   : > { %v3581_v43 = vpop.f32.mrf.mxu1 }
 0x276   : > { %v3582_v45 = vadd.f32 %v3581_v43, %v3508_v9  ;;  %v3510_v13 = vpop.f32.mrf.mxu0  ;;  %v4843_v9 = vpack.c.bf16 %v4733_v26, %v4731_v33  ;;  %v4732_v43 = vld [vmem:[#allocation2 + $0x110] sm:$0xff] }
 0x277   : > { %v3583_v31 = vpop.f32.mrf.mxu1  ;;  %v4842_v48 = vpack.c.bf16 %v4732_v43, %v4730_v46  ;;  %v4740_v43 = vld [vmem:[#allocation2 + $0x150] sm:$0xff]  ;;  %v4745_v46 = vld [vmem:[#allocation2 + $0x178] sm:$0xff] }
 0x278   : > { %3601 = vst.msk [vmem:[#allocation2 + $0x2e8] sm:$0xff] %vm853_vm0, %v3582_v45  ;;  %v10047_v32 = vadd.f32 %v3583_v31, %v3510_v13  ;;  %v3512_v57 = vpop.f32.mrf.mxu0  ;;  %v4737_v45 = vld [vmem:[#allocation2 + $0x138] sm:$0xff] }
 0x279   : > { %v3585_v59 = vpop.f32.mrf.mxu1  ;;  %v4845_v13 = vpack.c.bf16 %v4737_v45, %v4735_v44  ;;  %v4743_v45 = vld [vmem:[#allocation2 + $0x168] sm:$0xff] }
 0x27a   : > { %v3586_v15 = vadd.f32 %v3585_v59, %v3512_v57  ;;  %v4872_v28 = vpack.c.bf16 %v10047_v32, %v10044_v8  ;;  %5147 = vmatmul.mubr.bf16.gmra.mxu0 %v4834_v7 }
 0x27b   : > { %7655 = vmatprep.mubr.msk.bf16.mxu0 %vm853_vm0, %v4837_v24 }
 0x27c   : > { %3603 = vst.msk [vmem:[#allocation2 + $0x2f8] sm:$0xff] %vm853_vm0, %v3586_v15  ;;  %v4734_v15 = vld [vmem:[#allocation2 + $0x120] sm:$0xff] }
 0x27d   : > { %v4844_v1 = vpack.c.bf16 %v4736_v62, %v4734_v15 }
 0x282   : > { %5155 = vmatmul.mubr.bf16.gmra.mxu0 %v4836_v60  ;;  %v4741_v60 = vld [vmem:[#allocation2 + $0x158] sm:$0xff] }
 0x283   : > { %7656 = vmatprep.mubr.msk.bf16.mxu0 %vm853_vm0, %v4839_v17 }
 0x28a   : > { %5163 = vmatmul.mubr.bf16.gmra.mxu0 %v4838_v19  ;;  %v4847_v19 = vpack.c.bf16 %v4741_v60, %v4739_v10 }
 0x28b   : > { %7657 = vmatprep.mubr.msk.bf16.mxu0 %vm853_vm0, %v4841_v22 }
 0x292   : > { %5171 = vmatmul.mubr.bf16.gmra.mxu0 %v4840_v27 }
 0x293   : > { %7658 = vmatprep.mubr.msk.bf16.mxu0 %vm853_vm0, %v4843_v9  ;;  %v4738_v9 = vld [vmem:[#allocation2 + $0x140] sm:$0xff] }
 0x29a   : > { %v4023_v31 = vpop.f32.mrf.mxu0  ;;  %5179 = vmatmul.mubr.bf16.gmra.mxu0 %v4842_v48 }
 0x29b   : > { %v4096_v49 = vpop.f32.mrf.mxu1  ;;  %7659 = vmatprep.mubr.msk.bf16.mxu0 %vm853_vm0, %v4845_v13 }
 0x29c   : > { %v10056_v7 = vadd.f32 %v4096_v49, %v4023_v31  ;;  %v4025_v57 = vpop.f32.mrf.mxu0  ;;  %v4846_v49 = vpack.c.bf16 %v4740_v43, %v4738_v9  ;;  %v4747_v9 = vld [vmem:[#allocation2 + $0x188] sm:$0xff] }
 0x29d   : > { %v4098_v59 = vpop.f32.mrf.mxu1 }
 0x29e   : > { %v4099_v24 = vadd.f32 %v4098_v59, %v4025_v57  ;;  %v4027_v4 = vpop.f32.mrf.mxu0 }
 0x29f   : > { %v4100_v5 = vpop.f32.mrf.mxu1 }
 0x2a0   : > { %4136 = vst.msk [vmem:[#allocation2 + $0x308] sm:$0xff] %vm853_vm0, %v4099_v24  ;;  %v10060_v17 = vadd.f32 %v4100_v5, %v4027_v4  ;;  %v4029_v11 = vpop.f32.mrf.mxu0  ;;  %v4849_v24 = vpack.c.bf16 %v4745_v46, %v4743_v45 }
 0x2a1   : > { %v4102_v14 = vpop.f32.mrf.mxu1 }
 0x2a2   : > { %v4103_v0 = vadd.f32 %v4102_v14, %v4029_v11  ;;  %v4874_v22 = vpack.c.bf16 %v10060_v17, %v10056_v7  ;;  %5187 = vmatmul.mubr.bf16.gmra.mxu0 %v4844_v1  ;;  %v4033_v20 = vpop.f32.mrf.mxu0  ;;  %v4742_v14 = vld [vmem:[#allocation2 + $0x160] sm:$0xff]  ;;  %v4744_v1 = vld [vmem:[#allocation2 + $0x170] sm:$0xff] }
 0x2a3   : > { %v4106_v23 = vpop.f32.mrf.mxu1  ;;  %7660 = vmatprep.mubr.msk.bf16.mxu0 %vm853_vm0, %v4847_v19  ;;  %v4749_v19 = vld [vmem:[#allocation2 + $0x198] sm:$0xff] }
 0x2a4   : > { %4138 = vst.msk [vmem:[#allocation2 + $0x318] sm:$0xff] %vm853_vm0, %v4103_v0  ;;  %v10066_v26 = vadd.f32 %v4106_v23, %v4033_v20  ;;  %v4035_v27 = vpop.f32.mrf.mxu0  ;;  %v4851_v45 = vpack.c.bf16 %v4749_v19, %v4747_v9 }
 0x2a5   : > { %v4108_v33 = vpop.f32.mrf.mxu1 }
 0x2a6   : > { %v4109_v44 = vadd.f32 %v4108_v33, %v4035_v27  ;;  %v4037_v48 = vpop.f32.mrf.mxu0  ;;  %v4848_v33 = vpack.c.bf16 %v4744_v1, %v4742_v14  ;;  %v4746_v1 = vld [vmem:[#allocation2 + $0x180] sm:$0xff] }
 0x2a7   : > { %v4110_v13 = vpop.f32.mrf.mxu1  ;;  %v4795_v38 = vld [vmem:[#allocation2 + $0x308] sm:$0xff] }
 0x2a8   : > { %4140 = vst.msk [vmem:[#allocation2 + $0x328] sm:$0xff] %vm853_vm0, %v4109_v44  ;;  %v10069_v31 = vadd.f32 %v4110_v13, %v4037_v48  ;;  %v4039_v57 = vpop.f32.mrf.mxu0 }
 0x2a9   : > { %v4112_v59 = vpop.f32.mrf.mxu1 }
 0x2aa   : > { %v4113_v15 = vadd.f32 %v4112_v59, %v4039_v57  ;;  %v4876_v62 = vpack.c.bf16 %v10069_v31, %v10066_v26  ;;  %5195 = vmatmul.mubr.bf16.gmra.mxu0 %v4846_v49  ;;  %v4043_v4 = vpop.f32.mrf.mxu0 }
 0x2ab   : > { %v4116_v5 = vpop.f32.mrf.mxu1  ;;  %7661 = vmatprep.mubr.msk.bf16.mxu0 %vm853_vm0, %v4849_v24  ;;  %v4797_v16 = vld [vmem:[#allocation2 + $0x318] sm:$0xff] }
 0x2ac   : > { %4142 = vst.msk [vmem:[#allocation2 + $0x338] sm:$0xff] %vm853_vm0, %v4113_v15  ;;  %v10075_v10 = vadd.f32 %v4116_v5, %v4043_v4  ;;  %v4045_v60 = vpop.f32.mrf.mxu0  ;;  %v4748_v15 = vld [vmem:[#allocation2 + $0x190] sm:$0xff]  ;;  %v4751_v5 = vld [vmem:[#allocation2 + $0x1a8] sm:$0xff] }
 0x2ad   : > { %v4118_v11 = vpop.f32.mrf.mxu1  ;;  %v4850_v19 = vpack.c.bf16 %v4748_v15, %v4746_v1  ;;  %v4763_v15 = vld [vmem:[#allocation2 + $0x208] sm:$0xff] }
 0x2ae   : > { %v4119_v0 = vadd.f32 %v4118_v11, %v4045_v60  ;;  %v4047_v20 = vpop.f32.mrf.mxu0  ;;  %v4753_v60 = vld [vmem:[#allocation2 + $0x1b8] sm:$0xff] }
 0x2af   : > { %v4120_v23 = vpop.f32.mrf.mxu1  ;;  %v4799_v42 = vld [vmem:[#allocation2 + $0x328] sm:$0xff] }
 0x2b0   : > { %4144 = vst.msk [vmem:[#allocation2 + $0x348] sm:$0xff] %vm853_vm0, %v4119_v0  ;;  %v10078_v27 = vadd.f32 %v4120_v23, %v4047_v20  ;;  %v4049_v43 = vpop.f32.mrf.mxu0 }
 0x2b1   : > { %v4122_v44 = vpop.f32.mrf.mxu1 }
 0x2b2   : > { %v4123_v46 = vadd.f32 %v4122_v44, %v4049_v43  ;;  %v4878_v48 = vpack.c.bf16 %v10078_v27, %v10075_v10  ;;  %5203 = vmatmul.mubr.bf16.gmra.mxu0 %v4848_v33  ;;  %v4053_v13 = vpop.f32.mrf.mxu0  ;;  %v4853_v33 = vpack.c.bf16 %v4753_v60, %v4751_v5  ;;  %v4755_v44 = vld [vmem:[#allocation2 + $0x1c8] sm:$0xff] }
 0x2b3   : > { %v4126_v49 = vpop.f32.mrf.mxu1  ;;  %7662 = vmatprep.mubr.msk.bf16.mxu0 %vm853_vm0, %v4851_v45  ;;  %v4757_v45 = vld [vmem:[#allocation2 + $0x1d8] sm:$0xff] }
 0x2b4   : > { %4146 = vst.msk [vmem:[#allocation2 + $0x358] sm:$0xff] %vm853_vm0, %v4123_v46  ;;  %v10084_v57 = vadd.f32 %v4126_v49, %v4053_v13  ;;  %v4055_v59 = vpop.f32.mrf.mxu0  ;;  %v4855_v46 = vpack.c.bf16 %v4757_v45, %v4755_v44  ;;  %v4759_v13 = vld [vmem:[#allocation2 + $0x1e8] sm:$0xff]  ;;  %v4761_v49 = vld [vmem:[#allocation2 + $0x1f8] sm:$0xff] }
 0x2b5   : > { %v4128_v24 = vpop.f32.mrf.mxu1  ;;  %v4801_v55 = vld [vmem:[#allocation2 + $0x338] sm:$0xff] }
 0x2b6   : > { %v4129_v4 = vadd.f32 %v4128_v24, %v4055_v59  ;;  %v4057_v11 = vpop.f32.mrf.mxu0  ;;  %v4857_v59 = vpack.c.bf16 %v4761_v49, %v4759_v13  ;;  %v4765_v24 = vld [vmem:[#allocation2 + $0x218] sm:$0xff]  ;;  %v4775_v13 = vld [vmem:[#allocation2 + $0x268] sm:$0xff] }
 0x2b7   : > { %v4130_v14 = vpop.f32.mrf.mxu1  ;;  %v4777_v49 = vld [vmem:[#allocation2 + $0x278] sm:$0xff] }
 0x2b8   : > { %4148 = vst.msk [vmem:[#allocation2 + $0x368] sm:$0xff] %vm853_vm0, %v4129_v4  ;;  %v10087_v0 = vadd.f32 %v4130_v14, %v4057_v11  ;;  %v4059_v20 = vpop.f32.mrf.mxu0  ;;  %v4859_v4 = vpack.c.bf16 %v4765_v24, %v4763_v15  ;;  %v4773_v14 = vld [vmem:[#allocation2 + $0x258] sm:$0xff] }
 0x2b9   : > { %v4132_v23 = vpop.f32.mrf.mxu1 }
 0x2ba   : > { %v4133_v9 = vadd.f32 %v4132_v23, %v4059_v20  ;;  %v4880_v43 = vpack.c.bf16 %v10087_v0, %v10084_v57  ;;  %5211 = vmatmul.mubr.bf16.gmra.mxu0 %v4850_v19 }
 0x2bb   : > { %7663 = vmatprep.mubr.msk.bf16.mxu0 %vm853_vm0, %v4853_v33  ;;  %v4805_v8 = vld [vmem:[#allocation2 + $0x358] sm:$0xff] }
 0x2bc   : > { %4150 = vst.msk [vmem:[#allocation2 + $0x378] sm:$0xff] %vm853_vm0, %v4133_v9 }
 0x2c2   : > { %5219 = vmatmul.mubr.bf16.gmra.mxu0 %v4852_v58  ;;  %v4861_v58 = vpack.c.bf16 %v4769_v54, %v4767_v40 }
 0x2c3   : > { %7664 = vmatprep.mubr.msk.bf16.mxu0 %vm853_vm0, %v4855_v46 }
 0x2ca   : > { %5227 = vmatmul.mubr.bf16.gmra.mxu0 %v4854_v18 }
 0x2cb   : > { %7665 = vmatprep.mubr.msk.bf16.mxu0 %vm853_vm0, %v4857_v59 }
 0x2d2   : > { %5235 = vmatmul.mubr.bf16.gmra.mxu0 %v4856_v6  ;;  %v4771_v6 = vld [vmem:[#allocation2 + $0x248] sm:$0xff] }
 0x2d3   : > { %7666 = vmatprep.mubr.msk.bf16.mxu0 %vm853_vm0, %v4859_v4  ;;  %v4863_v35 = vpack.c.bf16 %v4773_v14, %v4771_v6 }
 0x2da   : > { %v4570_v5 = vpop.f32.mrf.mxu0  ;;  %5243 = vmatmul.mubr.bf16.gmra.mxu0 %v4858_v53 }
 0x2db   : > { %v4643_v60 = vpop.f32.mrf.mxu1  ;;  %7667 = vmatprep.mubr.msk.bf16.mxu0 %vm853_vm0, %v4861_v58 }
 0x2dc   : > { %v10108_v51 = vadd.f32 %v4643_v60, %v4570_v5  ;;  %v4572_v2 = vpop.f32.mrf.mxu0 }
 0x2dd   : > { %v4645_v18 = vpop.f32.mrf.mxu1 }
 0x2de   : > { %v4646_v11 = vadd.f32 %v4645_v18, %v4572_v2  ;;  %v4574_v37 = vpop.f32.mrf.mxu0 }
 0x2df   : > { %v4647_v47 = vpop.f32.mrf.mxu1 }
 0x2e0   : > { %4683 = vst.msk [vmem:[#allocation2 + $0x388] sm:$0xff] %vm853_vm0, %v4646_v11  ;;  %v10112_v1 = vadd.f32 %v4647_v47, %v4574_v37  ;;  %v4576_v19 = vpop.f32.mrf.mxu0  ;;  %v4781_v11 = vld [vmem:[#allocation2 + $0x298] sm:$0xff] }
 0x2e1   : > { %v4649_v20 = vpop.f32.mrf.mxu1  ;;  %v4867_v14 = vpack.c.bf16 %v4781_v11, %v4779_v61 }
 0x2e2   : > { %v4650_v23 = vadd.f32 %v4649_v20, %v4576_v19  ;;  %v4882_v12 = vpack.c.bf16 %v10112_v1, %v10108_v51  ;;  %5251 = vmatmul.mubr.bf16.gmra.mxu0 %v4860_v29  ;;  %v4580_v53 = vpop.f32.mrf.mxu0  ;;  %v4865_v29 = vpack.c.bf16 %v4777_v49, %v4775_v13  ;;  %v4785_v13 = vld [vmem:[#allocation2 + $0x2b8] sm:$0xff] }
 0x2e3   : > { %v4653_v33 = vpop.f32.mrf.mxu1  ;;  %7668 = vmatprep.mubr.msk.bf16.mxu0 %vm853_vm0, %v4863_v35 }
 0x2e4   : > { %4685 = vst.msk [vmem:[#allocation2 + $0x398] sm:$0xff] %vm853_vm0, %v4650_v23  ;;  %v10121_v9 = vadd.f32 %v4653_v33, %v4580_v53  ;;  %v4582_v44 = vpop.f32.mrf.mxu0 }
 0x2e5   : > { %v4655_v45 = vpop.f32.mrf.mxu1 }
 0x2e6   : > { %v4656_v46 = vadd.f32 %v4655_v45, %v4582_v44  ;;  %v4584_v59 = vpop.f32.mrf.mxu0 }
 0x2e7   : > { %v4657_v24 = vpop.f32.mrf.mxu1 }
 0x2e8   : > { %4687 = vst.msk [vmem:[#allocation2 + $0x3a8] sm:$0xff] %vm853_vm0, %v4656_v46  ;;  %v10124_v15 = vadd.f32 %v4657_v24, %v4584_v59  ;;  %v4586_v39 = vpop.f32.mrf.mxu0  ;;  %v4783_v46 = vld [vmem:[#allocation2 + $0x2a8] sm:$0xff] }
 0x2e9   : > { %v4659_v50 = vpop.f32.mrf.mxu1 }
 0x2ea   : > { %v4660_v4 = vadd.f32 %v4659_v50, %v4586_v39  ;;  %v4884_v40 = vpack.c.bf16 %v10124_v15, %v10121_v9  ;;  %5259 = vmatmul.mubr.bf16.gmra.mxu0 %v4862_v30  ;;  %v4590_v54 = vpop.f32.mrf.mxu0 }
 0x2eb   : > { %v4663_v58 = vpop.f32.mrf.mxu1  ;;  %7669 = vmatprep.mubr.msk.bf16.mxu0 %vm853_vm0, %v4865_v29  ;;  %v4787_v29 = vld [vmem:[#allocation2 + $0x2c8] sm:$0xff] }
 0x2ec   : > { %4689 = vst.msk [vmem:[#allocation2 + $0x3b8] sm:$0xff] %vm853_vm0, %v4660_v4  ;;  %v10133_v5 = vadd.f32 %v4663_v58, %v4590_v54  ;;  %v4592_v60 = vpop.f32.mrf.mxu0  ;;  %v4789_v4 = vld [vmem:[#allocation2 + $0x2d8] sm:$0xff]  ;;  %v4791_v58 = vld [vmem:[#allocation2 + $0x2e8] sm:$0xff] }
 0x2ed   : > { %v4665_v2 = vpop.f32.mrf.mxu1  ;;  %v4871_v54 = vpack.c.bf16 %v4789_v4, %v4787_v29 }
 0x2ee   : > { %v4666_v18 = vadd.f32 %v4665_v2, %v4592_v60  ;;  %v4594_v37 = vpop.f32.mrf.mxu0  ;;  %v4793_v60 = vld [vmem:[#allocation2 + $0x2f8] sm:$0xff] }
 0x2ef   : > { %v4667_v47 = vpop.f32.mrf.mxu1  ;;  %v4873_v2 = vpack.c.bf16 %v4793_v60, %v4791_v58 }
 0x2f0   : > { %4691 = vst.msk [vmem:[#allocation2 + $0x3c8] sm:$0xff] %vm853_vm0, %v4666_v18  ;;  %v10136_v6 = vadd.f32 %v4667_v47, %v4594_v37  ;;  %v4596_v21 = vpop.f32.mrf.mxu0  ;;  %v4809_v37 = vld [vmem:[#allocation2 + $0x378] sm:$0xff] }
 0x2f1   : > { %v4669_v30 = vpop.f32.mrf.mxu1 }
 0x2f2   : > { %v4670_v19 = vadd.f32 %v4669_v30, %v4596_v21  ;;  %v4886_v20 = vpack.c.bf16 %v10136_v6, %v10133_v5  ;;  %5267 = vmatmul.mubr.bf16.gmra.mxu0 %v4864_v3  ;;  %v4600_v23 = vpop.f32.mrf.mxu0  ;;  %v4869_v3 = vpack.c.bf16 %v4785_v13, %v4783_v46 }
 0x2f3   : > { %v4673_v35 = vpop.f32.mrf.mxu1  ;;  %7670 = vmatprep.mubr.msk.bf16.mxu0 %vm853_vm0, %v4867_v14  ;;  %v4811_v14 = vld [vmem:[#allocation2 + $0x388] sm:$0xff] }
 0x2f4   : > { %4693 = vst.msk [vmem:[#allocation2 + $0x3d8] sm:$0xff] %vm853_vm0, %v4670_v19  ;;  %v10145_v53 = vadd.f32 %v4673_v35, %v4600_v23  ;;  %v4602_v33 = vpop.f32.mrf.mxu0  ;;  %v4817_v35 = vld [vmem:[#allocation2 + $0x3b8] sm:$0xff] }
 0x2f5   : > { %v4675_v44 = vpop.f32.mrf.mxu1 }
 0x2f6   : > { %v4676_v45 = vadd.f32 %v4675_v44, %v4602_v33  ;;  %v4604_v49 = vpop.f32.mrf.mxu0 }
 0x2f7   : > { %v4677_v59 = vpop.f32.mrf.mxu1 }
 0x2f8   : > { %4695 = vst.msk [vmem:[#allocation2 + $0x3e8] sm:$0xff] %vm853_vm0, %v4676_v45  ;;  %v10148_v24 = vadd.f32 %v4677_v59, %v4604_v49  ;;  %v4606_v41 = vpop.f32.mrf.mxu0 }
 0x2f9   : > { %v4679_v52 = vpop.f32.mrf.mxu1 }
 0x2fa   : > { %v4680_v39 = vadd.f32 %v4679_v52, %v4606_v41  ;;  %v4888_v50 = vpack.c.bf16 %v10148_v24, %v10145_v53  ;;  %5275 = vmatmul.mubr.bf16.gmra.mxu0 %v4866_v34  ;;  %v4875_v34 = vpack.c.bf16 %v4797_v16, %v4795_v38 }
 0x2fb   : > { %7671 = vmatprep.mubr.msk.bf16.mxu0 %vm853_vm0, %v4869_v3  ;;  %v4821_v46 = vld [vmem:[#allocation2 + $0x3d8] sm:$0xff] }
 0x2fc   : > { %4697 = vst.msk [vmem:[#allocation2 + $0x3f8] sm:$0xff] %vm853_vm0, %v4680_v39 }
 0x302   : > { %5283 = vmatmul.mubr.bf16.gmra.mxu0 %v4868_v25  ;;  %v4877_v25 = vpack.c.bf16 %v4801_v55, %v4799_v42 }
 0x303   : > { %7672 = vmatprep.mubr.msk.bf16.mxu0 %vm853_vm0, %v4871_v54  ;;  %v4825_v41 = vld [vmem:[#allocation2 + $0x3f8] sm:$0xff] }
 0x30a   : > { %5291 = vmatmul.mubr.bf16.gmra.mxu0 %v4870_v36  ;;  %v4803_v36 = vld [vmem:[#allocation2 + $0x348] sm:$0xff] }
 0x30b   : > { %7673 = vmatprep.mubr.msk.bf16.mxu0 %vm853_vm0, %v4873_v2 }
 0x312   : > { %5299 = vmatmul.mubr.bf16.gmra.mxu0 %v4872_v28  ;;  %v4879_v28 = vpack.c.bf16 %v4805_v8, %v4803_v36 }
 0x313   : > { %7674 = vmatprep.mubr.msk.bf16.mxu0 %vm853_vm0, %v4875_v34 }
 0x31a   : > { %v10169_v18 = vpop.f32.mrf.mxu0  ;;  %5307 = vmatmul.mubr.bf16.gmra.mxu0 %v4874_v22  ;;  %v4807_v22 = vld [vmem:[#allocation2 + $0x368] sm:$0xff] }
 0x31b   : > { %5371 = vmax.xlane.f32.xlu0 %v10169_v18  ;;  %7675 = vmatprep.mubr.msk.bf16.mxu0 %vm853_vm0, %v4877_v25  ;;  %v4881_v61 = vpack.c.bf16 %v4809_v37, %v4807_v22 }
 0x31c   : > { %v5118_v63 = vpop.f32.mrf.mxu0 }
 0x31e   : > { %v10176_v56 = vpop.f32.mrf.mxu0 }
 0x31f   : > { %5373 = vmax.xlane.f32.xlu0 %v10176_v56 }
 0x320   : > { %v5121_v32 = vpop.f32.mrf.mxu0 }
 0x322   : > { %v10179_v11 = vpop.f32.mrf.mxu0  ;;  %5315 = vmatmul.mubr.bf16.gmra.mxu0 %v4876_v62  ;;  %v4813_v62 = vld [vmem:[#allocation2 + $0x398] sm:$0xff] }
 0x323   : > { %5375 = vmax.xlane.f32.xlu1 %v10179_v11  ;;  %7676 = vmatprep.mubr.msk.bf16.mxu0 %vm853_vm0, %v4879_v28  ;;  %v4883_v19 = vpack.c.bf16 %v4813_v62, %v4811_v14 }
 0x324   : > { %v5126_v7 = vpop.f32.mrf.mxu0 }
 0x326   : > { %v10186_v17 = vpop.f32.mrf.mxu0 }
 0x327   : > { %5377 = vmax.xlane.f32.xlu1 %v10186_v17 }
 0x328   : > { %v5129_v47 = vpop.f32.mrf.mxu0 }
 0x32a   : > { %v10189_v21 = vpop.f32.mrf.mxu0  ;;  %5323 = vmatmul.mubr.bf16.gmra.mxu0 %v4878_v48  ;;  %v4815_v48 = vld [vmem:[#allocation2 + $0x3a8] sm:$0xff] }
 0x32b   : > { %5379 = vmax.xlane.f32.xlu0 %v10189_v21  ;;  %7677 = vmatprep.mubr.msk.bf16.mxu0 %vm853_vm0, %v4881_v61  ;;  %v4885_v44 = vpack.c.bf16 %v4817_v35, %v4815_v48 }
 0x32c   : > { %v5134_v26 = vpop.f32.mrf.mxu0 }
 0x32e   : > { %v10196_v31 = vpop.f32.mrf.mxu0 }
 0x32f   : > { %5381 = vmax.xlane.f32.xlu1 %v10196_v31 }
 0x330   : > { %v5137_v30 = vpop.f32.mrf.mxu0 }
 0x332   : > { %v10199_v23 = vpop.f32.mrf.mxu0  ;;  %5331 = vmatmul.mubr.bf16.gmra.mxu0 %v4880_v43  ;;  %v4819_v43 = vld [vmem:[#allocation2 + $0x3c8] sm:$0xff] }
 0x333   : > { %7678 = vmatprep.mubr.msk.bf16.mxu0 %vm853_vm0, %v4883_v19  ;;  %5383 = vmax.xlane.f32.xlu0 %v10199_v23  ;;  %v4887_v49 = vpack.c.bf16 %v4821_v46, %v4819_v43 }
 0x334   : > { %v5142_v10 = vpop.f32.mrf.mxu0 }
 0x336   : > { %v10206_v27 = vpop.f32.mrf.mxu0 }
 0x337   : > { %5385 = vmax.xlane.f32.xlu1 %v10206_v27 }
 0x338   : > { %v5145_v33 = vpop.f32.mrf.mxu0 }
 0x33a   : > { %v10209_v45 = vpop.f32.mrf.mxu0  ;;  %5339 = vmatmul.mubr.bf16.gmra.mxu0 %v4882_v12  ;;  %v4823_v12 = vld [vmem:[#allocation2 + $0x3e8] sm:$0xff] }
 0x33b   : > { %7679 = vmatprep.mubr.msk.bf16.mxu0 %vm853_vm0, %v4885_v44  ;;  %5387 = vmax.xlane.f32.xlu0 %v10209_v45  ;;  %v4889_v3 = vpack.c.bf16 %v4825_v41, %v4823_v12 }
 0x33c   : > { %v5150_v57 = vpop.f32.mrf.mxu0 }
 0x33e   : > { %v10216_v0 = vpop.f32.mrf.mxu0 }
 0x33f   : > { %5389 = vmax.xlane.f32.xlu1 %v10216_v0 }
 0x340   : > { %v5153_v13 = vpop.f32.mrf.mxu0 }
 0x342   : > { %v10219_v59 = vpop.f32.mrf.mxu0  ;;  %5347 = vmatmul.mubr.bf16.gmra.mxu0 %v4884_v40 }
 0x343   : > { %7680 = vmatprep.mubr.msk.bf16.mxu0 %vm853_vm0, %v4887_v49  ;;  %5391 = vmax.xlane.f32.xlu0 %v10219_v59 }
 0x344   : > { %v5158_v51 = vpop.f32.mrf.mxu0 }
 0x346   : > { %v10226_v1 = vpop.f32.mrf.mxu0 }
 0x347   : > { %5393 = vmax.xlane.f32.xlu1 %v10226_v1 }
 0x348   : > { %v5161_v52 = vpop.f32.mrf.mxu0 }
 0x34a   : > { %v10229_v39 = vpop.f32.mrf.mxu0  ;;  %5355 = vmatmul.mubr.bf16.gmra.mxu0 %v4886_v20 }
 0x34b   : > { %7681 = vmatprep.mubr.msk.bf16.mxu0 %vm853_vm0, %v4889_v3  ;;  %5395 = vmax.xlane.f32.xlu0 %v10229_v39 }
 0x34c   : > { %v5166_v9 = vpop.f32.mrf.mxu0 }
 0x34e   : > { %v10236_v15 = vpop.f32.mrf.mxu0 }
 0x34f   : > { %5397 = vmax.xlane.f32.xlu1 %v10236_v15 }
 0x350   : > { %v5169_v40 = vpop.f32.mrf.mxu0 }
 0x352   : > { %v10239_v29 = vpop.f32.mrf.mxu0  ;;  %5363 = vmatmul.mubr.bf16.gmra.mxu0 %v4888_v50 }
 0x353   : > { %5399 = vmax.xlane.f32.xlu0 %v10239_v29 }
 0x354   : > { %v5174_v5 = vpop.f32.mrf.mxu0 }
 0x356   : > { %v10245_v6 = vpop.f32.mrf.mxu0 }
 0x357   : > { %5401 = vmax.xlane.f32.xlu1 %v10245_v6 }
 0x358   : > { %v5177_v20 = vpop.f32.mrf.mxu0 }
 0x35a   : > { %v10248_v4 = vpop.f32.mrf.mxu0 }
 0x35b   : > { %5403 = vmax.xlane.f32.xlu0 %v10248_v4 }
 0x35c   : > { %v5182_v54 = vpop.f32.mrf.mxu0 }
 0x35e   : > { %v10251_v58 = vpop.f32.mrf.mxu0 }
 0x35f   : > { %5405 = vmax.xlane.f32.xlu1 %v10251_v58 }
 0x360   : > { %v5185_v60 = vpop.f32.mrf.mxu0 }
 0x362   : > { %v10254_v53 = vpop.f32.mrf.mxu0 }
 0x363   : > { %5407 = vmax.xlane.f32.xlu0 %v10254_v53 }
 0x364   : > { %v5190_v24 = vpop.f32.mrf.mxu0 }
 0x366   : > { %v10257_v50 = vpop.f32.mrf.mxu0 }
 0x367   : > { %5409 = vmax.xlane.f32.xlu1 %v10257_v50 }
 0x368   : > { %v5193_v2 = vpop.f32.mrf.mxu0 }
 0x36a   : > { %v10260_v16 = vpop.f32.mrf.mxu0 }
 0x36b   : > { %5411 = vmax.xlane.f32.xlu0 %v10260_v16 }
 0x36c   : > { %v5198_v38 = vpop.f32.mrf.mxu0 }
 0x36e   : > { %v10263_v34 = vpop.f32.mrf.mxu0 }
 0x36f   : > { %5413 = vmax.xlane.f32.xlu1 %v10263_v34 }
 0x370   : > { %v5201_v42 = vpop.f32.mrf.mxu0 }
 0x372   : > { %v10266_v55 = vpop.f32.mrf.mxu0 }
 0x373   : > { %5415 = vmax.xlane.f32.xlu0 %v10266_v55 }
 0x374   : > { %v5206_v25 = vpop.f32.mrf.mxu0 }
 0x376   : > { %v10269_v63 = vpop.f32.mrf.mxu0 }
 0x377   : > { %5417 = vmax.xlane.f32.xlu1 %v10269_v63 }
 0x378   : > { %v5209_v36 = vpop.f32.mrf.mxu0 }
 0x37a   : > { %v10272_v8 = vpop.f32.mrf.mxu0 }
 0x37c   : > { %v5214_v32 = vpop.f32.mrf.mxu0 }
 0x37e   : > { %v10274_v28 = vpop.f32.mrf.mxu0 }
 0x380   : > { %v5217_v7 = vpop.f32.mrf.mxu0 }
 0x382   : > { %v10276_v22 = vpop.f32.mrf.mxu0 }
 0x384   : > { %v5222_v37 = vpop.f32.mrf.mxu0 }
 0x386   : > { %v10278_v47 = vpop.f32.mrf.mxu0 }
 0x388   : > { %v5225_v61 = vpop.f32.mrf.mxu0 }
 0x38a   : > { %v10280_v26 = vpop.f32.mrf.mxu0 }
 0x38c   : > { %v5230_v62 = vpop.f32.mrf.mxu0 }
 0x38e   : > { %v10282_v30 = vpop.f32.mrf.mxu0 }
 0x390   : > { %v5233_v14 = vpop.f32.mrf.mxu0 }
 0x392   : > { %v10284_v19 = vpop.f32.mrf.mxu0 }
 0x394   : > { %v5238_v10 = vpop.f32.mrf.mxu0 }
 0x396   : > { %v10286_v48 = vpop.f32.mrf.mxu0 }
 0x398   : > { %v5241_v35 = vpop.f32.mrf.mxu0 }
 0x39a   : > { %v10288_v33 = vpop.f32.mrf.mxu0 }
 0x39c   : > { %v5246_v44 = vpop.f32.mrf.mxu0 }
 0x39e   : > { %v10290_v57 = vpop.f32.mrf.mxu0 }
 0x3a0   : > { %v5249_v43 = vpop.f32.mrf.mxu0 }
 0x3a2   : > { %v10292_v46 = vpop.f32.mrf.mxu0 }
 0x3a4   : > { %v5372_v13 = vpop.xlane.xlu0 %5371  ;;  %v5254_v49 = vpop.f32.mrf.mxu0 }
 0x3a5   : > { %v5499_v51 = vsub.f32 %v10169_v18, %v5372_v13 }
 0x3a6   : > { %v10295_v12 = vpop.f32.mrf.mxu0 }
 0x3a7   : > { %v5563_v41 = vmul.f32 1.442695, %v5499_v51 }
 0x3a8   : > { %v5374_v52 = vpop.xlane.xlu0 %5373  ;;  %v5257_v3 = vpop.f32.mrf.mxu0 }
 0x3a9   : > { %8545 = vpow2.f32 %v5563_v41  ;;  %v5500_v9 = vsub.f32 %v10176_v56, %v5374_v52 }
 0x3aa   : > { %v10298_v40 = vpop.f32.mrf.mxu0 }
 0x3ab   : > { %v5565_v5 = vmul.f32 1.442695, %v5500_v9 }
 0x3ac   : > { %v5376_v20 = vpop.xlane.xlu1 %5375  ;;  %v5262_v54 = vpop.f32.mrf.mxu0 }
 0x3ad   : > { %8547 = vpow2.f32 %v5565_v5  ;;  %v5501_v60 = vsub.f32 %v10179_v11, %v5376_v20 }
 0x3ae   : > { %v10301_v24 = vpop.f32.mrf.mxu0 }
 0x3af   : > { %v5567_v2 = vmul.f32 1.442695, %v5501_v60 }
 0x3b0   : > { %v5378_v18 = vpop.xlane.xlu1 %5377  ;;  %v5265_v38 = vpop.f32.mrf.mxu0 }
 0x3b1   : > { %8549 = vpow2.f32 %v5567_v2  ;;  %v5502_v42 = vsub.f32 %v10186_v17, %v5378_v18 }
 0x3b2   : > { %v10304_v25 = vpop.f32.mrf.mxu0 }
 0x3b3   : > { %v5569_v36 = vmul.f32 1.442695, %v5502_v42 }
 0x3b4   : > { %v5380_v56 = vpop.xlane.xlu0 %5379  ;;  %v5270_v32 = vpop.f32.mrf.mxu0 }
 0x3b5   : > { %8551 = vpow2.f32 %v5569_v36  ;;  %v5503_v7 = vsub.f32 %v10189_v21, %v5380_v56 }
 0x3b6   : > { %v10307_v37 = vpop.eup %8545  ;;  %v10309_v61 = vpop.f32.mrf.mxu0 }
 0x3b7   : > { %v5571_v11 = vmul.f32 1.442695, %v5503_v7  ;;  %5691 = vadd.xlane.f32.xlu0 %v10307_v37 }
 0x3b8   : > { %v5382_v62 = vpop.xlane.xlu1 %5381  ;;  %v5273_v14 = vpop.f32.mrf.mxu0 }
 0x3b9   : > { %8553 = vpow2.f32 %v5571_v11  ;;  %v5504_v17 = vsub.f32 %v10196_v31, %v5382_v62 }
 0x3ba   : > { %v10313_v10 = vpop.eup %8547  ;;  %v10315_v35 = vpop.f32.mrf.mxu0 }
 0x3bb   : > { %v5573_v44 = vmul.f32 1.442695, %v5504_v17  ;;  %5693 = vadd.xlane.f32.xlu1 %v10313_v10  ;;  %5419 = vmax.xlane.f32.xlu0 %v10272_v8 }
 0x3bc   : > { %v5384_v21 = vpop.xlane.xlu0 %5383  ;;  %v5278_v43 = vpop.f32.mrf.mxu0 }
 0x3bd   : > { %8555 = vpow2.f32 %v5573_v44  ;;  %v5505_v13 = vsub.f32 %v10199_v23, %v5384_v21 }
 0x3be   : > { %v10320_v49 = vpop.eup %8549  ;;  %v10322_v51 = vpop.f32.mrf.mxu0 }
 0x3bf   : > { %v5575_v41 = vmul.f32 1.442695, %v5505_v13  ;;  %5695 = vadd.xlane.f32.xlu0 %v10320_v49  ;;  %5421 = vmax.xlane.f32.xlu1 %v10274_v28 }
 0x3c0   : > { %v5386_v31 = vpop.xlane.xlu1 %5385  ;;  %v5281_v52 = vpop.f32.mrf.mxu0 }
 0x3c1   : > { %8557 = vpow2.f32 %v5575_v41  ;;  %v5506_v3 = vsub.f32 %v10206_v27, %v5386_v31 }
 0x3c2   : > { %v10327_v9 = vpop.eup %8551  ;;  %v10329_v5 = vpop.f32.mrf.mxu0 }
 0x3c3   : > { %v5577_v20 = vmul.f32 1.442695, %v5506_v3  ;;  %5697 = vadd.xlane.f32.xlu1 %v10327_v9  ;;  %5423 = vmax.xlane.f32.xlu0 %v10276_v22 }
 0x3c4   : > { %v5388_v23 = vpop.xlane.xlu0 %5387  ;;  %v5286_v54 = vpop.f32.mrf.mxu0 }
 0x3c5   : > { %8559 = vpow2.f32 %v5577_v20  ;;  %v5507_v60 = vsub.f32 %v10209_v45, %v5388_v23 }
 0x3c6   : > { %v10334_v2 = vpop.eup %8553  ;;  %v10336_v18 = vpop.f32.mrf.mxu0 }
 0x3c7   : > { %v5579_v38 = vmul.f32 1.442695, %v5507_v60  ;;  %5699 = vadd.xlane.f32.xlu0 %v10334_v2  ;;  %5425 = vmax.xlane.f32.xlu1 %v10278_v47 }
 0x3c8   : > { %v5390_v27 = vpop.xlane.xlu1 %5389  ;;  %v5289_v42 = vpop.f32.mrf.mxu0 }
 0x3c9   : > { %8561 = vpow2.f32 %v5579_v38  ;;  %v5508_v36 = vsub.f32 %v10216_v0, %v5390_v27 }
 0x3ca   : > { %v10341_v56 = vpop.eup %8555  ;;  %v10343_v32 = vpop.f32.mrf.mxu0 }
 0x3cb   : > { %11083 = vst [vmem:[#allocation6_spill] sm:$0xff] %v10343_v32  ;;  %v5581_v7 = vmul.f32 1.442695, %v5508_v36  ;;  %5701 = vadd.xlane.f32.xlu1 %v10341_v56  ;;  %5427 = vmax.xlane.f32.xlu0 %v10280_v26  ;;  %v11067_v36 = vmov 0  }
 0x3cc   : > { %v5392_v45 = vpop.xlane.xlu0 %5391  ;;  %v5294_v11 = vpop.f32.mrf.mxu0  ;;  %6019 = vmatprep.mubr.bf16.mxu1 %v11067_v36 }
 0x3cd   : > { %8563 = vpow2.f32 %v5581_v7  ;;  %v5509_v62 = vsub.f32 %v10219_v59, %v5392_v45 }
 0x3ce   : > { %v10348_v14 = vpop.eup %8557  ;;  %v10350_v17 = vpop.f32.mrf.mxu0 }
 0x3cf   : > { %11084 = vst [vmem:[#allocation7_spill] sm:$0xff] %v10350_v17  ;;  %v5583_v44 = vmul.f32 1.442695, %v5509_v62  ;;  %5703 = vadd.xlane.f32.xlu0 %v10348_v14  ;;  %5429 = vmax.xlane.f32.xlu1 %v10282_v30 }
 0x3d0   : > { %v5394_v0 = vpop.xlane.xlu1 %5393  ;;  %v5297_v21 = vpop.f32.mrf.mxu0 }
 0x3d1   : > { %8565 = vpow2.f32 %v5583_v44  ;;  %v5510_v43 = vsub.f32 %v10226_v1, %v5394_v0 }
 0x3d2   : > { %v10355_v13 = vpop.eup %8559  ;;  %v10357_v41 = vpop.f32.mrf.mxu0 }
 0x3d3   : > { %11085 = vst [vmem:[#allocation8_spill] sm:$0xff] %v10357_v41  ;;  %v5585_v31 = vmul.f32 1.442695, %v5510_v43  ;;  %5705 = vadd.xlane.f32.xlu1 %v10355_v13  ;;  %5431 = vmax.xlane.f32.xlu0 %v10284_v19 }
 0x3d4   : > { %v5396_v59 = vpop.xlane.xlu0 %5395  ;;  %v5302_v52 = vpop.f32.mrf.mxu0 }
 0x3d5   : > { %8567 = vpow2.f32 %v5585_v31  ;;  %v5511_v3 = vsub.f32 %v10229_v39, %v5396_v59 }
 0x3d6   : > { %v10362_v20 = vpop.eup %8561  ;;  %v10364_v23 = vpop.f32.mrf.mxu0 }
 0x3d7   : > { %11086 = vst [vmem:[#allocation9_spill] sm:$0xff] %v10364_v23  ;;  %v5587_v54 = vmul.f32 1.442695, %v5511_v3  ;;  %5707 = vadd.xlane.f32.xlu0 %v10362_v20  ;;  %5433 = vmax.xlane.f32.xlu1 %v10286_v48 }
 0x3d8   : > { %v5398_v1 = vpop.xlane.xlu1 %5397  ;;  %v5305_v60 = vpop.f32.mrf.mxu0 }
 0x3d9   : > { %8569 = vpow2.f32 %v5587_v54  ;;  %v5512_v38 = vsub.f32 %v10236_v15, %v5398_v1 }
 0x3da   : > { %v10369_v27 = vpop.eup %8563  ;;  %v10371_v42 = vpop.f32.mrf.mxu0 }
 0x3db   : > { %v5589_v39 = vmul.f32 1.442695, %v5512_v38  ;;  %5709 = vadd.xlane.f32.xlu1 %v10369_v27  ;;  %5435 = vmax.xlane.f32.xlu0 %v10288_v33 }
 0x3dc   : > { %v5400_v7 = vpop.xlane.xlu0 %5399  ;;  %v5310_v45 = vpop.f32.mrf.mxu0 }
 0x3dd   : > { %8571 = vpow2.f32 %v5589_v39  ;;  %v5513_v11 = vsub.f32 %v10239_v29, %v5400_v7 }
 0x3de   : > { %v10377_v62 = vpop.eup %8565  ;;  %v10379_v15 = vpop.f32.mrf.mxu0 }
 0x3df   : > { %v5591_v44 = vmul.f32 1.442695, %v5513_v11  ;;  %5711 = vadd.xlane.f32.xlu0 %v10377_v62  ;;  %5437 = vmax.xlane.f32.xlu1 %v10290_v57 }
 0x3e0   : > { %v5402_v0 = vpop.xlane.xlu1 %5401  ;;  %v5313_v21 = vpop.f32.mrf.mxu0 }
 0x3e1   : > { %8573 = vpow2.f32 %v5591_v44  ;;  %v5514_v43 = vsub.f32 %v10245_v6, %v5402_v0 }
 0x3e2   : > { %v10384_v31 = vpop.eup %8567  ;;  %v10386_v59 = vpop.f32.mrf.mxu0 }
 0x3e3   : > { %v5593_v52 = vmul.f32 1.442695, %v5514_v43  ;;  %5713 = vadd.xlane.f32.xlu1 %v10384_v31  ;;  %5439 = vmax.xlane.f32.xlu0 %v10292_v46 }
 0x3e4   : > { %v5404_v29 = vpop.xlane.xlu0 %5403  ;;  %v5318_v3 = vpop.f32.mrf.mxu0 }
 0x3e5   : > { %8575 = vpow2.f32 %v5593_v52  ;;  %v5515_v54 = vsub.f32 %v10248_v4, %v5404_v29 }
 0x3e6   : > { %v10391_v1 = vpop.eup %8569  ;;  %v10393_v60 = vpop.f32.mrf.mxu0 }
 0x3e7   : > { %v5595_v38 = vmul.f32 1.442695, %v5515_v54  ;;  %5715 = vadd.xlane.f32.xlu0 %v10391_v1  ;;  %5441 = vmax.xlane.f32.xlu1 %v10295_v12 }
 0x3e8   : > { %v5406_v6 = vpop.xlane.xlu1 %5405  ;;  %v5321_v39 = vpop.f32.mrf.mxu0 }
 0x3e9   : > { %8577 = vpow2.f32 %v5595_v38  ;;  %v5516_v7 = vsub.f32 %v10251_v58, %v5406_v6 }
 0x3ea   : > { %v10398_v45 = vpop.eup %8571  ;;  %v10400_v11 = vpop.f32.mrf.mxu0 }
 0x3eb   : > { %v5597_v44 = vmul.f32 1.442695, %v5516_v7  ;;  %5717 = vadd.xlane.f32.xlu1 %v10398_v45  ;;  %5443 = vmax.xlane.f32.xlu0 %v10298_v40 }
 0x3ec   : > { %v5408_v4 = vpop.xlane.xlu0 %5407  ;;  %v5326_v0 = vpop.f32.mrf.mxu0 }
 0x3ed   : > { %8579 = vpow2.f32 %v5597_v44  ;;  %v5517_v21 = vsub.f32 %v10254_v53, %v5408_v4 }
 0x3ee   : > { %v10405_v43 = vpop.eup %8573  ;;  %v10407_v52 = vpop.f32.mrf.mxu0 }
 0x3ef   : > { %v5599_v29 = vmul.f32 1.442695, %v5517_v21  ;;  %5719 = vadd.xlane.f32.xlu0 %v10405_v43  ;;  %5445 = vmax.xlane.f32.xlu1 %v10301_v24 }
 0x3f0   : > { %v5410_v58 = vpop.xlane.xlu1 %5409  ;;  %v5329_v3 = vpop.f32.mrf.mxu0 }
 0x3f1   : > { %8581 = vpow2.f32 %v5599_v29  ;;  %v5518_v54 = vsub.f32 %v10257_v50, %v5410_v58 }
 0x3f2   : > { %v10412_v38 = vpop.eup %8575  ;;  %v10414_v6 = vpop.f32.mrf.mxu0 }
 0x3f3   : > { %v5601_v39 = vmul.f32 1.442695, %v5518_v54  ;;  %5721 = vadd.xlane.f32.xlu1 %v10412_v38  ;;  %5447 = vmax.xlane.f32.xlu0 %v10304_v25 }
 0x3f4   : > { %v5412_v53 = vpop.xlane.xlu0 %5411  ;;  %v5334_v7 = vpop.f32.mrf.mxu0 }
 0x3f5   : > { %8583 = vpow2.f32 %v5601_v39  ;;  %v5519_v44 = vsub.f32 %v10260_v16, %v5412_v53 }
 0x3f6   : > { %v10419_v4 = vpop.eup %8577  ;;  %v10421_v0 = vpop.f32.mrf.mxu0 }
 0x3f7   : > { %v5603_v21 = vmul.f32 1.442695, %v5519_v44  ;;  %5723 = vadd.xlane.f32.xlu0 %v10419_v4  ;;  %5449 = vmax.xlane.f32.xlu1 %v10309_v61 }
 0x3f8   : > { %v5414_v50 = vpop.xlane.xlu1 %5413  ;;  %v5337_v29 = vpop.f32.mrf.mxu0 }
 0x3f9   : > { %8585 = vpow2.f32 %v5603_v21  ;;  %v5520_v58 = vsub.f32 %v10263_v34, %v5414_v50 }
 0x3fa   : > { %v10426_v3 = vpop.eup %8579  ;;  %v10428_v54 = vpop.f32.mrf.mxu0 }
 0x3fb   : > { %11087 = vst [vmem:[#allocation10_spill] sm:$0xff] %v10426_v3  ;;  %v5605_v39 = vmul.f32 1.442695, %v5520_v58  ;;  %5725 = vadd.xlane.f32.xlu1 %v10426_v3  ;;  %5451 = vmax.xlane.f32.xlu0 %v10315_v35 }
 0x3fc   : > { %v5416_v16 = vpop.xlane.xlu0 %5415  ;;  %v5342_v53 = vpop.f32.mrf.mxu0 }
 0x3fd   : > { %8587 = vpow2.f32 %v5605_v39  ;;  %v5521_v7 = vsub.f32 %v10266_v55, %v5416_v16 }
 0x3fe   : > { %v10433_v44 = vpop.eup %8581  ;;  %v10435_v29 = vpop.f32.mrf.mxu0 }
 0x3ff   : > { %11088 = vst [vmem:[#allocation11_spill] sm:$0xff] %v10433_v44  ;;  %v5607_v21 = vmul.f32 1.442695, %v5521_v7  ;;  %5727 = vadd.xlane.f32.xlu0 %v10433_v44  ;;  %5453 = vmax.xlane.f32.xlu1 %v10322_v51 }
 0x400   : > { %v5418_v34 = vpop.xlane.xlu1 %5417  ;;  %v5345_v50 = vpop.f32.mrf.mxu0 }
 0x401   : > { %8589 = vpow2.f32 %v5607_v21  ;;  %v5522_v58 = vsub.f32 %v10269_v63, %v5418_v34 }
 0x402   : > { %v10440_v36 = vpop.eup %8583  ;;  %v10442_v53 = vpop.f32.mrf.mxu0 }
 0x403   : > { %11089 = vst [vmem:[#allocation12_spill] sm:$0xff] %v10440_v36  ;;  %v5609_v39 = vmul.f32 1.442695, %v5522_v58  ;;  %5729 = vadd.xlane.f32.xlu1 %v10440_v36  ;;  %5455 = vmax.xlane.f32.xlu0 %v10329_v5 }
 0x404   : > { %v5350_v55 = vpop.f32.mrf.mxu0 }
 0x405   : > { %8591 = vpow2.f32 %v5609_v39 }
 0x406   : > { %v10446_v16 = vpop.eup %8585  ;;  %v10448_v7 = vpop.f32.mrf.mxu0 }
 0x407   : > { %11090 = vst [vmem:[#allocation13_spill] sm:$0xff] %v10446_v16  ;;  %5731 = vadd.xlane.f32.xlu0 %v10446_v16  ;;  %5457 = vmax.xlane.f32.xlu1 %v10336_v18 }
 0x408   : > { %v5353_v63 = vpop.f32.mrf.mxu0 }
 0x40a   : > { %v10452_v21 = vpop.eup %8587  ;;  %v10454_v34 = vpop.f32.mrf.mxu0 }
 0x40b   : > { %11091 = vst [vmem:[#allocation14_spill] sm:$0xff] %v10452_v21  ;;  %5733 = vadd.xlane.f32.xlu1 %v10452_v21  ;;  %5459 = vmax.xlane.f32.xlu0 %v10343_v32 }
 0x40c   : > { %v5358_v50 = vpop.f32.mrf.mxu0 }
 0x40e   : > { %v10458_v58 = vpop.eup %8589  ;;  %v10460_v39 = vpop.f32.mrf.mxu0 }
 0x40f   : > { %11092 = vst [vmem:[#allocation15_spill] sm:$0xff] %v10458_v58  ;;  %5735 = vadd.xlane.f32.xlu0 %v10458_v58  ;;  %5461 = vmax.xlane.f32.xlu1 %v10350_v17 }
 0x410   : > { %v5361_v55 = vpop.f32.mrf.mxu0 }
 0x412   : > { %v10464_v63 = vpop.eup %8591  ;;  %v10466_v16 = vpop.f32.mrf.mxu0 }
 0x413   : > { %11093 = vst [vmem:[#allocation16_spill] sm:$0xff] %v10464_v63  ;;  %5737 = vadd.xlane.f32.xlu1 %v10464_v63  ;;  %5463 = vmax.xlane.f32.xlu0 %v10357_v41 }
 0x414   : > { %v5366_v21 = vpop.f32.mrf.mxu0 }
 0x416   : > { %v10470_v50 = vpop.f32.mrf.mxu0 }
 0x417   : > { %11094 = vst [vmem:[#allocation17_spill] sm:$0xff] %v10470_v50  ;;  %5465 = vmax.xlane.f32.xlu1 %v10364_v23 }
 0x418   : > { %v5369_v36 = vpop.f32.mrf.mxu0 }
 0x440   : > { %v5692_v58 = vpop.xlane.xlu0 %5691 }
 0x441   : > { %8593 = vrcp.f32 %v5692_v58 }
 0x444   : > { %v5694_v17 = vpop.xlane.xlu1 %5693  ;;  %v5420_v55 = vpop.xlane.xlu0 %5419 }
 0x445   : > { %8595 = vrcp.f32 %v5694_v17  ;;  %v5523_v44 = vsub.f32 %v10272_v8, %v5420_v55 }
 0x447   : > { %v5611_v32 = vmul.f32 1.442695, %v5523_v44 }
 0x448   : > { %v5696_v3 = vpop.xlane.xlu0 %5695  ;;  %v5422_v63 = vpop.xlane.xlu1 %5421 }
 0x449   : > { %8597 = vpow2.f32 %v5611_v32  ;;  %v5524_v21 = vsub.f32 %v10274_v28, %v5422_v63 }
 0x44a   : > { %8599 = vrcp.f32 %v5696_v3 }
 0x44b   : > { %v5613_v41 = vmul.f32 1.442695, %v5524_v21 }
 0x44c   : > { %v5698_v23 = vpop.xlane.xlu1 %5697  ;;  %v5424_v36 = vpop.xlane.xlu0 %5423 }
 0x44d   : > { %8601 = vpow2.f32 %v5613_v41  ;;  %v5525_v58 = vsub.f32 %v10276_v22, %v5424_v36 }
 0x44e   : > { %v8594_v50 = vpop.eup %8593  ;;  %8603 = vrcp.f32 %v5698_v23 }
 0x44f   : > { %v5883_v8 = vmul.f32 %v8594_v50, %v10307_v37  ;;  %v5615_v17 = vmul.f32 1.442695, %v5525_v58 }
 0x450   : > { %v5700_v44 = vpop.xlane.xlu0 %5699  ;;  %v5426_v55 = vpop.xlane.xlu1 %5425 }
 0x451   : > { %6468 = vst [vmem:[%s10480_s7] sm:$0xff] %v5883_v8  ;;  %8605 = vpow2.f32 %v5615_v17  ;;  %v5526_v28 = vsub.f32 %v10278_v47, %v5426_v55 }
 0x452   : > { %v8596_v32 = vpop.eup %8595  ;;  %8607 = vrcp.f32 %v5700_v44 }
 0x453   : > { %v5884_v41 = vmul.f32 %v8596_v32, %v10313_v10  ;;  %v5617_v22 = vmul.f32 1.442695, %v5526_v28  ;;  %v11095_v10 = vmov 0  }
 0x454   : > { %v5702_v3 = vpop.xlane.xlu1 %5701  ;;  %v5428_v23 = vpop.xlane.xlu0 %5427 }
 0x455   : > { %6469 = vst [vmem:[%s10480_s7 + $0x8] sm:$0xff] %v5884_v41  ;;  %8609 = vpow2.f32 %v5617_v22  ;;  %v5527_v37 = vsub.f32 %v10280_v26, %v5428_v23  ;;  %v5947_v63 = vpack.c.bf16 %v5884_v41, %v5883_v8 }
 0x456   : > { %v10487_v50 = vpop.eup %8597  ;;  %8611 = vrcp.f32 %v5702_v3 }
 0x457   : > { %v8600_v21 = vpop.eup %8599  ;;  %v5619_v36 = vmul.f32 1.442695, %v5527_v37  ;;  %6020 = vmatmul.mubr.bf16.vlgmr.msra.gmra.mxu1 %v5947_v63  ;;  %5739 = vadd.xlane.f32.xlu0 %v10487_v50 }
 0x458   : > { %v5704_v47 = vpop.xlane.xlu0 %5703  ;;  %v5430_v58 = vpop.xlane.xlu1 %5429  ;;  %6029 = vmatprep.mubr.bf16.mxu1 %v11095_v10  ;;  %v5885_v17 = vmul.f32 %v8600_v21, %v10320_v49 }
 0x459   : > { %8613 = vpow2.f32 %v5619_v36  ;;  %v5528_v44 = vsub.f32 %v10282_v30, %v5430_v58 }
 0x45a   : > { %v10493_v26 = vpop.eup %8601  ;;  %8615 = vrcp.f32 %v5704_v47  ;;  %6470 = vst [vmem:[%s10480_s7 + $0x10] sm:$0xff] %v5885_v17 }
 0x45b   : > { %v8604_v8 = vpop.eup %8603  ;;  %v5621_v55 = vmul.f32 1.442695, %v5528_v44  ;;  %5741 = vadd.xlane.f32.xlu1 %v10493_v26  ;;  %5467 = vmax.xlane.f32.xlu0 %v10371_v42 }
 0x45c   : > { %v5706_v28 = vpop.xlane.xlu1 %5705  ;;  %v5432_v32 = vpop.xlane.xlu0 %5431  ;;  %v5886_v41 = vmul.f32 %v8604_v8, %v10327_v9 }
 0x45d   : > { %8617 = vpow2.f32 %v5621_v55  ;;  %v5529_v49 = vsub.f32 %v10284_v19, %v5432_v32 }
 0x45e   : > { %v10500_v22 = vpop.eup %8605  ;;  %8619 = vrcp.f32 %v5706_v28  ;;  %v5948_v30 = vpack.c.bf16 %v5886_v41, %v5885_v17  ;;  %6471 = vst [vmem:[%s10480_s7 + $0x18] sm:$0xff] %v5886_v41 }
 0x45f   : > { %v8608_v3 = vpop.eup %8607  ;;  %v5623_v23 = vmul.f32 1.442695, %v5529_v49  ;;  %5743 = vadd.xlane.f32.xlu0 %v10500_v22  ;;  %5469 = vmax.xlane.f32.xlu1 %v10379_v15 }
 0x460   : > { %6030 = vmatmul.mubr.bf16.gmra.mxu1 %v5948_v30  ;;  %v5708_v37 = vpop.xlane.xlu0 %5707  ;;  %v5434_v63 = vpop.xlane.xlu1 %5433  ;;  %v5887_v9 = vmul.f32 %v8608_v3, %v10334_v2 }
 0x461   : > { %8621 = vpow2.f32 %v5623_v23  ;;  %v5530_v19 = vsub.f32 %v10286_v48, %v5434_v63  ;;  %6039 = vmatprep.mubr.bf16.mxu1 %v11095_v10 }
 0x462   : > { %v10508_v21 = vpop.eup %8609  ;;  %8623 = vrcp.f32 %v5708_v37  ;;  %6472 = vst [vmem:[%s10480_s7 + $0x20] sm:$0xff] %v5887_v9 }
 0x463   : > { %v8612_v36 = vpop.eup %8611  ;;  %v5625_v47 = vmul.f32 1.442695, %v5530_v19  ;;  %5745 = vadd.xlane.f32.xlu1 %v10508_v21  ;;  %5471 = vmax.xlane.f32.xlu0 %v10386_v59 }
 0x464   : > { %v5710_v58 = vpop.xlane.xlu1 %5709  ;;  %v5436_v17 = vpop.xlane.xlu0 %5435  ;;  %v5888_v2 = vmul.f32 %v8612_v36, %v10341_v56 }
 0x465   : > { %8625 = vpow2.f32 %v5625_v47  ;;  %v5531_v48 = vsub.f32 %v10288_v33, %v5436_v17 }
 0x466   : > { %v10515_v44 = vpop.eup %8613  ;;  %8627 = vrcp.f32 %v5710_v58  ;;  %v5949_v8 = vpack.c.bf16 %v5888_v2, %v5887_v9  ;;  %6473 = vst [vmem:[%s10480_s7 + $0x28] sm:$0xff] %v5888_v2 }
 0x467   : > { %v8616_v55 = vpop.eup %8615  ;;  %v5627_v28 = vmul.f32 1.442695, %v5531_v48  ;;  %5747 = vadd.xlane.f32.xlu0 %v10515_v44  ;;  %5473 = vmax.xlane.f32.xlu1 %v10393_v60 }
 0x468   : > { %6040 = vmatmul.mubr.bf16.gmra.mxu1 %v5949_v8  ;;  %v5712_v32 = vpop.xlane.xlu0 %5711  ;;  %v5438_v41 = vpop.xlane.xlu1 %5437  ;;  %v5889_v56 = vmul.f32 %v8616_v55, %v10348_v14 }
 0x469   : > { %8629 = vpow2.f32 %v5627_v28  ;;  %v5532_v33 = vsub.f32 %v10290_v57, %v5438_v41  ;;  %6049 = vmatprep.mubr.bf16.mxu1 %v11095_v10 }
 0x46a   : > { %v10523_v49 = vpop.eup %8617  ;;  %8631 = vrcp.f32 %v5712_v32  ;;  %6474 = vst [vmem:[%s10480_s7 + $0x30] sm:$0xff] %v5889_v56 }
 0x46b   : > { %v8620_v30 = vpop.eup %8619  ;;  %v5629_v3 = vmul.f32 1.442695, %v5532_v33  ;;  %5749 = vadd.xlane.f32.xlu1 %v10523_v49  ;;  %5475 = vmax.xlane.f32.xlu0 %v10400_v11 }
 0x46c   : > { %v5714_v23 = vpop.xlane.xlu1 %5713  ;;  %v5440_v37 = vpop.xlane.xlu0 %5439  ;;  %v5890_v14 = vmul.f32 %v8620_v30, %v10355_v13 }
 0x46d   : > { %8633 = vpow2.f32 %v5629_v3  ;;  %v5533_v57 = vsub.f32 %v10292_v46, %v5440_v37 }
 0x46e   : > { %v10530_v63 = vpop.eup %8621  ;;  %8635 = vrcp.f32 %v5714_v23  ;;  %v5950_v9 = vpack.c.bf16 %v5890_v14, %v5889_v56  ;;  %6475 = vst [vmem:[%s10480_s7 + $0x38] sm:$0xff] %v5890_v14 }
 0x46f   : > { %v8624_v19 = vpop.eup %8623  ;;  %v5631_v36 = vmul.f32 1.442695, %v5533_v57  ;;  %5751 = vadd.xlane.f32.xlu0 %v10530_v63  ;;  %5477 = vmax.xlane.f32.xlu1 %v10407_v52 }
 0x470   : > { %6050 = vmatmul.mubr.bf16.gmra.mxu1 %v5950_v9  ;;  %v5716_v47 = vpop.xlane.xlu0 %5715  ;;  %v5442_v58 = vpop.xlane.xlu1 %5441  ;;  %v5891_v13 = vmul.f32 %v8624_v19, %v10362_v20 }
 0x471   : > { %8637 = vpow2.f32 %v5631_v36  ;;  %v5534_v46 = vsub.f32 %v10295_v12, %v5442_v58  ;;  %6059 = vmatprep.mubr.bf16.mxu1 %v11095_v10 }
 0x472   : > { %v10538_v17 = vpop.eup %8625  ;;  %8639 = vrcp.f32 %v5716_v47  ;;  %6476 = vst [vmem:[%s10480_s7 + $0x40] sm:$0xff] %v5891_v13 }
 0x473   : > { %v8628_v2 = vpop.eup %8627  ;;  %v5633_v48 = vmul.f32 1.442695, %v5534_v46  ;;  %5753 = vadd.xlane.f32.xlu1 %v10538_v17  ;;  %5479 = vmax.xlane.f32.xlu0 %v10414_v6 }
 0x474   : > { %v5718_v8 = vpop.xlane.xlu1 %5717  ;;  %v5444_v55 = vpop.xlane.xlu0 %5443  ;;  %v5892_v20 = vmul.f32 %v8628_v2, %v10369_v27 }
 0x475   : > { %8641 = vpow2.f32 %v5633_v48  ;;  %v5535_v12 = vsub.f32 %v10298_v40, %v5444_v55 }
 0x476   : > { %v10545_v28 = vpop.eup %8629  ;;  %8643 = vrcp.f32 %v5718_v8  ;;  %v5951_v32 = vpack.c.bf16 %v5892_v20, %v5891_v13  ;;  %6477 = vst [vmem:[%s10480_s7 + $0x48] sm:$0xff] %v5892_v20 }
 0x477   : > { %v8632_v41 = vpop.eup %8631  ;;  %v5635_v56 = vmul.f32 1.442695, %v5535_v12  ;;  %5755 = vadd.xlane.f32.xlu0 %v10545_v28  ;;  %5481 = vmax.xlane.f32.xlu1 %v10421_v0 }
 0x478   : > { %6060 = vmatmul.mubr.bf16.gmra.mxu1 %v5951_v32  ;;  %v5720_v33 = vpop.xlane.xlu0 %5719  ;;  %v5446_v30 = vpop.xlane.xlu1 %5445  ;;  %v5893_v27 = vmul.f32 %v8632_v41, %v10377_v62 }
 0x479   : > { %8645 = vpow2.f32 %v5635_v56  ;;  %v5536_v40 = vsub.f32 %v10301_v24, %v5446_v30  ;;  %6069 = vmatprep.mubr.bf16.mxu1 %v11095_v10 }
 0x47a   : > { %v10553_v3 = vpop.eup %8633  ;;  %8647 = vrcp.f32 %v5720_v33  ;;  %6478 = vst [vmem:[%s10480_s7 + $0x50] sm:$0xff] %v5893_v27 }
 0x47b   : > { %v8636_v23 = vpop.eup %8635  ;;  %v5637_v37 = vmul.f32 1.442695, %v5536_v40  ;;  %5757 = vadd.xlane.f32.xlu1 %v10553_v3  ;;  %5483 = vmax.xlane.f32.xlu0 %v10428_v54 }
 0x47c   : > { %v5722_v14 = vpop.xlane.xlu1 %5721  ;;  %v5448_v57 = vpop.xlane.xlu0 %5447  ;;  %v5894_v62 = vmul.f32 %v8636_v23, %v10384_v31 }
 0x47d   : > { %8649 = vpow2.f32 %v5637_v37  ;;  %v5537_v24 = vsub.f32 %v10304_v25, %v5448_v57 }
 0x47e   : > { %v10560_v9 = vpop.eup %8637  ;;  %8651 = vrcp.f32 %v5722_v14  ;;  %v5952_v19 = vpack.c.bf16 %v5894_v62, %v5893_v27  ;;  %6479 = vst [vmem:[%s10480_s7 + $0x58] sm:$0xff] %v5894_v62 }
 0x47f   : > { %v8640_v36 = vpop.eup %8639  ;;  %v5639_v47 = vmul.f32 1.442695, %v5537_v24  ;;  %5759 = vadd.xlane.f32.xlu0 %v10560_v9  ;;  %5485 = vmax.xlane.f32.xlu1 %v10435_v29 }
 0x480   : > { %6070 = vmatmul.mubr.bf16.gmra.mxu1 %v5952_v19  ;;  %v5724_v58 = vpop.xlane.xlu0 %5723  ;;  %v5450_v13 = vpop.xlane.xlu1 %5449  ;;  %v5895_v31 = vmul.f32 %v8640_v36, %v10391_v1 }
 0x481   : > { %8653 = vpow2.f32 %v5639_v47  ;;  %v5538_v25 = vsub.f32 %v10309_v61, %v5450_v13  ;;  %6079 = vmatprep.mubr.bf16.mxu1 %v11095_v10 }
 0x482   : > { %v10568_v46 = vpop.eup %8641  ;;  %8655 = vrcp.f32 %v5724_v58  ;;  %6480 = vst [vmem:[%s10480_s7 + $0x60] sm:$0xff] %v5895_v31 }
 0x483   : > { %v8644_v2 = vpop.eup %8643  ;;  %v5641_v48 = vmul.f32 1.442695, %v5538_v25  ;;  %5761 = vadd.xlane.f32.xlu1 %v10568_v46  ;;  %5487 = vmax.xlane.f32.xlu0 %v10442_v53 }
 0x484   : > { %v5726_v8 = vpop.xlane.xlu1 %5725  ;;  %v5452_v55 = vpop.xlane.xlu0 %5451  ;;  %v5896_v1 = vmul.f32 %v8644_v2, %v10398_v45  ;;  %v11096_v2 = vld [vmem:[#allocation10_spill] sm:$0xff] }
 0x485   : > { %8657 = vpow2.f32 %v5641_v48  ;;  %v5539_v61 = vsub.f32 %v10315_v35, %v5452_v55  ;;  %v11097_v48 = vld [vmem:[#allocation6_spill] sm:$0xff] }
 0x486   : > { %v10575_v20 = vpop.eup %8645  ;;  %8659 = vrcp.f32 %v5726_v8  ;;  %v5953_v12 = vpack.c.bf16 %v5896_v1, %v5895_v31  ;;  %6481 = vst [vmem:[%s10480_s7 + $0x68] sm:$0xff] %v5896_v1 }
 0x487   : > { %v8648_v32 = vpop.eup %8647  ;;  %v5643_v41 = vmul.f32 1.442695, %v5539_v61  ;;  %5763 = vadd.xlane.f32.xlu0 %v10575_v20  ;;  %5489 = vmax.xlane.f32.xlu1 %v10448_v7 }
 0x488   : > { %6080 = vmatmul.mubr.bf16.gmra.mxu1 %v5953_v12  ;;  %v5728_v56 = vpop.xlane.xlu0 %5727  ;;  %v5454_v33 = vpop.xlane.xlu1 %5453  ;;  %v5897_v45 = vmul.f32 %v8648_v32, %v10405_v43  ;;  %v11098_v12 = vld [vmem:[#allocation17_spill] sm:$0xff] }
 0x489   : > { %8661 = vpow2.f32 %v5643_v41  ;;  %v5540_v35 = vsub.f32 %v10322_v51, %v5454_v33  ;;  %6089 = vmatprep.mubr.bf16.mxu1 %v11095_v10 }
 0x48a   : > { %v10583_v30 = vpop.eup %8649  ;;  %8663 = vrcp.f32 %v5728_v56  ;;  %6482 = vst [vmem:[%s10480_s7 + $0x70] sm:$0xff] %v5897_v45  ;;  %v11099_v56 = vld [vmem:[#allocation11_spill] sm:$0xff] }
 0x48b   : > { %v8652_v27 = vpop.eup %8651  ;;  %v5645_v40 = vmul.f32 1.442695, %v5540_v35  ;;  %5765 = vadd.xlane.f32.xlu1 %v10583_v30  ;;  %5491 = vmax.xlane.f32.xlu0 %v10454_v34 }
 0x48c   : > { %v5730_v23 = vpop.xlane.xlu1 %5729  ;;  %v5456_v37 = vpop.xlane.xlu0 %5455  ;;  %v5898_v43 = vmul.f32 %v8652_v27, %v10412_v38 }
 0x48d   : > { %8665 = vpow2.f32 %v5645_v40  ;;  %v5541_v51 = vsub.f32 %v10329_v5, %v5456_v37 }
 0x48e   : > { %v10590_v14 = vpop.eup %8653  ;;  %8667 = vrcp.f32 %v5730_v23  ;;  %v5954_v57 = vpack.c.bf16 %v5898_v43, %v5897_v45  ;;  %6483 = vst [vmem:[%s10480_s7 + $0x78] sm:$0xff] %v5898_v43  ;;  %v11100_v45 = vld [vmem:[#allocation7_spill] sm:$0xff] }
 0x48f   : > { %v8656_v62 = vpop.eup %8655  ;;  %v5647_v24 = vmul.f32 1.442695, %v5541_v51  ;;  %5767 = vadd.xlane.f32.xlu0 %v10590_v14  ;;  %5493 = vmax.xlane.f32.xlu1 %v10460_v39  ;;  %v11101_v51 = vld [vmem:[#allocation12_spill] sm:$0xff] }
 0x490   : > { %6090 = vmatmul.mubr.bf16.gmra.mxu1 %v5954_v57  ;;  %v5732_v19 = vpop.xlane.xlu0 %5731  ;;  %v5458_v36 = vpop.xlane.xlu1 %5457  ;;  %v5899_v38 = vmul.f32 %v8656_v62, %v10419_v4  ;;  %v11102_v62 = vld [vmem:[#allocation8_spill] sm:$0xff] }
 0x491   : > { %8669 = vpow2.f32 %v5647_v24  ;;  %v5542_v5 = vsub.f32 %v10336_v18, %v5458_v36  ;;  %6099 = vmatprep.mubr.bf16.mxu1 %v11095_v10 }
 0x492   : > { %v10598_v47 = vpop.eup %8657  ;;  %8671 = vrcp.f32 %v5732_v19  ;;  %6484 = vst [vmem:[%s10480_s7 + $0x80] sm:$0xff] %v5899_v38 }
 0x493   : > { %v8660_v58 = vpop.eup %8659  ;;  %v5649_v13 = vmul.f32 1.442695, %v5542_v5  ;;  %5769 = vadd.xlane.f32.xlu1 %v10598_v47  ;;  %5495 = vmax.xlane.f32.xlu0 %v10466_v16 }
 0x494   : > { %v5734_v31 = vpop.xlane.xlu1 %5733  ;;  %v5460_v25 = vpop.xlane.xlu0 %5459  ;;  %v5900_v4 = vmul.f32 %v8660_v58, %v11096_v2 }
 0x495   : > { %8673 = vpow2.f32 %v5649_v13  ;;  %v5543_v18 = vsub.f32 %v11097_v48, %v5460_v25  ;;  %v11103_v13 = vld [vmem:[#allocation13_spill] sm:$0xff] }
 0x496   : > { %v10605_v8 = vpop.eup %8661  ;;  %8675 = vrcp.f32 %v5734_v31  ;;  %v5955_v55 = vpack.c.bf16 %v5900_v4, %v5899_v38  ;;  %6485 = vst [vmem:[%s10480_s7 + $0x88] sm:$0xff] %v5900_v4  ;;  %v11104_v25 = vld [vmem:[#allocation9_spill] sm:$0xff] }
 0x497   : > { %v8664_v1 = vpop.eup %8663  ;;  %v5651_v61 = vmul.f32 1.442695, %v5543_v18  ;;  %5771 = vadd.xlane.f32.xlu0 %v10605_v8  ;;  %5497 = vmax.xlane.f32.xlu1 %v11098_v12 }
 0x498   : > { %6100 = vmatmul.mubr.bf16.gmra.mxu1 %v5955_v55  ;;  %v5736_v32 = vpop.xlane.xlu0 %5735  ;;  %v5462_v41 = vpop.xlane.xlu1 %5461  ;;  %v5901_v33 = vmul.f32 %v8664_v1, %v11099_v56  ;;  %v11105_v55 = vld [vmem:[#allocation14_spill] sm:$0xff]  ;;  %v11106_v56 = vld [vmem:[#allocation15_spill] sm:$0xff] }
 0x499   : > { %8677 = vpow2.f32 %v5651_v61  ;;  %v5544_v35 = vsub.f32 %v11100_v45, %v5462_v41  ;;  %6109 = vmatprep.mubr.bf16.mxu1 %v11095_v10 }
 0x49a   : > { %v10613_v27 = vpop.eup %8665  ;;  %8679 = vrcp.f32 %v5736_v32  ;;  %6486 = vst [vmem:[%s10480_s7 + $0x90] sm:$0xff] %v5901_v33 }
 0x49b   : > { %v8668_v40 = vpop.eup %8667  ;;  %v5653_v23 = vmul.f32 1.442695, %v5544_v35  ;;  %5773 = vadd.xlane.f32.xlu1 %v10613_v27 }
 0x49c   : > { %v5738_v37 = vpop.xlane.xlu1 %5737  ;;  %v5464_v43 = vpop.xlane.xlu0 %5463  ;;  %v5902_v57 = vmul.f32 %v8668_v40, %v11101_v51  ;;  %v11107_v40 = vld [vmem:[#allocation16_spill] sm:$0xff] }
 0x49d   : > { %8681 = vpow2.f32 %v5653_v23  ;;  %v5545_v24 = vsub.f32 %v11102_v62, %v5464_v43 }
 0x49e   : > { %v10619_v19 = vpop.eup %8669  ;;  %8683 = vrcp.f32 %v5738_v37  ;;  %v5956_v36 = vpack.c.bf16 %v5902_v57, %v5901_v33  ;;  %6487 = vst [vmem:[%s10480_s7 + $0x98] sm:$0xff] %v5902_v57 }
 0x49f   : > { %v8672_v38 = vpop.eup %8671  ;;  %v5655_v5 = vmul.f32 1.442695, %v5545_v24  ;;  %5775 = vadd.xlane.f32.xlu0 %v10619_v19 }
 0x4a0   : > { %6110 = vmatmul.mubr.bf16.gmra.mxu1 %v5956_v36  ;;  %v5466_v58 = vpop.xlane.xlu1 %5465  ;;  %v5903_v31 = vmul.f32 %v8672_v38, %v11103_v13 }
 0x4a1   : > { %8685 = vpow2.f32 %v5655_v5  ;;  %v5546_v2 = vsub.f32 %v11104_v25, %v5466_v58  ;;  %6119 = vmatprep.mubr.bf16.mxu1 %v11095_v10 }
 0x4a2   : > { %v10626_v4 = vpop.eup %8673  ;;  %6488 = vst [vmem:[%s10480_s7 + $0xa0] sm:$0xff] %v5903_v31 }
 0x4a3   : > { %v8676_v48 = vpop.eup %8675  ;;  %v5657_v18 = vmul.f32 1.442695, %v5546_v2  ;;  %5777 = vadd.xlane.f32.xlu1 %v10626_v4 }
 0x4a4   : > { %v5904_v1 = vmul.f32 %v8676_v48, %v11105_v55 }
 0x4a5   : > { %8687 = vpow2.f32 %v5657_v18 }
 0x4a6   : > { %v10631_v61 = vpop.eup %8677  ;;  %v5957_v32 = vpack.c.bf16 %v5904_v1, %v5903_v31  ;;  %6489 = vst [vmem:[%s10480_s7 + $0xa8] sm:$0xff] %v5904_v1 }
 0x4a7   : > { %v8680_v41 = vpop.eup %8679  ;;  %5779 = vadd.xlane.f32.xlu0 %v10631_v61 }
 0x4a8   : > { %6120 = vmatmul.mubr.bf16.gmra.mxu1 %v5957_v32  ;;  %v5905_v33 = vmul.f32 %v8680_v41, %v11106_v56 }
 0x4a9   : > { %6129 = vmatprep.mubr.bf16.mxu1 %v11095_v10 }
 0x4aa   : > { %v10637_v45 = vpop.eup %8681  ;;  %6490 = vst [vmem:[%s10480_s7 + $0xb0] sm:$0xff] %v5905_v33 }
 0x4ab   : > { %v8684_v35 = vpop.eup %8683  ;;  %5781 = vadd.xlane.f32.xlu1 %v10637_v45 }
 0x4ac   : > { %v5906_v23 = vmul.f32 %v8684_v35, %v11107_v40 }
 0x4ae   : > { %v10642_v37 = vpop.eup %8685  ;;  %v5958_v43 = vpack.c.bf16 %v5906_v23, %v5905_v33  ;;  %6491 = vst [vmem:[%s10480_s7 + $0xb8] sm:$0xff] %v5906_v23 }
 0x4af   : > { %5783 = vadd.xlane.f32.xlu0 %v10642_v37 }
 0x4b0   : > { %6130 = vmatmul.mubr.bf16.gmra.mxu1 %v5958_v43 }
 0x4b1   : > { %6139 = vmatprep.mubr.bf16.mxu1 %v11095_v10 }
 0x4b2   : > { %v10647_v51 = vpop.eup %8687 }
 0x4b3   : > { %5785 = vadd.xlane.f32.xlu1 %v10647_v51 }
 0x4e0   : > { %v5740_v57 = vpop.xlane.xlu0 %5739 }
 0x4e1   : > { %8689 = vrcp.f32 %v5740_v57 }
 0x4e4   : > { %v5742_v62 = vpop.xlane.xlu1 %5741  ;;  %v5468_v24 = vpop.xlane.xlu0 %5467 }
 0x4e5   : > { %8691 = vrcp.f32 %v5742_v62  ;;  %v5547_v36 = vsub.f32 %v10371_v42, %v5468_v24 }
 0x4e7   : > { %v5659_v38 = vmul.f32 1.442695, %v5547_v36 }
 0x4e8   : > { %v5744_v5 = vpop.xlane.xlu0 %5743  ;;  %v5470_v58 = vpop.xlane.xlu1 %5469 }
 0x4e9   : > { %8693 = vpow2.f32 %v5659_v38  ;;  %v5548_v13 = vsub.f32 %v10379_v15, %v5470_v58 }
 0x4ea   : > { %8695 = vrcp.f32 %v5744_v5 }
 0x4eb   : > { %v5661_v31 = vmul.f32 1.442695, %v5548_v13 }
 0x4ec   : > { %v5746_v25 = vpop.xlane.xlu1 %5745  ;;  %v5472_v2 = vpop.xlane.xlu0 %5471 }
 0x4ed   : > { %8697 = vpow2.f32 %v5661_v31  ;;  %v5549_v48 = vsub.f32 %v10386_v59, %v5472_v2 }
 0x4ee   : > { %v8690_v18 = vpop.eup %8689  ;;  %8699 = vrcp.f32 %v5746_v25 }
 0x4ef   : > { %v5663_v55 = vmul.f32 1.442695, %v5549_v48  ;;  %v5907_v42 = vmul.f32 %v8690_v18, %v10487_v50 }
 0x4f0   : > { %v5748_v1 = vpop.xlane.xlu0 %5747  ;;  %v5474_v32 = vpop.xlane.xlu1 %5473 }
 0x4f1   : > { %8701 = vpow2.f32 %v5663_v55  ;;  %v5550_v41 = vsub.f32 %v10393_v60, %v5474_v32  ;;  %6492 = vst [vmem:[%s10480_s7 + $0xc0] sm:$0xff] %v5907_v42 }
 0x4f2   : > { %v8692_v15 = vpop.eup %8691  ;;  %8703 = vrcp.f32 %v5748_v1 }
 0x4f3   : > { %v5665_v56 = vmul.f32 1.442695, %v5550_v41  ;;  %v5908_v33 = vmul.f32 %v8692_v15, %v10493_v26 }
 0x4f4   : > { %v5750_v35 = vpop.xlane.xlu1 %5749  ;;  %v5476_v40 = vpop.xlane.xlu0 %5475 }
 0x4f5   : > { %8705 = vpow2.f32 %v5665_v56  ;;  %v5551_v59 = vsub.f32 %v10400_v11, %v5476_v40  ;;  %v5959_v23 = vpack.c.bf16 %v5908_v33, %v5907_v42  ;;  %6493 = vst [vmem:[%s10480_s7 + $0xc8] sm:$0xff] %v5908_v33 }
 0x4f6   : > { %v10659_v50 = vpop.eup %8693  ;;  %8707 = vrcp.f32 %v5750_v35 }
 0x4f7   : > { %v8696_v43 = vpop.eup %8695  ;;  %v5667_v57 = vmul.f32 1.442695, %v5551_v59  ;;  %6140 = vmatmul.mubr.bf16.gmra.mxu1 %v5959_v23  ;;  %5787 = vadd.xlane.f32.xlu0 %v10659_v50 }
 0x4f8   : > { %v5752_v60 = vpop.xlane.xlu0 %5751  ;;  %v5478_v62 = vpop.xlane.xlu1 %5477  ;;  %6149 = vmatprep.mubr.bf16.mxu1 %v11095_v10  ;;  %v5909_v26 = vmul.f32 %v8696_v43, %v10500_v22 }
 0x4f9   : > { %8709 = vpow2.f32 %v5667_v57  ;;  %v5552_v11 = vsub.f32 %v10407_v52, %v5478_v62 }
 0x4fa   : > { %v10665_v24 = vpop.eup %8697  ;;  %8711 = vrcp.f32 %v5752_v60  ;;  %6494 = vst [vmem:[%s10480_s7 + $0xd0] sm:$0xff] %v5909_v26 }
 0x4fb   : > { %v8700_v36 = vpop.eup %8699  ;;  %v5669_v38 = vmul.f32 1.442695, %v5552_v11  ;;  %5789 = vadd.xlane.f32.xlu1 %v10665_v24 }
 0x4fc   : > { %v5754_v5 = vpop.xlane.xlu1 %5753  ;;  %v5480_v58 = vpop.xlane.xlu0 %5479  ;;  %v5910_v13 = vmul.f32 %v8700_v36, %v10508_v21 }
 0x4fd   : > { %8713 = vpow2.f32 %v5669_v38  ;;  %v5553_v31 = vsub.f32 %v10414_v6, %v5480_v58 }
 0x4fe   : > { %v10671_v22 = vpop.eup %8701  ;;  %8715 = vrcp.f32 %v5754_v5  ;;  %v5960_v52 = vpack.c.bf16 %v5910_v13, %v5909_v26  ;;  %6495 = vst [vmem:[%s10480_s7 + $0xd8] sm:$0xff] %v5910_v13 }
 0x4ff   : > { %v8704_v25 = vpop.eup %8703  ;;  %v5671_v2 = vmul.f32 1.442695, %v5553_v31  ;;  %5791 = vadd.xlane.f32.xlu0 %v10671_v22 }
 0x500   : > { %6150 = vmatmul.mubr.bf16.gmra.mxu1 %v5960_v52  ;;  %v5756_v48 = vpop.xlane.xlu0 %5755  ;;  %v5482_v18 = vpop.xlane.xlu1 %5481  ;;  %v5911_v55 = vmul.f32 %v8704_v25, %v10515_v44 }
 0x501   : > { %8717 = vpow2.f32 %v5671_v2  ;;  %v5554_v21 = vsub.f32 %v10421_v0, %v5482_v18  ;;  %6159 = vmatprep.mubr.bf16.mxu1 %v11095_v10 }
 0x502   : > { %v10678_v6 = vpop.eup %8705  ;;  %8719 = vrcp.f32 %v5756_v48  ;;  %6496 = vst [vmem:[%s10480_s7 + $0xe0] sm:$0xff] %v5911_v55 }
 0x503   : > { %v8708_v42 = vpop.eup %8707  ;;  %v5673_v1 = vmul.f32 1.442695, %v5554_v21  ;;  %5793 = vadd.xlane.f32.xlu1 %v10678_v6 }
 0x504   : > { %v5758_v32 = vpop.xlane.xlu1 %5757  ;;  %v5484_v41 = vpop.xlane.xlu0 %5483  ;;  %v5912_v15 = vmul.f32 %v8708_v42, %v10523_v49 }
 0x505   : > { %8721 = vpow2.f32 %v5673_v1  ;;  %v5555_v44 = vsub.f32 %v10428_v54, %v5484_v41 }
 0x506   : > { %v10684_v56 = vpop.eup %8709  ;;  %8723 = vrcp.f32 %v5758_v32  ;;  %v5961_v0 = vpack.c.bf16 %v5912_v15, %v5911_v55  ;;  %6497 = vst [vmem:[%s10480_s7 + $0xe8] sm:$0xff] %v5912_v15 }
 0x507   : > { %v8712_v33 = vpop.eup %8711  ;;  %v5675_v35 = vmul.f32 1.442695, %v5555_v44  ;;  %5795 = vadd.xlane.f32.xlu0 %v10684_v56 }
 0x508   : > { %6160 = vmatmul.mubr.bf16.gmra.mxu1 %v5961_v0  ;;  %v5760_v40 = vpop.xlane.xlu0 %5759  ;;  %v5486_v59 = vpop.xlane.xlu1 %5485  ;;  %v5913_v23 = vmul.f32 %v8712_v33, %v10530_v63 }
 0x509   : > { %8725 = vpow2.f32 %v5675_v35  ;;  %v5556_v49 = vsub.f32 %v10435_v29, %v5486_v59  ;;  %6169 = vmatprep.mubr.bf16.mxu1 %v11095_v10 }
 0x50a   : > { %v10691_v54 = vpop.eup %8713  ;;  %8727 = vrcp.f32 %v5760_v40  ;;  %6498 = vst [vmem:[%s10480_s7 + $0xf0] sm:$0xff] %v5913_v23 }
 0x50b   : > { %v8716_v43 = vpop.eup %8715  ;;  %v5677_v57 = vmul.f32 1.442695, %v5556_v49  ;;  %5797 = vadd.xlane.f32.xlu1 %v10691_v54 }
 0x50c   : > { %v5762_v60 = vpop.xlane.xlu1 %5761  ;;  %v5488_v62 = vpop.xlane.xlu0 %5487  ;;  %v5914_v26 = vmul.f32 %v8716_v43, %v10538_v17 }
 0x50d   : > { %8729 = vpow2.f32 %v5677_v57  ;;  %v5557_v63 = vsub.f32 %v10442_v53, %v5488_v62 }
 0x50e   : > { %v10697_v11 = vpop.eup %8717  ;;  %8731 = vrcp.f32 %v5762_v60  ;;  %v5962_v29 = vpack.c.bf16 %v5914_v26, %v5913_v23  ;;  %6499 = vst [vmem:[%s10480_s7 + $0xf8] sm:$0xff] %v5914_v26 }
 0x50f   : > { %v8720_v36 = vpop.eup %8719  ;;  %v5679_v38 = vmul.f32 1.442695, %v5557_v63  ;;  %5799 = vadd.xlane.f32.xlu0 %v10697_v11 }
 0x510   : > { %6170 = vmatmul.mubr.bf16.gmra.mxu1 %v5962_v29  ;;  %v5764_v5 = vpop.xlane.xlu0 %5763  ;;  %v5490_v58 = vpop.xlane.xlu1 %5489  ;;  %v5915_v13 = vmul.f32 %v8720_v36, %v10545_v28 }
 0x511   : > { %8733 = vpow2.f32 %v5679_v38  ;;  %v5558_v17 = vsub.f32 %v10448_v7, %v5490_v58  ;;  %6179 = vmatprep.mubr.bf16.mxu1 %v11095_v10 }
 0x512   : > { %v10704_v53 = vpop.eup %8721  ;;  %8735 = vrcp.f32 %v5764_v5  ;;  %6500 = vst [vmem:[%s10480_s7 + $0x100] sm:$0xff] %v5915_v13 }
 0x513   : > { %v8724_v31 = vpop.eup %8723  ;;  %v5681_v52 = vmul.f32 1.442695, %v5558_v17  ;;  %5801 = vadd.xlane.f32.xlu1 %v10704_v53 }
 0x514   : > { %v5766_v25 = vpop.xlane.xlu1 %5765  ;;  %v5492_v2 = vpop.xlane.xlu0 %5491  ;;  %v5916_v48 = vmul.f32 %v8724_v31, %v10553_v3 }
 0x515   : > { %8737 = vpow2.f32 %v5681_v52  ;;  %v5559_v28 = vsub.f32 %v10454_v34, %v5492_v2 }
 0x516   : > { %v10716_v7 = vpop.eup %8725  ;;  %8739 = vrcp.f32 %v5766_v25  ;;  %v5963_v18 = vpack.c.bf16 %v5916_v48, %v5915_v13  ;;  %6501 = vst [vmem:[%s10480_s7 + $0x108] sm:$0xff] %v5916_v48 }
 0x517   : > { %v8728_v55 = vpop.eup %8727  ;;  %v5683_v21 = vmul.f32 1.442695, %v5559_v28  ;;  %v6021_v42 = vpop.f32.mrf.mxu1  ;;  %5803 = vadd.xlane.f32.xlu0 %v10716_v7 }
 0x518   : > { %6340 = vst [vmem:[%s10714_s12] sm:$0xff] %v6021_v42  ;;  %6180 = vmatmul.mubr.bf16.gmra.mxu1 %v5963_v18  ;;  %v5768_v34 = vpop.xlane.xlu0 %5767  ;;  %v5494_v3 = vpop.xlane.xlu1 %5493  ;;  %v5917_v1 = vmul.f32 %v8728_v55, %v10560_v9 }
 0x519   : > { %8741 = vpow2.f32 %v5683_v21  ;;  %v5560_v32 = vsub.f32 %v10460_v39, %v5494_v3  ;;  %v6023_v41 = vpop.f32.mrf.mxu1  ;;  %6189 = vmatprep.mubr.bf16.mxu1 %v11095_v10 }
 0x51a   : > { %v10724_v15 = vpop.eup %8729  ;;  %8743 = vrcp.f32 %v5768_v34  ;;  %6341 = vst.msk [vmem:[%s10714_s12 + $0x8] sm:$0xff] %vm853_vm0, %v6023_v41  ;;  %6502 = vst [vmem:[%s10480_s7 + $0x110] sm:$0xff] %v5917_v1 }
 0x51b   : > { %v8732_v44 = vpop.eup %8731  ;;  %v5685_v0 = vmul.f32 1.442695, %v5560_v32  ;;  %v6025_v33 = vpop.f32.mrf.mxu1  ;;  %5805 = vadd.xlane.f32.xlu1 %v10724_v15 }
 0x51c   : > { %6342 = vst [vmem:[%s10714_s12 + $0x10] sm:$0xff] %v6025_v33  ;;  %v5770_v9 = vpop.xlane.xlu1 %5769  ;;  %v5496_v35 = vpop.xlane.xlu0 %5495  ;;  %v5918_v39 = vmul.f32 %v8732_v44, %v10568_v46 }
 0x51d   : > { %8745 = vpow2.f32 %v5685_v0  ;;  %v5561_v40 = vsub.f32 %v10466_v16, %v5496_v35  ;;  %v6027_v59 = vpop.f32.mrf.mxu1 }
 0x51e   : > { %v10733_v23 = vpop.eup %8733  ;;  %8747 = vrcp.f32 %v5770_v9  ;;  %6343 = vst.msk [vmem:[%s10714_s12 + $0x18] sm:$0xff] %vm853_vm0, %v6027_v59  ;;  %v5964_v49 = vpack.c.bf16 %v5918_v39, %v5917_v1  ;;  %6503 = vst [vmem:[%s10480_s7 + $0x118] sm:$0xff] %v5918_v39 }
 0x51f   : > { %v8736_v43 = vpop.eup %8735  ;;  %v5687_v57 = vmul.f32 1.442695, %v5561_v40  ;;  %5807 = vadd.xlane.f32.xlu0 %v10733_v23 }
 0x520   : > { %v6031_v60 = vpop.f32.mrf.mxu1  ;;  %6190 = vmatmul.mubr.bf16.gmra.mxu1 %v5964_v49  ;;  %v5772_v46 = vpop.xlane.xlu0 %5771  ;;  %v5919_v62 = vmul.f32 %v8736_v43, %v10575_v20 }
 0x521   : > { %8749 = vpow2.f32 %v5687_v57  ;;  %6344 = vst [vmem:[%s10714_s12 + $0x20] sm:$0xff] %v6031_v60  ;;  %v5498_v16 = vpop.xlane.xlu1 %5497  ;;  %6199 = vmatprep.mubr.bf16.mxu1 %v11095_v10 }
 0x522   : > { %v10742_v26 = vpop.eup %8737  ;;  %8751 = vrcp.f32 %v5772_v46  ;;  %v5562_v63 = vsub.f32 %v11098_v12, %v5498_v16  ;;  %v6033_v29 = vpop.f32.mrf.mxu1  ;;  %6504 = vst [vmem:[%s10480_s7 + $0x120] sm:$0xff] %v5919_v62 }
 0x523   : > { %v8740_v36 = vpop.eup %8739  ;;  %6345 = vst.msk [vmem:[%s10714_s12 + $0x28] sm:$0xff] %vm853_vm0, %v6033_v29  ;;  %5809 = vadd.xlane.f32.xlu1 %v10742_v26 }
 0x524   : > { %v5689_v20 = vmul.f32 1.442695, %v5562_v63  ;;  %v6035_v38 = vpop.f32.mrf.mxu1  ;;  %v5920_v5 = vmul.f32 %v8740_v36, %v10583_v30 }
 0x525   : > { %6346 = vst [vmem:[%s10714_s12 + $0x30] sm:$0xff] %v6035_v38  ;;  %v5774_v58 = vpop.xlane.xlu1 %5773 }
 0x526   : > { %v10751_v13 = vpop.eup %8741  ;;  %8753 = vpow2.f32 %v5689_v20  ;;  %v6037_v17 = vpop.f32.mrf.mxu1  ;;  %v5965_v12 = vpack.c.bf16 %v5920_v5, %v5919_v62  ;;  %6505 = vst [vmem:[%s10480_s7 + $0x128] sm:$0xff] %v5920_v5 }
 0x527   : > { %v8744_v31 = vpop.eup %8743  ;;  %8755 = vrcp.f32 %v5774_v58  ;;  %6347 = vst.msk [vmem:[%s10714_s12 + $0x38] sm:$0xff] %vm853_vm0, %v6037_v17  ;;  %5811 = vadd.xlane.f32.xlu0 %v10751_v13 }
 0x528   : > { %v6041_v52 = vpop.f32.mrf.mxu1  ;;  %6200 = vmatmul.mubr.bf16.gmra.mxu1 %v5965_v12  ;;  %v5776_v30 = vpop.xlane.xlu0 %5775  ;;  %v5921_v25 = vmul.f32 %v8744_v31, %v10590_v14 }
 0x529   : > { %6348 = vst [vmem:[%s10714_s12 + $0x40] sm:$0xff] %v6041_v52  ;;  %8757 = vrcp.f32 %v5776_v30  ;;  %6209 = vmatprep.mubr.bf16.mxu1 %v11095_v10 }
 0x52a   : > { %v10760_v2 = vpop.eup %8745  ;;  %v6043_v48 = vpop.f32.mrf.mxu1  ;;  %6506 = vst [vmem:[%s10480_s7 + $0x130] sm:$0xff] %v5921_v25 }
 0x52b   : > { %v8748_v28 = vpop.eup %8747  ;;  %6349 = vst.msk [vmem:[%s10714_s12 + $0x48] sm:$0xff] %vm853_vm0, %v6043_v48  ;;  %5813 = vadd.xlane.f32.xlu1 %v10760_v2 }
 0x52c   : > { %v6045_v18 = vpop.f32.mrf.mxu1  ;;  %v5778_v55 = vpop.xlane.xlu1 %5777  ;;  %v5922_v14 = vmul.f32 %v8748_v28, %v10598_v47 }
 0x52d   : > { %6350 = vst [vmem:[%s10714_s12 + $0x50] sm:$0xff] %v6045_v18  ;;  %8759 = vrcp.f32 %v5778_v55 }
 0x52e   : > { %v10768_v21 = vpop.eup %8749  ;;  %v6047_v42 = vpop.f32.mrf.mxu1  ;;  %v5966_v34 = vpack.c.bf16 %v5922_v14, %v5921_v25  ;;  %6507 = vst [vmem:[%s10480_s7 + $0x138] sm:$0xff] %v5922_v14 }
 0x52f   : > { %v8752_v3 = vpop.eup %8751  ;;  %6351 = vst.msk [vmem:[%s10714_s12 + $0x58] sm:$0xff] %vm853_vm0, %v6047_v42  ;;  %5815 = vadd.xlane.f32.xlu0 %v10768_v21 }
 0x530   : > { %v6051_v1 = vpop.f32.mrf.mxu1  ;;  %6210 = vmatmul.mubr.bf16.gmra.mxu1 %v5966_v34  ;;  %v5780_v32 = vpop.xlane.xlu0 %5779  ;;  %v5923_v47 = vmul.f32 %v8752_v3, %v10605_v8 }
 0x531   : > { %6352 = vst [vmem:[%s10714_s12 + $0x60] sm:$0xff] %v6051_v1  ;;  %8761 = vrcp.f32 %v5780_v32  ;;  %6219 = vmatprep.mubr.bf16.mxu1 %v11095_v10 }
 0x532   : > { %v6053_v41 = vpop.f32.mrf.mxu1  ;;  %6508 = vst [vmem:[%s10480_s7 + $0x140] sm:$0xff] %v5923_v47 }
 0x533   : > { %v10778_v44 = vpop.eup %8753  ;;  %6353 = vst.msk [vmem:[%s10714_s12 + $0x68] sm:$0xff] %vm853_vm0, %v6053_v41 }
 0x534   : > { %v8756_v0 = vpop.eup %8755  ;;  %v6055_v33 = vpop.f32.mrf.mxu1  ;;  %5817 = vadd.xlane.f32.xlu1 %v10778_v44 }
 0x535   : > { %v5782_v9 = vpop.xlane.xlu1 %5781  ;;  %6354 = vst [vmem:[%s10714_s12 + $0x70] sm:$0xff] %v6055_v33  ;;  %v5924_v8 = vmul.f32 %v8756_v0, %v10613_v27 }
 0x536   : > { %8763 = vrcp.f32 %v5782_v9  ;;  %v8758_v35 = vpop.eup %8757  ;;  %v6057_v39 = vpop.f32.mrf.mxu1 }
 0x537   : > { %6355 = vst.msk [vmem:[%s10714_s12 + $0x78] sm:$0xff] %vm853_vm0, %v6057_v39  ;;  %v5967_v40 = vpack.c.bf16 %v5924_v8, %v5923_v47  ;;  %6509 = vst [vmem:[%s10480_s7 + $0x148] sm:$0xff] %v5924_v8  ;;  %v5925_v59 = vmul.f32 %v8758_v35, %v10619_v19 }
 0x538   : > { %v6061_v49 = vpop.f32.mrf.mxu1  ;;  %v5784_v43 = vpop.xlane.xlu0 %5783 }
 0x539   : > { %6356 = vst [vmem:[%s10714_s12 + $0x80] sm:$0xff] %v6061_v49  ;;  %6220 = vmatmul.mubr.bf16.gmra.mxu1 %v5967_v40  ;;  %8765 = vrcp.f32 %v5784_v43  ;;  %6510 = vst [vmem:[%s10480_s7 + $0x150] sm:$0xff] %v5925_v59 }
 0x53a   : > { %v8760_v57 = vpop.eup %8759  ;;  %v6063_v27 = vpop.f32.mrf.mxu1  ;;  %6229 = vmatprep.mubr.bf16.mxu1 %v11095_v10 }
 0x53b   : > { %6357 = vst.msk [vmem:[%s10714_s12 + $0x88] sm:$0xff] %vm853_vm0, %v6063_v27  ;;  %v5926_v60 = vmul.f32 %v8760_v57, %v10626_v4 }
 0x53c   : > { %v6065_v46 = vpop.f32.mrf.mxu1  ;;  %v5786_v19 = vpop.xlane.xlu1 %5785 }
 0x53d   : > { %6358 = vst [vmem:[%s10714_s12 + $0x90] sm:$0xff] %v6065_v46  ;;  %8767 = vrcp.f32 %v5786_v19  ;;  %v5968_v62 = vpack.c.bf16 %v5926_v60, %v5925_v59  ;;  %6511 = vst [vmem:[%s10480_s7 + $0x158] sm:$0xff] %v5926_v60 }
 0x53e   : > { %v8762_v16 = vpop.eup %8761  ;;  %v6067_v63 = vpop.f32.mrf.mxu1 }
 0x53f   : > { %6359 = vst.msk [vmem:[%s10714_s12 + $0x98] sm:$0xff] %vm853_vm0, %v6067_v63  ;;  %v5927_v29 = vmul.f32 %v8762_v16, %v10631_v61 }
 0x540   : > { %v6071_v36 = vpop.f32.mrf.mxu1 }
 0x541   : > { %6360 = vst [vmem:[%s10714_s12 + $0xa0] sm:$0xff] %v6071_v36  ;;  %6230 = vmatmul.mubr.bf16.gmra.mxu1 %v5968_v62  ;;  %6512 = vst [vmem:[%s10480_s7 + $0x160] sm:$0xff] %v5927_v29 }
 0x542   : > { %v6073_v20 = vpop.f32.mrf.mxu1  ;;  %6239 = vmatprep.mubr.bf16.mxu1 %v11095_v10 }
 0x543   : > { %v8764_v4 = vpop.eup %8763  ;;  %6361 = vst.msk [vmem:[%s10714_s12 + $0xa8] sm:$0xff] %vm853_vm0, %v6073_v20 }
 0x544   : > { %v5928_v38 = vmul.f32 %v8764_v4, %v10637_v45  ;;  %v6075_v5 = vpop.f32.mrf.mxu1 }
 0x545   : > { %6362 = vst [vmem:[%s10714_s12 + $0xb0] sm:$0xff] %v6075_v5 }
 0x546   : > { %v5969_v58 = vpack.c.bf16 %v5928_v38, %v5927_v29  ;;  %6513 = vst [vmem:[%s10480_s7 + $0x168] sm:$0xff] %v5928_v38  ;;  %v8766_v61 = vpop.eup %8765  ;;  %v6077_v17 = vpop.f32.mrf.mxu1 }
 0x547   : > { %6363 = vst.msk [vmem:[%s10714_s12 + $0xb8] sm:$0xff] %vm853_vm0, %v6077_v17  ;;  %v5929_v12 = vmul.f32 %v8766_v61, %v10642_v37 }
 0x548   : > { %v6081_v31 = vpop.f32.mrf.mxu1 }
 0x549   : > { %6364 = vst [vmem:[%s10714_s12 + $0xc0] sm:$0xff] %v6081_v31  ;;  %6240 = vmatmul.mubr.bf16.gmra.mxu1 %v5969_v58  ;;  %6514 = vst [vmem:[%s10480_s7 + $0x170] sm:$0xff] %v5929_v12 }
 0x54a   : > { %v8768_v45 = vpop.eup %8767  ;;  %v6083_v52 = vpop.f32.mrf.mxu1  ;;  %6249 = vmatprep.mubr.bf16.mxu1 %v11095_v10 }
 0x54b   : > { %6365 = vst.msk [vmem:[%s10714_s12 + $0xc8] sm:$0xff] %vm853_vm0, %v6083_v52  ;;  %v5930_v30 = vmul.f32 %v8768_v45, %v10647_v51 }
 0x54c   : > { %v6085_v25 = vpop.f32.mrf.mxu1 }
 0x54d   : > { %6366 = vst [vmem:[%s10714_s12 + $0xd0] sm:$0xff] %v6085_v25  ;;  %v5970_v37 = vpack.c.bf16 %v5930_v30, %v5929_v12  ;;  %6515 = vst [vmem:[%s10480_s7 + $0x178] sm:$0xff] %v5930_v30 }
 0x54e   : > { %v6087_v48 = vpop.f32.mrf.mxu1 }
 0x54f   : > { %6367 = vst.msk [vmem:[%s10714_s12 + $0xd8] sm:$0xff] %vm853_vm0, %v6087_v48 }
 0x550   : > { %v6091_v28 = vpop.f32.mrf.mxu1 }
 0x551   : > { %6368 = vst [vmem:[%s10714_s12 + $0xe0] sm:$0xff] %v6091_v28  ;;  %6250 = vmatmul.mubr.bf16.gmra.mxu1 %v5970_v37 }
 0x552   : > { %v6093_v18 = vpop.f32.mrf.mxu1  ;;  %6259 = vmatprep.mubr.bf16.mxu1 %v11095_v10 }
 0x553   : > { %6369 = vst.msk [vmem:[%s10714_s12 + $0xe8] sm:$0xff] %vm853_vm0, %v6093_v18 }
 0x554   : > { %v6095_v51 = vpop.f32.mrf.mxu1 }
 0x555   : > { %6370 = vst [vmem:[%s10714_s12 + $0xf0] sm:$0xff] %v6095_v51 }
 0x556   : > { %v6097_v55 = vpop.f32.mrf.mxu1 }
 0x557   : > { %6371 = vst.msk [vmem:[%s10714_s12 + $0xf8] sm:$0xff] %vm853_vm0, %v6097_v55 }
 0x558   : > { %v6101_v14 = vpop.f32.mrf.mxu1 }
 0x559   : > { %6372 = vst [vmem:[%s10714_s12 + $0x100] sm:$0xff] %v6101_v14 }
 0x55a   : > { %v6103_v42 = vpop.f32.mrf.mxu1 }
 0x55b   : > { %6373 = vst.msk [vmem:[%s10714_s12 + $0x108] sm:$0xff] %vm853_vm0, %v6103_v42 }
 0x55c   : > { %v6105_v34 = vpop.f32.mrf.mxu1 }
 0x55d   : > { %6374 = vst [vmem:[%s10714_s12 + $0x110] sm:$0xff] %v6105_v34 }
 0x55e   : > { %v6107_v3 = vpop.f32.mrf.mxu1 }
 0x55f   : > { %6375 = vst.msk [vmem:[%s10714_s12 + $0x118] sm:$0xff] %vm853_vm0, %v6107_v3 }
 0x560   : > { %v6111_v1 = vpop.f32.mrf.mxu1 }
 0x561   : > { %6376 = vst [vmem:[%s10714_s12 + $0x120] sm:$0xff] %v6111_v1 }
 0x562   : > { %v6113_v32 = vpop.f32.mrf.mxu1 }
 0x563   : > { %6377 = vst.msk [vmem:[%s10714_s12 + $0x128] sm:$0xff] %vm853_vm0, %v6113_v32 }
 0x564   : > { %v6115_v47 = vpop.f32.mrf.mxu1 }
 0x565   : > { %6378 = vst [vmem:[%s10714_s12 + $0x130] sm:$0xff] %v6115_v47 }
 0x566   : > { %v6117_v41 = vpop.f32.mrf.mxu1 }
 0x567   : > { %6379 = vst.msk [vmem:[%s10714_s12 + $0x138] sm:$0xff] %vm853_vm0, %v6117_v41 }
 0x568   : > { %v6121_v0 = vpop.f32.mrf.mxu1 }
 0x569   : > { %6380 = vst [vmem:[%s10714_s12 + $0x140] sm:$0xff] %v6121_v0 }
 0x56a   : > { %v6123_v33 = vpop.f32.mrf.mxu1 }
 0x56b   : > { %6381 = vst.msk [vmem:[%s10714_s12 + $0x148] sm:$0xff] %vm853_vm0, %v6123_v33 }
 0x56c   : > { %v6125_v9 = vpop.f32.mrf.mxu1 }
 0x56d   : > { %6382 = vst [vmem:[%s10714_s12 + $0x150] sm:$0xff] %v6125_v9 }
 0x56e   : > { %v6127_v8 = vpop.f32.mrf.mxu1 }
 0x56f   : > { %6383 = vst.msk [vmem:[%s10714_s12 + $0x158] sm:$0xff] %vm853_vm0, %v6127_v8 }
 0x570   : > { %v6131_v35 = vpop.f32.mrf.mxu1 }
 0x571   : > { %6384 = vst [vmem:[%s10714_s12 + $0x160] sm:$0xff] %v6131_v35 }
 0x572   : > { %v6133_v39 = vpop.f32.mrf.mxu1 }
 0x573   : > { %6385 = vst.msk [vmem:[%s10714_s12 + $0x168] sm:$0xff] %vm853_vm0, %v6133_v39 }
 0x574   : > { %v6135_v40 = vpop.f32.mrf.mxu1 }
 0x575   : > { %6386 = vst [vmem:[%s10714_s12 + $0x170] sm:$0xff] %v6135_v40 }
 0x576   : > { %v6137_v59 = vpop.f32.mrf.mxu1 }
 0x577   : > { %6387 = vst.msk [vmem:[%s10714_s12 + $0x178] sm:$0xff] %vm853_vm0, %v6137_v59 }
 0x580   : > { %v5788_v49 = vpop.xlane.xlu0 %5787 }
 0x581   : > { %8769 = vrcp.f32 %v5788_v49 }
 0x584   : > { %v5790_v43 = vpop.xlane.xlu1 %5789 }
 0x585   : > { %8771 = vrcp.f32 %v5790_v43 }
 0x588   : > { %v5792_v57 = vpop.xlane.xlu0 %5791 }
 0x589   : > { %8773 = vrcp.f32 %v5792_v57 }
 0x58c   : > { %v5794_v27 = vpop.xlane.xlu1 %5793 }
 0x58d   : > { %8775 = vrcp.f32 %v5794_v27 }
 0x58e   : > { %v8770_v60 = vpop.eup %8769 }
 0x58f   : > { %v5931_v46 = vmul.f32 %v8770_v60, %v10659_v50 }
 0x590   : > { %v5796_v19 = vpop.xlane.xlu0 %5795 }
 0x591   : > { %8777 = vrcp.f32 %v5796_v19  ;;  %6516 = vst [vmem:[%s10480_s7 + $0x180] sm:$0xff] %v5931_v46 }
 0x592   : > { %v8772_v62 = vpop.eup %8771 }
 0x593   : > { %v5932_v16 = vmul.f32 %v8772_v62, %v10665_v24 }
 0x594   : > { %v5798_v63 = vpop.xlane.xlu1 %5797 }
 0x595   : > { %8779 = vrcp.f32 %v5798_v63  ;;  %v5971_v29 = vpack.c.bf16 %v5932_v16, %v5931_v46  ;;  %6517 = vst [vmem:[%s10480_s7 + $0x188] sm:$0xff] %v5932_v16 }
 0x596   : > { %v8774_v36 = vpop.eup %8773 }
 0x597   : > { %6260 = vmatmul.mubr.bf16.gmra.mxu1 %v5971_v29  ;;  %v5933_v4 = vmul.f32 %v8774_v36, %v10671_v22 }
 0x598   : > { %v5800_v20 = vpop.xlane.xlu0 %5799  ;;  %6269 = vmatprep.mubr.bf16.mxu1 %v11095_v10 }
 0x599   : > { %8781 = vrcp.f32 %v5800_v20  ;;  %6518 = vst [vmem:[%s10480_s7 + $0x190] sm:$0xff] %v5933_v4 }
 0x59a   : > { %v8776_v50 = vpop.eup %8775 }
 0x59b   : > { %v5934_v38 = vmul.f32 %v8776_v50, %v10678_v6 }
 0x59c   : > { %v5802_v5 = vpop.xlane.xlu1 %5801 }
 0x59d   : > { %8783 = vrcp.f32 %v5802_v5  ;;  %v5972_v24 = vpack.c.bf16 %v5934_v38, %v5933_v4  ;;  %6519 = vst [vmem:[%s10480_s7 + $0x198] sm:$0xff] %v5934_v38 }
 0x59e   : > { %v8778_v58 = vpop.eup %8777 }
 0x59f   : > { %6270 = vmatmul.mubr.bf16.gmra.mxu1 %v5972_v24  ;;  %v5935_v61 = vmul.f32 %v8778_v58, %v10684_v56 }
 0x5a0   : > { %v5804_v17 = vpop.xlane.xlu0 %5803  ;;  %6279 = vmatprep.mubr.bf16.mxu1 %v11095_v10 }
 0x5a1   : > { %8785 = vrcp.f32 %v5804_v17  ;;  %6520 = vst [vmem:[%s10480_s7 + $0x1a0] sm:$0xff] %v5935_v61 }
 0x5a2   : > { %v8780_v22 = vpop.eup %8779 }
 0x5a3   : > { %v5936_v12 = vmul.f32 %v8780_v22, %v10691_v54 }
 0x5a4   : > { %v5806_v31 = vpop.xlane.xlu1 %5805 }
 0x5a5   : > { %8787 = vrcp.f32 %v5806_v31  ;;  %v5973_v6 = vpack.c.bf16 %v5936_v12, %v5935_v61  ;;  %6521 = vst [vmem:[%s10480_s7 + $0x1a8] sm:$0xff] %v5936_v12 }
 0x5a6   : > { %v8782_v45 = vpop.eup %8781 }
 0x5a7   : > { %6280 = vmatmul.mubr.bf16.gmra.mxu1 %v5973_v6  ;;  %v5937_v52 = vmul.f32 %v8782_v45, %v10697_v11 }
 0x5a8   : > { %v5808_v30 = vpop.xlane.xlu0 %5807  ;;  %6289 = vmatprep.mubr.bf16.mxu1 %v11095_v10 }
 0x5a9   : > { %8789 = vrcp.f32 %v5808_v30  ;;  %6522 = vst [vmem:[%s10480_s7 + $0x1b0] sm:$0xff] %v5937_v52 }
 0x5aa   : > { %v8784_v56 = vpop.eup %8783 }
 0x5ab   : > { %v5938_v25 = vmul.f32 %v8784_v56, %v10704_v53 }
 0x5ac   : > { %v5810_v37 = vpop.xlane.xlu1 %5809 }
 0x5ad   : > { %8791 = vrcp.f32 %v5810_v37  ;;  %v5974_v54 = vpack.c.bf16 %v5938_v25, %v5937_v52  ;;  %6523 = vst [vmem:[%s10480_s7 + $0x1b8] sm:$0xff] %v5938_v25 }
 0x5ae   : > { %v8786_v48 = vpop.eup %8785 }
 0x5af   : > { %6290 = vmatmul.mubr.bf16.gmra.mxu1 %v5974_v54  ;;  %v5939_v28 = vmul.f32 %v8786_v48, %v10716_v7 }
 0x5b0   : > { %v5812_v11 = vpop.xlane.xlu0 %5811  ;;  %6299 = vmatprep.mubr.bf16.mxu1 %v11095_v10 }
 0x5b1   : > { %8793 = vrcp.f32 %v5812_v11  ;;  %6524 = vst [vmem:[%s10480_s7 + $0x1c0] sm:$0xff] %v5939_v28 }
 0x5b2   : > { %v8788_v18 = vpop.eup %8787 }
 0x5b3   : > { %v5940_v51 = vmul.f32 %v8788_v18, %v10724_v15 }
 0x5b4   : > { %v5814_v53 = vpop.xlane.xlu1 %5813 }
 0x5b5   : > { %8795 = vrcp.f32 %v5814_v53  ;;  %v5975_v55 = vpack.c.bf16 %v5940_v51, %v5939_v28  ;;  %6525 = vst [vmem:[%s10480_s7 + $0x1c8] sm:$0xff] %v5940_v51 }
 0x5b6   : > { %v8790_v14 = vpop.eup %8789 }
 0x5b7   : > { %v6141_v42 = vpop.f32.mrf.mxu1  ;;  %6300 = vmatmul.mubr.bf16.gmra.mxu1 %v5975_v55  ;;  %v5941_v7 = vmul.f32 %v8790_v14, %v10733_v23 }
 0x5b8   : > { %6388 = vst [vmem:[%s10714_s12 + $0x180] sm:$0xff] %v6141_v42  ;;  %v5816_v34 = vpop.xlane.xlu0 %5815  ;;  %6309 = vmatprep.mubr.bf16.mxu1 %v11095_v10 }
 0x5b9   : > { %8797 = vrcp.f32 %v5816_v34  ;;  %v6143_v3 = vpop.f32.mrf.mxu1  ;;  %6526 = vst [vmem:[%s10480_s7 + $0x1d0] sm:$0xff] %v5941_v7 }
 0x5ba   : > { %v8792_v15 = vpop.eup %8791  ;;  %6389 = vst.msk [vmem:[%s10714_s12 + $0x188] sm:$0xff] %vm853_vm0, %v6143_v3 }
 0x5bb   : > { %v6145_v1 = vpop.f32.mrf.mxu1  ;;  %v5942_v32 = vmul.f32 %v8792_v15, %v10742_v26 }
 0x5bc   : > { %6390 = vst [vmem:[%s10714_s12 + $0x190] sm:$0xff] %v6145_v1 }
 0x5bd   : > { %v5818_v47 = vpop.xlane.xlu1 %5817  ;;  %v6147_v23 = vpop.f32.mrf.mxu1  ;;  %v5976_v41 = vpack.c.bf16 %v5942_v32, %v5941_v7  ;;  %6527 = vst [vmem:[%s10480_s7 + $0x1d8] sm:$0xff] %v5942_v32 }
 0x5be   : > { %v8794_v0 = vpop.eup %8793  ;;  %8799 = vrcp.f32 %v5818_v47  ;;  %6391 = vst.msk [vmem:[%s10714_s12 + $0x198] sm:$0xff] %vm853_vm0, %v6147_v23 }
 0x5bf   : > { %6310 = vmatmul.mubr.bf16.gmra.mxu1 %v5976_v41  ;;  %v5943_v33 = vmul.f32 %v8794_v0, %v10751_v13 }
 0x5c0   : > { %v6151_v9 = vpop.f32.mrf.mxu1  ;;  %6319 = vmatprep.mubr.bf16.mxu1 %v11095_v10 }
 0x5c1   : > { %6392 = vst [vmem:[%s10714_s12 + $0x1a0] sm:$0xff] %v6151_v9  ;;  %6528 = vst [vmem:[%s10480_s7 + $0x1e0] sm:$0xff] %v5943_v33 }
 0x5c2   : > { %v8796_v26 = vpop.eup %8795  ;;  %v6153_v8 = vpop.f32.mrf.mxu1 }
 0x5c3   : > { %6393 = vst.msk [vmem:[%s10714_s12 + $0x1a8] sm:$0xff] %vm853_vm0, %v6153_v8  ;;  %v5944_v35 = vmul.f32 %v8796_v26, %v10760_v2 }
 0x5c4   : > { %v6155_v39 = vpop.f32.mrf.mxu1 }
 0x5c5   : > { %6394 = vst [vmem:[%s10714_s12 + $0x1b0] sm:$0xff] %v6155_v39  ;;  %v5977_v40 = vpack.c.bf16 %v5944_v35, %v5943_v33  ;;  %6529 = vst [vmem:[%s10480_s7 + $0x1e8] sm:$0xff] %v5944_v35 }
 0x5c6   : > { %v8798_v13 = vpop.eup %8797  ;;  %v6157_v59 = vpop.f32.mrf.mxu1 }
 0x5c7   : > { %6395 = vst.msk [vmem:[%s10714_s12 + $0x1b8] sm:$0xff] %vm853_vm0, %v6157_v59  ;;  %6320 = vmatmul.mubr.bf16.gmra.mxu1 %v5977_v40  ;;  %v5945_v49 = vmul.f32 %v8798_v13, %v10768_v21 }
 0x5c8   : > { %v6161_v43 = vpop.f32.mrf.mxu1  ;;  %6329 = vmatprep.mubr.bf16.mxu1 %v11095_v10 }
 0x5c9   : > { %6396 = vst [vmem:[%s10714_s12 + $0x1c0] sm:$0xff] %v6161_v43  ;;  %6530 = vst [vmem:[%s10480_s7 + $0x1f0] sm:$0xff] %v5945_v49 }
 0x5ca   : > { %v6163_v2 = vpop.f32.mrf.mxu1 }
 0x5cb   : > { %v8800_v57 = vpop.eup %8799  ;;  %6397 = vst.msk [vmem:[%s10714_s12 + $0x1c8] sm:$0xff] %vm853_vm0, %v6163_v2 }
 0x5cc   : > { %v6165_v27 = vpop.f32.mrf.mxu1  ;;  %v5946_v60 = vmul.f32 %v8800_v57, %v10778_v44 }
 0x5cd   : > { %6398 = vst [vmem:[%s10714_s12 + $0x1d0] sm:$0xff] %v6165_v27 }
 0x5ce   : > { %v6167_v46 = vpop.f32.mrf.mxu1  ;;  %v5978_v21 = vpack.c.bf16 %v5946_v60, %v5945_v49  ;;  %6531 = vst [vmem:[%s10480_s7 + $0x1f8] sm:$0xff] %v5946_v60 }
 0x5cf   : > { %6399 = vst.msk [vmem:[%s10714_s12 + $0x1d8] sm:$0xff] %vm853_vm0, %v6167_v46 }
 0x5d0   : > { %v6171_v10 = vpop.f32.mrf.mxu1  ;;  %6330 = vmatmul.mubr.bf16.gmra.mxu1 %v5978_v21 }
 0x5d1   : > { %6400 = vst [vmem:[%s10714_s12 + $0x1e0] sm:$0xff] %v6171_v10 }
 0x5d2   : > { %v6173_v19 = vpop.f32.mrf.mxu1 }
 0x5d3   : > { %6401 = vst.msk [vmem:[%s10714_s12 + $0x1e8] sm:$0xff] %vm853_vm0, %v6173_v19 }
 0x5d4   : > { %v6175_v62 = vpop.f32.mrf.mxu1 }
 0x5d5   : > { %6402 = vst [vmem:[%s10714_s12 + $0x1f0] sm:$0xff] %v6175_v62 }
 0x5d6   : > { %v6177_v44 = vpop.f32.mrf.mxu1 }
 0x5d7   : > { %6403 = vst.msk [vmem:[%s10714_s12 + $0x1f8] sm:$0xff] %vm853_vm0, %v6177_v44 }
 0x5d8   : > { %v6181_v16 = vpop.f32.mrf.mxu1 }
 0x5d9   : > { %6404 = vst [vmem:[%s10714_s12 + $0x200] sm:$0xff] %v6181_v16 }
 0x5da   : > { %v6183_v63 = vpop.f32.mrf.mxu1 }
 0x5db   : > { %6405 = vst.msk [vmem:[%s10714_s12 + $0x208] sm:$0xff] %vm853_vm0, %v6183_v63 }
 0x5dc   : > { %v6185_v29 = vpop.f32.mrf.mxu1 }
 0x5dd   : > { %6406 = vst [vmem:[%s10714_s12 + $0x210] sm:$0xff] %v6185_v29 }
 0x5de   : > { %v6187_v36 = vpop.f32.mrf.mxu1 }
 0x5df   : > { %6407 = vst.msk [vmem:[%s10714_s12 + $0x218] sm:$0xff] %vm853_vm0, %v6187_v36 }
 0x5e0   : > { %v6191_v4 = vpop.f32.mrf.mxu1 }
 0x5e1   : > { %6408 = vst [vmem:[%s10714_s12 + $0x220] sm:$0xff] %v6191_v4 }
 0x5e2   : > { %v6193_v20 = vpop.f32.mrf.mxu1 }
 0x5e3   : > { %6409 = vst.msk [vmem:[%s10714_s12 + $0x228] sm:$0xff] %vm853_vm0, %v6193_v20 }
 0x5e4   : > { %v6195_v50 = vpop.f32.mrf.mxu1 }
 0x5e5   : > { %6410 = vst [vmem:[%s10714_s12 + $0x230] sm:$0xff] %v6195_v50 }
 0x5e6   : > { %v6197_v38 = vpop.f32.mrf.mxu1 }
 0x5e7   : > { %6411 = vst.msk [vmem:[%s10714_s12 + $0x238] sm:$0xff] %vm853_vm0, %v6197_v38 }
 0x5e8   : > { %v6201_v5 = vpop.f32.mrf.mxu1 }
 0x5e9   : > { %6412 = vst [vmem:[%s10714_s12 + $0x240] sm:$0xff] %v6201_v5 }
 0x5ea   : > { %v6203_v24 = vpop.f32.mrf.mxu1 }
 0x5eb   : > { %6413 = vst.msk [vmem:[%s10714_s12 + $0x248] sm:$0xff] %vm853_vm0, %v6203_v24 }
 0x5ec   : > { %v6205_v58 = vpop.f32.mrf.mxu1 }
 0x5ed   : > { %6414 = vst [vmem:[%s10714_s12 + $0x250] sm:$0xff] %v6205_v58 }
 0x5ee   : > { %v6207_v61 = vpop.f32.mrf.mxu1 }
 0x5ef   : > { %6415 = vst.msk [vmem:[%s10714_s12 + $0x258] sm:$0xff] %vm853_vm0, %v6207_v61 }
 0x5f0   : > { %v6211_v17 = vpop.f32.mrf.mxu1 }
 0x5f1   : > { %6416 = vst [vmem:[%s10714_s12 + $0x260] sm:$0xff] %v6211_v17 }
 0x5f2   : > { %v6213_v22 = vpop.f32.mrf.mxu1 }
 0x5f3   : > { %6417 = vst.msk [vmem:[%s10714_s12 + $0x268] sm:$0xff] %vm853_vm0, %v6213_v22 }
 0x5f4   : > { %v6215_v12 = vpop.f32.mrf.mxu1 }
 0x5f5   : > { %6418 = vst [vmem:[%s10714_s12 + $0x270] sm:$0xff] %v6215_v12 }
 0x5f6   : > { %v6217_v31 = vpop.f32.mrf.mxu1 }
 0x5f7   : > { %6419 = vst.msk [vmem:[%s10714_s12 + $0x278] sm:$0xff] %vm853_vm0, %v6217_v31 }
 0x5f9   : > { %v6221_v6 = vpop.f32.mrf.mxu1 }
 0x5fa   : > { %6420 = vst [vmem:[%s10714_s12 + $0x280] sm:$0xff] %v6221_v6 }
 0x5fb   : > { %v6223_v45 = vpop.f32.mrf.mxu1 }
 0x5fc   : > { %6421 = vst.msk [vmem:[%s10714_s12 + $0x288] sm:$0xff] %vm853_vm0, %v6223_v45 }
 0x5fd   : > { %v6225_v52 = vpop.f32.mrf.mxu1 }
 0x5fe   : > { %6422 = vst [vmem:[%s10714_s12 + $0x290] sm:$0xff] %v6225_v52 }
 0x5ff   : > { %v6227_v30 = vpop.f32.mrf.mxu1 }
 0x600   : > { %6423 = vst.msk [vmem:[%s10714_s12 + $0x298] sm:$0xff] %vm853_vm0, %v6227_v30 }
 0x601   : > { %v6231_v56 = vpop.f32.mrf.mxu1 }
 0x602   : > { %6424 = vst [vmem:[%s10714_s12 + $0x2a0] sm:$0xff] %v6231_v56 }
 0x603   : > { %v6233_v25 = vpop.f32.mrf.mxu1 }
 0x604   : > { %6425 = vst.msk [vmem:[%s10714_s12 + $0x2a8] sm:$0xff] %vm853_vm0, %v6233_v25 }
 0x605   : > { %v6235_v37 = vpop.f32.mrf.mxu1 }
 0x606   : > { %6426 = vst [vmem:[%s10714_s12 + $0x2b0] sm:$0xff] %v6235_v37 }
 0x607   : > { %v6237_v54 = vpop.f32.mrf.mxu1 }
 0x608   : > { %6427 = vst.msk [vmem:[%s10714_s12 + $0x2b8] sm:$0xff] %vm853_vm0, %v6237_v54 }
 0x609   : > { %v6241_v48 = vpop.f32.mrf.mxu1 }
 0x60a   : > { %6428 = vst [vmem:[%s10714_s12 + $0x2c0] sm:$0xff] %v6241_v48 }
 0x60b   : > { %v6243_v28 = vpop.f32.mrf.mxu1 }
 0x60c   : > { %6429 = vst.msk [vmem:[%s10714_s12 + $0x2c8] sm:$0xff] %vm853_vm0, %v6243_v28 }
 0x60d   : > { %v6245_v11 = vpop.f32.mrf.mxu1 }
 0x60e   : > { %6430 = vst [vmem:[%s10714_s12 + $0x2d0] sm:$0xff] %v6245_v11 }
 0x60f   : > { %v6247_v18 = vpop.f32.mrf.mxu1 }
 0x610   : > { %6431 = vst.msk [vmem:[%s10714_s12 + $0x2d8] sm:$0xff] %vm853_vm0, %v6247_v18 }
 0x611   : > { %v6251_v51 = vpop.f32.mrf.mxu1 }
 0x612   : > { %6432 = vst [vmem:[%s10714_s12 + $0x2e0] sm:$0xff] %v6251_v51 }
 0x613   : > { %v6253_v53 = vpop.f32.mrf.mxu1 }
 0x614   : > { %6433 = vst.msk [vmem:[%s10714_s12 + $0x2e8] sm:$0xff] %vm853_vm0, %v6253_v53 }
 0x615   : > { %v6255_v55 = vpop.f32.mrf.mxu1 }
 0x616   : > { %6434 = vst [vmem:[%s10714_s12 + $0x2f0] sm:$0xff] %v6255_v55 }
 0x617   : > { %v6257_v14 = vpop.f32.mrf.mxu1 }
 0x618   : > { %6435 = vst.msk [vmem:[%s10714_s12 + $0x2f8] sm:$0xff] %vm853_vm0, %v6257_v14 }
 0x619   : > { %8848 = shalt.err (!%p8845_p3)
}
 0x61a   : > { %s8849_s30 = scalar_lea.hbm %s10967_s20, 8192  ;;  %s8853_s7 = scalar_lea.hbm %s11066_s4, 16384 }
 0x61b   : > { %p8850_p4 = scmp.ne.s32.totalorder %s10967_s20, %s8849_s30  ;;  %p8854_p9 = scmp.lt.s32.totalorder %s10967_s20, %s11066_s4 }
 0x61c   : > { %p8855_p10 = scmp.lt.s32.totalorder %s8853_s7, %s8849_s30 }
 0x61d   : > { %p8851_p7 = pnand %p8850_p4, %p8964_p5 }
 0x61e   : > { %p8856_p11 = por %p8855_p10, %p8854_p9 }
 0x61f   : > { %p8852_p8 = pneg %p8851_p7 }
 0x621   : > { %p8857_p12 = pnand %p8856_p11, %p8852_p8 }
 0x623   : > { %8860 = shalt.err (!%p8857_p12)
}
 0x624   : > { %s8899_s11 = smov 128   ;;  %s8900_s5 = smov 8  }
 0x625   : > { %7690 = dma.vmem_to_hbm [thread:$0]  (%p8964_p5), %s10970_s22, 8192, %s10967_s20, %s10974_s23, %s8899_s11, %s8899_s11, %s8900_s5  }
 0x657   : > { %v6261_v42 = vpop.f32.mrf.mxu1 }
 0x658   : > { %6436 = vst [vmem:[%s10714_s12 + $0x300] sm:$0xff] %v6261_v42 }
 0x659   : > { %v6263_v7 = vpop.f32.mrf.mxu1 }
 0x65a   : > { %6437 = vst.msk [vmem:[%s10714_s12 + $0x308] sm:$0xff] %vm853_vm0, %v6263_v7 }
 0x65b   : > { %v6265_v34 = vpop.f32.mrf.mxu1 }
 0x65c   : > { %6438 = vst [vmem:[%s10714_s12 + $0x310] sm:$0xff] %v6265_v34 }
 0x65d   : > { %v6267_v3 = vpop.f32.mrf.mxu1 }
 0x65e   : > { %6439 = vst.msk [vmem:[%s10714_s12 + $0x318] sm:$0xff] %vm853_vm0, %v6267_v3 }
 0x65f   : > { %v6271_v15 = vpop.f32.mrf.mxu1 }
 0x660   : > { %6440 = vst [vmem:[%s10714_s12 + $0x320] sm:$0xff] %v6271_v15 }
 0x661   : > { %v6273_v1 = vpop.f32.mrf.mxu1 }
 0x662   : > { %6441 = vst.msk [vmem:[%s10714_s12 + $0x328] sm:$0xff] %vm853_vm0, %v6273_v1 }
 0x663   : > { %v6275_v32 = vpop.f32.mrf.mxu1 }
 0x664   : > { %6442 = vst [vmem:[%s10714_s12 + $0x330] sm:$0xff] %v6275_v32 }
 0x665   : > { %v6277_v47 = vpop.f32.mrf.mxu1 }
 0x666   : > { %6443 = vst.msk [vmem:[%s10714_s12 + $0x338] sm:$0xff] %vm853_vm0, %v6277_v47 }
 0x667   : > { %v6281_v23 = vpop.f32.mrf.mxu1 }
 0x668   : > { %6444 = vst [vmem:[%s10714_s12 + $0x340] sm:$0xff] %v6281_v23 }
 0x669   : > { %v6283_v41 = vpop.f32.mrf.mxu1 }
 0x66a   : > { %6445 = vst.msk [vmem:[%s10714_s12 + $0x348] sm:$0xff] %vm853_vm0, %v6283_v41 }
 0x66b   : > { %v6285_v0 = vpop.f32.mrf.mxu1 }
 0x66c   : > { %6446 = vst [vmem:[%s10714_s12 + $0x350] sm:$0xff] %v6285_v0 }
 0x66d   : > { %v6287_v33 = vpop.f32.mrf.mxu1 }
 0x66e   : > { %6447 = vst.msk [vmem:[%s10714_s12 + $0x358] sm:$0xff] %vm853_vm0, %v6287_v33 }
 0x66f   : > { %v6291_v9 = vpop.f32.mrf.mxu1 }
 0x670   : > { %6448 = vst [vmem:[%s10714_s12 + $0x360] sm:$0xff] %v6291_v9 }
 0x671   : > { %v6293_v26 = vpop.f32.mrf.mxu1 }
 0x672   : > { %6449 = vst.msk [vmem:[%s10714_s12 + $0x368] sm:$0xff] %vm853_vm0, %v6293_v26 }
 0x673   : > { %v6295_v8 = vpop.f32.mrf.mxu1 }
 0x674   : > { %6450 = vst [vmem:[%s10714_s12 + $0x370] sm:$0xff] %v6295_v8 }
 0x675   : > { %v6297_v35 = vpop.f32.mrf.mxu1 }
 0x676   : > { %6451 = vst.msk [vmem:[%s10714_s12 + $0x378] sm:$0xff] %vm853_vm0, %v6297_v35 }
 0x677   : > { %v6301_v39 = vpop.f32.mrf.mxu1 }
 0x678   : > { %6452 = vst [vmem:[%s10714_s12 + $0x380] sm:$0xff] %v6301_v39 }
 0x679   : > { %v6303_v40 = vpop.f32.mrf.mxu1 }
 0x67a   : > { %6453 = vst.msk [vmem:[%s10714_s12 + $0x388] sm:$0xff] %vm853_vm0, %v6303_v40 }
 0x67b   : > { %v6305_v13 = vpop.f32.mrf.mxu1 }
 0x67c   : > { %6454 = vst [vmem:[%s10714_s12 + $0x390] sm:$0xff] %v6305_v13 }
 0x67d   : > { %v6307_v59 = vpop.f32.mrf.mxu1 }
 0x67e   : > { %6455 = vst.msk [vmem:[%s10714_s12 + $0x398] sm:$0xff] %vm853_vm0, %v6307_v59 }
 0x67f   : > { %v6311_v49 = vpop.f32.mrf.mxu1 }
 0x680   : > { %6456 = vst [vmem:[%s10714_s12 + $0x3a0] sm:$0xff] %v6311_v49 }
 0x681   : > { %v6313_v43 = vpop.f32.mrf.mxu1 }
 0x682   : > { %6457 = vst.msk [vmem:[%s10714_s12 + $0x3a8] sm:$0xff] %vm853_vm0, %v6313_v43 }
 0x683   : > { %v6315_v2 = vpop.f32.mrf.mxu1 }
 0x684   : > { %6458 = vst [vmem:[%s10714_s12 + $0x3b0] sm:$0xff] %v6315_v2 }
 0x685   : > { %v6317_v57 = vpop.f32.mrf.mxu1 }
 0x686   : > { %6459 = vst.msk [vmem:[%s10714_s12 + $0x3b8] sm:$0xff] %vm853_vm0, %v6317_v57 }
 0x687   : > { %v6321_v27 = vpop.f32.mrf.mxu1 }
 0x688   : > { %6460 = vst [vmem:[%s10714_s12 + $0x3c0] sm:$0xff] %v6321_v27 }
 0x689   : > { %v6323_v60 = vpop.f32.mrf.mxu1 }
 0x68a   : > { %6461 = vst.msk [vmem:[%s10714_s12 + $0x3c8] sm:$0xff] %vm853_vm0, %v6323_v60 }
 0x68b   : > { %v6325_v46 = vpop.f32.mrf.mxu1 }
 0x68c   : > { %6462 = vst [vmem:[%s10714_s12 + $0x3d0] sm:$0xff] %v6325_v46 }
 0x68d   : > { %v6327_v21 = vpop.f32.mrf.mxu1 }
 0x68e   : > { %6463 = vst.msk [vmem:[%s10714_s12 + $0x3d8] sm:$0xff] %vm853_vm0, %v6327_v21 }
 0x690   : > { %v6331_v10 = vpop.f32.mrf.mxu1 }
 0x691   : > { %6464 = vst [vmem:[%s10714_s12 + $0x3e0] sm:$0xff] %v6331_v10 }
 0x692   : > { %v6333_v19 = vpop.f32.mrf.mxu1 }
 0x693   : > { %6465 = vst.msk [vmem:[%s10714_s12 + $0x3e8] sm:$0xff] %vm853_vm0, %v6333_v19 }
 0x694   : > { %v6335_v62 = vpop.f32.mrf.mxu1 }
 0x695   : > { %6466 = vst [vmem:[%s10714_s12 + $0x3f0] sm:$0xff] %v6335_v62 }
 0x696   : > { %v6337_v44 = vpop.f32.mrf.mxu1 }
 0x697   : > { %6467 = vst.msk [vmem:[%s10714_s12 + $0x3f8] sm:$0xff] %vm853_vm0, %v6337_v44 }
 0x698 PF: > { %p7696_p5 = scmp.ge.s32.totalorder %s8895_s18, 2  ;;  %s6577_s25 = sand.u32 1, %s8883_s15  }
 0x699   : > { %s6578_s13 = scalar_lea.sflag [#allocation4], %s6577_s25 }
 0x69a   : > { %p7693_p13 = pnand %p7696_p5, %p8968_p6 }
 0x69c   : > { %p7694_p0 = pneg %p7693_p13 }
 0x69e   : > { %8878 = dma.done.wait (%p7694_p0), %s6578_s13, 8192  }
 0x69f   : > { %8880 = vsyncadd (%p7694_p0), %s6578_s13, 4294959104  ;;  %p15_p1 = scmp.ge.s32.totalorder %s8951_s21, 4   ;;  %s11108_s15 = smov %s8887_s16 }
 0x6a0   : > { %s11109_s16 = smov %s8891_s17  ;;  %s11110_s17 = smov %s8962_s24 }
 0x6a1   : > { %s11111_s18 = smov %s8951_s21  ;;  %17 = sbr.rel (!%p15_p1) target bundleno = 3 (0x3), region = 86 }
 0x6a6   :  { %6583 = vsyncpa [#allocation4], 1 }
 0x6a7   :  { %6585 = vsyncpa [#allocation4 + $0x1], 1 }

</bundles_post_ra>
